<compile_context>
chip_gen: v7x
topology: tpu7x:2x2x1
jax: 0.10.0
libtpu: 0.0.40
codegen_flags: <defaults>
</compile_context>

<pallas_src>
import functools
import math

import jax
import jax.numpy as jnp
from jax import lax
from jax.experimental import pallas as pl
from jax.experimental.pallas import tpu as pltpu

_EPS = 1e-12                                     # F.normalize eps
_RRELU_SLOPE = (1.0 / 8.0 + 1.0 / 3.0) / 2.0     # F.rrelu eval-mode slope


def _round_up(x, m):
    return (x + m - 1) // m * m


def _l2norm_f32(x):
    # F.normalize(x, p=2, dim=1, eps=1e-12) == x / max(||x||, eps)
    #                                       == x * rsqrt(max(sum(x^2), eps^2))
    ss = jnp.sum(x * x, axis=-1, keepdims=True)
    return x * lax.rsqrt(jnp.maximum(ss, _EPS * _EPS))


# ---------------------------------------------------------------------------
# One ERDNet timestep, K-tiled over entity columns with a resident H.
#   acc   = sum_k A[i,k] @ H[k]                      (edge-count aggregation)
#   agg   = (acc + Mraw[i]) * inv_deg[i]             (mean over in-edges)
#   y     = H[i] @ [W_self | W_time_gate]            (fused N=2h matmul)
#   tmp   = l2norm(rrelu(agg @ W_n + y[:, :h]))      (RGCN layer, eval mode)
#   gate  = sigmoid(y[:, h:] + b)                    (time gate)
#   out   = l2norm(gate * tmp + (1 - gate) * H[i])
# ---------------------------------------------------------------------------
def erdnet_step_kernel(a_ref, h_ref, m_ref, invdeg_ref,
                       wn_ref, wst_ref, b_ref,
                       outf_ref, outb_ref):
    i = pl.program_id(0)
    k = pl.program_id(1)
    tm, tk = a_ref.shape
    hp = m_ref.shape[-1]

    @pl.when(k == 0)
    def _init():
        # f32 output block is resident across the k axis -> use it as the
        # accumulator (no extra VMEM scratch).
        outf_ref[...] = jnp.zeros_like(outf_ref)

    # bf16 MXU matmul, f32 accumulation.  H K-tile is sliced from the
    # resident VMEM copy (no HBM re-read).
    k_start = pl.multiple_of(k * tk, tk)
    hk = h_ref[pl.ds(k_start, tk), :]
    outf_ref[...] += jnp.dot(a_ref[...], hk, preferred_element_type=jnp.float32)

    @pl.when(k == pl.num_programs(1) - 1)
    def _epilogue():
        row_start = pl.multiple_of(i * tm, tm)
        h_tile_bf = h_ref[pl.ds(row_start, tm), :]          # (tm, h) bf16
        h_tile = h_tile_bf.astype(jnp.float32)

        # Mean aggregation: counts * (1/deg) applied post-matmul; the raw
        # relation message Mraw = Rm @ R gets the same scaling.
        agg = (outf_ref[...] + m_ref[...]) * invdeg_ref[...]

        # Fused self/time-gate matmul: N = 2h (>=256) fills the MXU.
        y = jnp.dot(h_tile_bf, wst_ref[...], preferred_element_type=jnp.float32)
        pre = jnp.dot(agg.astype(jnp.bfloat16), wn_ref[...],
                      preferred_element_type=jnp.float32) + y[:, :hp]

        # F.rrelu in eval mode == leaky relu with slope (lower + upper) / 2.
        tmp = jnp.where(pre >= 0.0, pre, _RRELU_SLOPE * pre)
        tmp = _l2norm_f32(tmp)

        gate = jax.nn.sigmoid(y[:, hp:] + b_ref[...])

        new = gate * tmp + (1.0 - gate) * h_tile
        new = _l2norm_f32(new)
        outf_ref[...] = new
        outb_ref[...] = new.astype(jnp.bfloat16)


def _vmem_limit_bytes(Ep, hp, tm, tk):
    # Rough double-buffered working-set estimate; only override the default
    # scoped limit when we actually need more, and never exceed v7x's 64 MiB
    # physical VMEM (shrink tiles / drop the resident H instead).
    est = (2 * tm * tk * 2          # A tile (bf16)
           + 2 * Ep * hp * 2        # resident H (bf16)
           + 2 * tm * hp * 4        # M tile (f32)
           + 2 * tm * 128 * 4       # inv_deg tile (lane-padded)
           + 2 * hp * hp * 2        # W_neighbor (bf16)
           + 2 * hp * 2 * hp * 2    # [W_self | W_time_gate] (bf16)
           + 2 * 8 * hp * 4         # bias row
           + 2 * tm * hp * 4        # f32 output
           + 2 * tm * hp * 2)       # bf16 output
    est = int(est * 1.25) + (1 << 20)
    if est <= 30 * 1024 * 1024:
        return None
    return min(est, 64 * 1024 * 1024)


def erdnet_step(A_bf, H_bf, M, inv_deg, Wn, Wst, b_row, *, tm, tk):
    Ep, hp = H_bf.shape
    limit = _vmem_limit_bytes(Ep, hp, tm, tk)
    return pl.pallas_call(
        erdnet_step_kernel,
        out_shape=(jax.ShapeDtypeStruct((Ep, hp), jnp.float32),
                   jax.ShapeDtypeStruct((Ep, hp), jnp.bfloat16)),
        grid_spec=pltpu.PrefetchScalarGridSpec(
            num_scalar_prefetch=0,
            grid=(Ep // tm, Ep // tk),
            in_specs=[
                pl.BlockSpec((tm, tk), lambda i, k: (i, k)),      # A counts  (bf16)
                pl.BlockSpec((Ep, hp), lambda i, k: (0, 0)),      # H resident (bf16)
                pl.BlockSpec((tm, hp), lambda i, k: (i, 0)),      # rel msg raw (f32)
                pl.BlockSpec((tm, 1), lambda i, k: (i, 0)),       # 1/deg      (f32)
                pl.BlockSpec((hp, hp), lambda i, k: (0, 0)),      # W_neighbor (bf16)
                pl.BlockSpec((hp, 2 * hp), lambda i, k: (0, 0)),  # W_self|W_t (bf16)
                pl.BlockSpec((1, hp), lambda i, k: (0, 0)),       # gate bias  (f32)
            ],
            out_specs=[
                pl.BlockSpec((tm, hp), lambda i, k: (i, 0)),      # f32 (also the acc)
                pl.BlockSpec((tm, hp), lambda i, k: (i, 0)),      # bf16 carry
            ],
        ),
        # Row axis parallel (megacore sharding), K reduction arbitrary.
        compiler_params=pltpu.CompilerParams(
            dimension_semantics=("parallel", "arbitrary"),
            vmem_limit_bytes=limit),
    )(A_bf, H_bf, M, inv_deg, Wn, Wst, b_row)


# ---------------------------------------------------------------------------
# Glue: dense graph matrices, padding, temporal scan (plain JAX around the
# per-timestep Pallas kernel).
# ---------------------------------------------------------------------------
def build_graph_mats(src, rel_idx, dst, num_E_pad, num_R2):
    # Raw in-edge counts; 1/deg is applied inside the kernel after the matmul.
    # TODO(synk): counts > 256 lose exactness in bf16; clamp or use f32/int8.
    A = jnp.zeros((num_E_pad, num_E_pad), jnp.float32).at[dst, src].add(1.0)
    Rm = jnp.zeros((num_E_pad, num_R2), jnp.float32).at[dst, rel_idx].add(1.0)
    deg = jnp.maximum(jnp.sum(A, axis=1, keepdims=True), 1.0)
    return A, Rm, 1.0 / deg


@functools.partial(jax.jit,
                   static_argnames=("num_E", "num_R", "h_dim", "tm", "tk"))
def _erdnet_forward_core(params, src_stack, rel_stack, dst_stack,
                         *, num_E, num_R, h_dim, tm, tk):
    num_R2 = 2 * num_R
    row_mult = tm * tk // math.gcd(tm, tk)
    Ep = _round_up(num_E, row_mult)        # entity rows padded to tile multiple
    hp = _round_up(h_dim, 128)             # lane-dense feature axis

    def pad2(x, r, c):
        return jnp.pad(x, ((0, r - x.shape[0]), (0, c - x.shape[1])))

    # One-time normalize in plain JAX (runs once).
    ent0 = _l2norm_f32(params["ent_embs"].astype(jnp.float32))
    rel_n = _l2norm_f32(params["rel_embs"].astype(jnp.float32))
    # e_r_bias is normalized in the reference but unused when use_bias == 0.

    ent0_bf = pad2(ent0, Ep, hp).astype(jnp.bfloat16)     # bf16 carried state
    rel_p = pad2(rel_n, num_R2, hp)

    Wn = pad2(params["W_neighbor"].astype(jnp.float32), hp, hp).astype(jnp.bfloat16)
    Ws = pad2(params["W_self"].astype(jnp.float32), hp, hp)
    Wt = pad2(params["time_gate_weight"].astype(jnp.float32), hp, hp)
    Wst = jnp.concatenate([Ws, Wt], axis=1).astype(jnp.bfloat16)   # (hp, 2hp)
    b_row = jnp.pad(params["time_gate_bias"].astype(jnp.float32).reshape(1, h_dim),
                    ((0, 0), (0, hp - h_dim)))

    def step(ent_bf, edges):
        src, rel_idx, dst = edges
        A, Rm, inv_deg = build_graph_mats(src, rel_idx, dst, Ep, num_R2)
        # Raw relation message hoisted out of the kernel (K dim = 2R is tiny);
        # the 1/deg scaling is applied inside the kernel together with A@H.
        M = jnp.dot(Rm, rel_p, preferred_element_type=jnp.float32)
        out_f32, out_bf = erdnet_step(A.astype(jnp.bfloat16), ent_bf, M,
                                      inv_deg, Wn, Wst, b_row, tm=tm, tk=tk)
        return out_bf, out_f32

    _, ent_stack = lax.scan(step, ent0_bf, (src_stack, rel_stack, dst_stack))
    return ent_stack[:, :num_E, :h_dim], rel_n


def erdnet_forward(hist_edges, params, *, num_E, num_R, h_dim, tm=256, tk=512):
    """hist_edges: list of (src, rel, dst) int32 arrays; use_bias=0 path."""
    src_stack = jnp.stack([e[0] for e in hist_edges])
    rel_stack = jnp.stack([e[1] for e in hist_edges])
    dst_stack = jnp.stack([e[2] for e in hist_edges])
    ent_stack, rel_n = _erdnet_forward_core(
        params, src_stack, rel_stack, dst_stack,
        num_E=num_E, num_R=num_R, h_dim=h_dim, tm=tm, tk=tk)
    n_t = len(hist_edges)
    ent_list = [ent_stack[t] for t in range(n_t)]
    rel_list = [rel_n for _ in range(n_t)]
    erb_list = [None for _ in range(n_t)]          # use_bias == 0
    return ent_list, rel_list, erb_list


# ---------------------------------------------------------------------------
# Parameter init (matches torch xavier init semantics).
# ---------------------------------------------------------------------------
def xavier_normal(key, shape, gain=1.0):
    fan_in, fan_out = shape[0], shape[1]
    std = gain * jnp.sqrt(2.0 / (fan_in + fan_out))
    return std * jax.random.normal(key, shape, dtype=jnp.float32)


def xavier_uniform(key, shape, gain=1.0):
    fan_in, fan_out = shape[0], shape[1]
    a = gain * jnp.sqrt(6.0 / (fan_in + fan_out))
    return jax.random.uniform(key, shape, dtype=jnp.float32, minval=-a, maxval=a)


if __name__ == "__main__":
    # num_E=900 pads to Ep=1024 -> 4 row tiles (even, both v7x TCs get work)
    # and 2 K tiles, exercising the resident-H K-tiled accumulation path.
    num_E, num_R, h_dim = 900, 4, 128
    n_timesteps, n_edges = 3, 256
    tm, tk = 256, 512

    key = jax.random.PRNGKey(0)
    ks = jax.random.split(key, 10)
    relu_gain = jnp.sqrt(2.0)

    params = {
        "ent_embs": xavier_normal(ks[0], (num_E, h_dim)),
        "rel_embs": xavier_normal(ks[1], (2 * num_R, h_dim)),
        "e_r_bias": jnp.zeros((num_E, h_dim), jnp.float32),
        "time_gate_weight": xavier_uniform(ks[2], (h_dim, h_dim), gain=relu_gain),
        "time_gate_bias": jnp.zeros((h_dim,), jnp.float32),
        "W_neighbor": xavier_uniform(ks[3], (h_dim, h_dim)),
        "W_self": xavier_uniform(ks[4], (h_dim, h_dim)),
    }

    # Synthetic history of graphs (src, rel, dst) per timestep.
    hist_edges = []
    ek = jax.random.split(ks[5], n_timesteps)
    for t in range(n_timesteps):
        e = jax.random.split(ek[t], 3)
        src = jax.random.randint(e[0], (n_edges,), 0, num_E, dtype=jnp.int32)
        rel = jax.random.randint(e[1], (n_edges,), 0, 2 * num_R, dtype=jnp.int32)
        dst = jax.random.randint(e[2], (n_edges,), 0, num_E, dtype=jnp.int32)
        hist_edges.append((src, rel, dst))

    ent_list, rel_list, erb_list = erdnet_forward(
        hist_edges, params, num_E=num_E, num_R=num_R, h_dim=h_dim, tm=tm, tk=tk)

    jax.block_until_ready(ent_list[-1])
    jax.block_until_ready(rel_list[-1])
    assert ent_list[-1].shape == (num_E, h_dim)
    assert rel_list[-1].shape == (2 * num_R, h_dim)
    assert all(b is None for b in erb_list)
    assert bool(jnp.all(jnp.isfinite(ent_list[-1])))
    print("KERNEL_OK")
</pallas_src>

<mosaic_0001>
module attributes {stable_mosaic.version = 11 : i64} {
  func.func private @main(%arg0: i32) attributes {dimension_semantics = [#tpu.dimension_semantics<core_parallel>], iteration_bounds = array<i64: 2>, tpu.core_type = #tpu.core_type<sc_scalar_subcore>, window_params = []} {
    return
  }
}

module attributes {stable_mosaic.version = 11 : i64} {
  func.func private @main(%arg0: i32) attributes {dimension_semantics = [#tpu.dimension_semantics<core_parallel>], iteration_bounds = array<i64: 2>, tpu.core_type = #tpu.core_type<sc_scalar_subcore>, window_params = []} {
    return
  }
}

module attributes {stable_mosaic.version = 11 : i64} {
  func.func @erdnet_step_kernel(%arg0: i32, %arg1: i32, %arg2: memref<256x512xbf16, #tpu.memory_space<vmem>>, %arg3: memref<1024x128xbf16, #tpu.memory_space<vmem>>, %arg4: memref<256x128xf32, #tpu.memory_space<vmem>>, %arg5: memref<256x1xf32, #tpu.memory_space<vmem>>, %arg6: memref<128x128xbf16, #tpu.memory_space<vmem>>, %arg7: memref<128x256xbf16, #tpu.memory_space<vmem>>, %arg8: memref<1x128xf32, #tpu.memory_space<vmem>>, %arg9: memref<256x128xf32, #tpu.memory_space<vmem>>, %arg10: memref<256x128xbf16, #tpu.memory_space<vmem>>) attributes {dimension_semantics = [#tpu.dimension_semantics<parallel>, #tpu.dimension_semantics<arbitrary>], iteration_bounds = array<i64: 4, 2>, scalar_prefetch = 0 : i64, scratch_operands = 0 : i64, tpu.core_type = #tpu.core_type<tc>, window_params = [{transform_indices = @transform_0, window_bounds = array<i64: 256, 512>}, {pipeline_mode = #tpu.pipeline_mode<synchronous>, transform_indices = @transform_1, window_bounds = array<i64: 1024, 128>}, {transform_indices = @transform_2, window_bounds = array<i64: 256, 128>}, {transform_indices = @transform_3, window_bounds = array<i64: 256, 1>}, {pipeline_mode = #tpu.pipeline_mode<synchronous>, transform_indices = @transform_4, window_bounds = array<i64: 128, 128>}, {pipeline_mode = #tpu.pipeline_mode<synchronous>, transform_indices = @transform_5, window_bounds = array<i64: 128, 256>}, {pipeline_mode = #tpu.pipeline_mode<synchronous>, transform_indices = @transform_6, window_bounds = array<i64: 1, 128>}, {transform_indices = @transform_7, window_bounds = array<i64: 256, 128>}, {transform_indices = @transform_8, window_bounds = array<i64: 256, 128>}]} {
    %c0_i32 = arith.constant 0 : i32
    %0 = arith.cmpi eq, %arg1, %c0_i32 : i32
    %1 = arith.extui %0 : i1 to i32
    %c0_i32_0 = arith.constant 0 : i32
    %2 = arith.cmpi ne, %1, %c0_i32_0 : i32
    scf.if %2 {
      %cst_8 = arith.constant 0.000000e+00 : f32
      %15 = vector.broadcast %cst_8 : f32 to vector<256x128xf32>
      %c0_9 = arith.constant 0 : index
      %c0_10 = arith.constant 0 : index
      %16 = vector.load %arg9[%c0_9, %c0_10] : memref<256x128xf32, #tpu.memory_space<vmem>>, vector<256x128xf32>
      tpu.vector_store %arg9[%c0_9, %c0_10], %15 {strides = array<i32>} : memref<256x128xf32, #tpu.memory_space<vmem>>, vector<256x128xf32>,
    } else {
    }
    %c512_i32 = arith.constant 512 : i32
    %3 = arith.muli %arg1, %c512_i32 : i32
    %4 = tpu.assume_multiple %3, 512 : i32
    %5 = arith.index_cast %4 : i32 to index
    %c0 = arith.constant 0 : index
    %6 = vector.load %arg3[%5, %c0] : memref<1024x128xbf16, #tpu.memory_space<vmem>>, vector<512x128xbf16>
    %c0_1 = arith.constant 0 : index
    %c0_2 = arith.constant 0 : index
    %7 = vector.load %arg9[%c0_1, %c0_2] : memref<256x128xf32, #tpu.memory_space<vmem>>, vector<256x128xf32>
    %c0_3 = arith.constant 0 : index
    %c0_4 = arith.constant 0 : index
    %8 = vector.load %arg2[%c0_3, %c0_4] : memref<256x512xbf16, #tpu.memory_space<vmem>>, vector<256x512xbf16>
    %cst = arith.constant dense<0.000000e+00> : vector<256x128xf32>
    %9 = tpu.matmul %8, %6, %cst {dimension_numbers = #tpu.dot_dimension_numbers<[1], [0], [0], [1], [0, 0, 1, 1], [], []>} : vector<256x512xbf16>, vector<512x128xbf16>, vector<256x128xf32> -> vector<256x128xf32>
    %10 = arith.addf %7, %9 : vector<256x128xf32>
    %c0_5 = arith.constant 0 : index
    %c0_6 = arith.constant 0 : index
    %11 = vector.load %arg9[%c0_5, %c0_6] : memref<256x128xf32, #tpu.memory_space<vmem>>, vector<256x128xf32>
    tpu.vector_store %arg9[%c0_5, %c0_6], %10 {strides = array<i32>} : memref<256x128xf32, #tpu.memory_space<vmem>>, vector<256x128xf32>,
    %c1_i32 = arith.constant 1 : i32
    %12 = arith.cmpi eq, %arg1, %c1_i32 : i32
    %13 = arith.extui %12 : i1 to i32
    %c0_i32_7 = arith.constant 0 : i32
    %14 = arith.cmpi ne, %13, %c0_i32_7 : i32
    scf.if %14 {
      %c256_i32 = arith.constant 256 : i32
      %15 = arith.muli %arg0, %c256_i32 : i32
      %16 = tpu.assume_multiple %15, 256 : i32
      %17 = arith.index_cast %16 : i32 to index
      %c0_8 = arith.constant 0 : index
      %18 = vector.load %arg3[%17, %c0_8] : memref<1024x128xbf16, #tpu.memory_space<vmem>>, vector<256x128xbf16>
      %19 = arith.extf %18 : vector<256x128xbf16> to vector<256x128xf32>
      %c0_9 = arith.constant 0 : index
      %c0_10 = arith.constant 0 : index
      %20 = vector.load %arg9[%c0_9, %c0_10] : memref<256x128xf32, #tpu.memory_space<vmem>>, vector<256x128xf32>
      %c0_11 = arith.constant 0 : index
      %c0_12 = arith.constant 0 : index
      %21 = vector.load %arg4[%c0_11, %c0_12] : memref<256x128xf32, #tpu.memory_space<vmem>>, vector<256x128xf32>
      %22 = arith.addf %20, %21 : vector<256x128xf32>
      %c0_13 = arith.constant 0 : index
      %c0_14 = arith.constant 0 : index
      %23 = vector.load %arg5[%c0_13, %c0_14] : memref<256x1xf32, #tpu.memory_space<vmem>>, vector<256x1xf32>
      %24 = vector.broadcast %23 : vector<256x1xf32> to vector<256x128xf32>
      %25 = arith.mulf %22, %24 : vector<256x128xf32>
      %c0_15 = arith.constant 0 : index
      %c0_16 = arith.constant 0 : index
      %26 = vector.load %arg7[%c0_15, %c0_16] : memref<128x256xbf16, #tpu.memory_space<vmem>>, vector<128x256xbf16>
      %cst_17 = arith.constant dense<0.000000e+00> : vector<256x256xf32>
      %27 = tpu.matmul %18, %26, %cst_17 {dimension_numbers = #tpu.dot_dimension_numbers<[1], [0], [0], [1], [0, 0, 1, 1], [], []>} : vector<256x128xbf16>, vector<128x256xbf16>, vector<256x256xf32> -> vector<256x256xf32>
      %28 = arith.truncf %25 : vector<256x128xf32> to vector<256x128xbf16>
      %c0_18 = arith.constant 0 : index
      %c0_19 = arith.constant 0 : index
      %29 = vector.load %arg6[%c0_18, %c0_19] : memref<128x128xbf16, #tpu.memory_space<vmem>>, vector<128x128xbf16>
      %cst_20 = arith.constant dense<0.000000e+00> : vector<256x128xf32>
      %30 = tpu.matmul %28, %29, %cst_20 {dimension_numbers = #tpu.dot_dimension_numbers<[1], [0], [0], [1], [0, 0, 1, 1], [], []>} : vector<256x128xbf16>, vector<128x128xbf16>, vector<256x128xf32> -> vector<256x128xf32>
      %31 = vector.extract_strided_slice %27 {offsets = [0, 0], sizes = [256, 128], strides = [1, 1]} : vector<256x256xf32> to vector<256x128xf32>
      %32 = arith.addf %30, %31 : vector<256x128xf32>
      %cst_21 = arith.constant 0.000000e+00 : f32
      %33 = vector.broadcast %cst_21 : f32 to vector<256x128xf32>
      %34 = arith.cmpf oge, %32, %33 : vector<256x128xf32>
      %cst_22 = arith.constant 0.229166672 : f32
      %35 = vector.broadcast %cst_22 : f32 to vector<256x128xf32>
      %36 = arith.mulf %35, %32 : vector<256x128xf32>
      %37 = arith.select %34, %32, %36 : vector<256x128xi1>, vector<256x128xf32>
      %38 = arith.mulf %37, %37 : vector<256x128xf32>
      %cst_23 = arith.constant dense<0.000000e+00> : vector<256xf32>
      %39 = vector.multi_reduction <add>, %38, %cst_23 [1] : vector<256x128xf32> to vector<256xf32>
      %40 = vector.shape_cast %39 : vector<256xf32> to vector<256x1xf32>
      %cst_24 = arith.constant 1.000000e-24 : f32
      %41 = vector.broadcast %cst_24 : f32 to vector<256x1xf32>
      %42 = arith.maximumf %40, %41 : vector<256x1xf32>
      %43 = math.rsqrt %42 : vector<256x1xf32>
      %44 = vector.broadcast %43 : vector<256x1xf32> to vector<256x128xf32>
      %45 = arith.mulf %37, %44 : vector<256x128xf32>
      %46 = vector.extract_strided_slice %27 {offsets = [0, 128], sizes = [256, 128], strides = [1, 1]} : vector<256x256xf32> to vector<256x128xf32>
      %c0_25 = arith.constant 0 : index
      %c0_26 = arith.constant 0 : index
      %47 = vector.load %arg8[%c0_25, %c0_26] : memref<1x128xf32, #tpu.memory_space<vmem>>, vector<1x128xf32>
      %48 = vector.broadcast %47 : vector<1x128xf32> to vector<256x128xf32>
      %49 = arith.addf %46, %48 : vector<256x128xf32>
      %50 = arith.negf %49 : vector<256x128xf32>
      %51 = math.exp %50 : vector<256x128xf32>
      %cst_27 = arith.constant 1.000000e+00 : f32
      %52 = vector.broadcast %cst_27 : f32 to vector<256x128xf32>
      %53 = arith.addf %52, %51 : vector<256x128xf32>
      %54 = arith.divf %52, %53 : vector<256x128xf32>
      %55 = arith.mulf %54, %45 : vector<256x128xf32>
      %cst_28 = arith.constant 1.000000e+00 : f32
      %56 = vector.broadcast %cst_28 : f32 to vector<256x128xf32>
      %57 = arith.subf %56, %54 : vector<256x128xf32>
      %58 = arith.mulf %57, %19 : vector<256x128xf32>
      %59 = arith.addf %55, %58 : vector<256x128xf32>
      %60 = arith.mulf %59, %59 : vector<256x128xf32>
      %cst_29 = arith.constant dense<0.000000e+00> : vector<256xf32>
      %61 = vector.multi_reduction <add>, %60, %cst_29 [1] : vector<256x128xf32> to vector<256xf32>
      %62 = vector.shape_cast %61 : vector<256xf32> to vector<256x1xf32>
      %cst_30 = arith.constant 1.000000e-24 : f32
      %63 = vector.broadcast %cst_30 : f32 to vector<256x1xf32>
      %64 = arith.maximumf %62, %63 : vector<256x1xf32>
      %65 = math.rsqrt %64 : vector<256x1xf32>
      %66 = vector.broadcast %65 : vector<256x1xf32> to vector<256x128xf32>
      %67 = arith.mulf %59, %66 : vector<256x128xf32>
      %c0_31 = arith.constant 0 : index
      %c0_32 = arith.constant 0 : index
      %68 = vector.load %arg9[%c0_31, %c0_32] : memref<256x128xf32, #tpu.memory_space<vmem>>, vector<256x128xf32>
      tpu.vector_store %arg9[%c0_31, %c0_32], %67 {strides = array<i32>} : memref<256x128xf32, #tpu.memory_space<vmem>>, vector<256x128xf32>,
      %69 = arith.truncf %67 : vector<256x128xf32> to vector<256x128xbf16>
      %c0_33 = arith.constant 0 : index
      %c0_34 = arith.constant 0 : index
      %70 = vector.load %arg10[%c0_33, %c0_34] : memref<256x128xbf16, #tpu.memory_space<vmem>>, vector<256x128xbf16>
      tpu.vector_store %arg10[%c0_33, %c0_34], %69 {strides = array<i32>} : memref<256x128xbf16, #tpu.memory_space<vmem>>, vector<256x128xbf16>,
    } else {
    }
    return
  }
  func.func @transform_0(%arg0: i32, %arg1: i32) -> (i32, i32) {
    %c0_i32 = arith.constant 0 : i32
    return %arg0, %arg1 : i32, i32
  }
  func.func @transform_1(%arg0: i32, %arg1: i32) -> (i32, i32) {
    %c0_i32 = arith.constant 0 : i32
    %c0_i32_0 = arith.constant 0 : i32
    %c0_i32_1 = arith.constant 0 : i32
    return %c0_i32, %c0_i32_0 : i32, i32
  }
  func.func @transform_2(%arg0: i32, %arg1: i32) -> (i32, i32) {
    %c0_i32 = arith.constant 0 : i32
    %c0_i32_0 = arith.constant 0 : i32
    return %arg0, %c0_i32 : i32, i32
  }
  func.func @transform_3(%arg0: i32, %arg1: i32) -> (i32, i32) {
    %c0_i32 = arith.constant 0 : i32
    %c0_i32_0 = arith.constant 0 : i32
    return %arg0, %c0_i32 : i32, i32
  }
  func.func @transform_4(%arg0: i32, %arg1: i32) -> (i32, i32) {
    %c0_i32 = arith.constant 0 : i32
    %c0_i32_0 = arith.constant 0 : i32
    %c0_i32_1 = arith.constant 0 : i32
    return %c0_i32, %c0_i32_0 : i32, i32
  }
  func.func @transform_5(%arg0: i32, %arg1: i32) -> (i32, i32) {
    %c0_i32 = arith.constant 0 : i32
    %c0_i32_0 = arith.constant 0 : i32
    %c0_i32_1 = arith.constant 0 : i32
    return %c0_i32, %c0_i32_0 : i32, i32
  }
  func.func @transform_6(%arg0: i32, %arg1: i32) -> (i32, i32) {
    %c0_i32 = arith.constant 0 : i32
    %c0_i32_0 = arith.constant 0 : i32
    %c0_i32_1 = arith.constant 0 : i32
    return %c0_i32, %c0_i32_0 : i32, i32
  }
  func.func @transform_7(%arg0: i32, %arg1: i32) -> (i32, i32) {
    %c0_i32 = arith.constant 0 : i32
    %c0_i32_0 = arith.constant 0 : i32
    return %arg0, %c0_i32 : i32, i32
  }
  func.func @transform_8(%arg0: i32, %arg1: i32) -> (i32, i32) {
    %c0_i32 = arith.constant 0 : i32
    %c0_i32_0 = arith.constant 0 : i32
    return %arg0, %c0_i32 : i32, i32
  }
}

</mosaic_0001>

<bundles_post_ra>
// kernel: custom-call.4
= control target key start
LH: loop header
LB: loop body
LE: loop exit
PB: predicated region body
PF: predicated region fallthrough
CT: control target
= control target key end

     0   :  { %s6_s0 = inlined_call_operand.vmem [shape: f32[3,1024,128], index: 0, kind: output, shape index: {}]  }

// kernel: closed_call.8
= control target key start
LH: loop header
LB: loop body
LE: loop exit
PB: predicated region body
PF: predicated region fallthrough
CT: control target
= control target key end

     0   :  { %s6858_s0 = inlined_call_operand.vmem [shape: f32[3,1024,128], index: 0, kind: input, shape index: {}, may-alias: {0,9}]   ;;  %s6859_s1 = inlined_call_operand.<no memory space> [shape: s32[], index: 1, kind: input, shape index: {}]   ;;  %s6860_s2 = inlined_call_operand.vmem [shape: bf16[1024,1024], index: 2, kind: input, shape index: {}]   ;;  %s6861_s3 = inlined_call_operand.vmem [shape: bf16[1024,128], index: 3, kind: input, shape index: {}]   ;;  %s6862_s4 = inlined_call_operand.vmem [shape: f32[1024,128], index: 4, kind: input, shape index: {}]   ;;  %s6863_s5 = inlined_call_operand.vmem [shape: f32[1024,1], index: 5, kind: input, shape index: {}]   ;;  %s6864_s6 = inlined_call_operand.vmem [shape: bf16[128,128], index: 6, kind: input, shape index: {}]   ;;  %s6865_s7 = inlined_call_operand.vmem [shape: bf16[128,256], index: 7, kind: input, shape index: {}]   ;;  %s6866_s8 = inlined_call_operand.vmem [shape: f32[1,128], index: 8, kind: input, shape index: {}]   ;;  %s6867_s9 = inlined_call_operand.vmem [shape: f32[3,1024,128], index: 9, kind: output, shape index: {0}, may-alias: {0,9}]   ;;  %s6868_s10 = inlined_call_operand.vmem [shape: bf16[1024,128], index: 10, kind: output, shape index: {1}]  }
   0x1   :  { %6898 = sst [smem:[#allocation57_spill]] %s6860_s2  ;;  %s4212_s14 = sshll.u32 %s6859_s1, 10 }
   0x2   :  { %s5318_s17 = scalar_lea.vmem %s6867_s9, %s4212_s14  }
   0x3   :  { %s5320_s18 = smov 0   ;;  %s5322_s19 = smov 0  }
   0x4   :  { %s5324_s20 = smov 0   ;;  %s5326_s21 = smov 0  }
   0x5   :  { %s5328_s22 = smov 0   ;;  %s5330_s23 = smov 0  }
   0x6   :  { %s5332_s24 = smov 0   ;;  %s5334_s1 = smov 0  }
   0x7   :  { %s5336_s25 = smov 0  }
   0x8 LB: > { %6899 = sst [smem:[#allocation4_spill]] %s5245_s24  ;;  %s33_s9 = sadd.s32 1, %s5245_s24  ;;  %s5253_s25 = sphi %s5336_s25, %s24_s25   ;;  %s5249_s1 = sphi %s5334_s1, %s7007_s1   ;;  %s5245_s24 = sphi %s5332_s24, %s7006_s24   ;;  %s5241_s23 = sphi %s5330_s23, %s7012_s23   ;;  %s5237_s22 = sphi %s5328_s22, %s7004_s22   ;;  %s5233_s21 = sphi %s5326_s21, %s7011_s21   ;;  %s5229_s20 = sphi %s5324_s20, %s7010_s20   ;;  %s5225_s19 = sphi %s5322_s19, %s7009_s19   ;;  %s5221_s18 = sphi %s5320_s18, %s7008_s18  }
   0x9   : > { %6900 = sst [smem:[#allocation5_spill]] %s5249_s1  ;;  %p34_p0 = scmp.ge.s32.totalorder %s33_s9, 2 }
   0xa   : > { %s36_s0 = sadd.s32 1, %s5249_s1  ;;  %p52_p1 = scmp.ne.s32.totalorder %s5233_s21, %s5229_s20 }
   0xb   : > { %s7014_s9 = smov (%p34_p0, %s33_s9), 0  ;;  %s7016_s0 = smov (!%p34_p0, %s36_s0), %s5249_s1 }
   0xc   : > { %6901 = sst [smem:[#allocation6_spill]] %s7014_s9  ;;  %s3982_s26 = sadd.s32 4294967295, %s5253_s25  }
   0xd   : > { %p53_p2 = scmp.eq.s32.totalorder %s5253_s25, 0  ;;  %p38_p3 = scmp.ge.s32.totalorder %s7016_s0, 4 }
   0xe   : > { %s41_s27 = ssub.s32 %s5245_s24, %s7014_s9  ;;  %p217_p5 = scmp.ne.s32.totalorder %s5225_s19, %s5221_s18 }
   0xf   : > { %p5376_p4 = por %p53_p2, %p52_p1  ;;  %s7018_s0 = smov (%p38_p3, %s7016_s0), 0 }
  0x10   : > { %6903 = sst [smem:[#allocation7_spill]] %s7018_s0  ;;  %s45_s29 = sadd.s32 1, %s5233_s21 }
  0x11   : > { %p218_p6 = scmp.eq.s32.totalorder %s3982_s26, 7  ;;  %s40_s30 = ssub.s32 %s5249_s1, %s7018_s0 }
  0x12   : > { %s207_s11 = sadd.s32 1, %s5225_s19  ;;  %s42_s12 = sor.u32 %s41_s27, %s40_s30 }
  0x13   : > { %p205_p7 = scmp.eq.s32.totalorder %s40_s30, 0  ;;  %p43_p8 = scmp.eq.s32.totalorder %s42_s12, 0 }
  0x14   : > { %p5388_p9 = por %p218_p6, %p217_p5  ;;  %p3985_p10 = scmp.ge.s32.totalorder %s5253_s25, 8 }
  0x15   : > { %s5393_s14 = scalar_select %p205_p7, %s5225_s19, %s207_s11  }
  0x16   : > { %s5396_s15 = scalar_select %p43_p8, %s5233_s21, %s45_s29  }
  0x17   : > { %278 = sbr.rel (%p3985_p10) target bundleno = 72 (0x48), region = 32 }
  0x18   : > { %6905 = sst [smem:[#allocation8_spill]] %s5396_s15 }
  0x1e   : > { %281 = sbr.rel (!%p5376_p4) target bundleno = 72 (0x48), region = 36  ;;  %s283_s16 = sand.u32 (%p5376_p4), 1, %s5233_s21  }
  0x1f   : > { %s3988_s26 = sshll.u32 (%p5376_p4), %s5245_s24, 2  ;;  %s3986_s27 = sshll.u32 (%p5376_p4), %s283_s16, 9 }
  0x20   : > { %s4213_s30 = sshll.u32 (%p5376_p4), %s5249_s1, 8  ;;  %s6906_s2 = sld [smem:[#allocation57_spill]] (%p5376_p4) }
  0x21   : > { %s289_s12 = sadd.s32 (%p5376_p4), %s4213_s30, %s3988_s26  ;;  %s5412_s28 = scalar_lea.vmem (%p5376_p4), [#allocation2], %s3986_s27 }
  0x22   : > { %s3990_s0 = sshll.u32 (%p5376_p4), %s289_s12, 2 }
  0x26   : > { %s5407_s29 = scalar_lea.vmem %s6906_s2, %s3990_s0 }
  0x27   : > { %v304_v0 = vld [vmem:[%s5407_s29] sm:$0xff]  ;;  %v306_v1 = vld [vmem:[%s5407_s29 + $0x8] sm:$0xff] }
  0x28   : > { %v308_v2 = vld [vmem:[%s5407_s29 + $0x20] sm:$0xff]  ;;  %305 = vst [vmem:[%s5412_s28] sm:$0xff] %v304_v0  ;;  %307 = vst [vmem:[%s5412_s28 + $0x8] sm:$0xff] %v306_v1  ;;  %v310_v3 = vld [vmem:[%s5407_s29 + $0x28] sm:$0xff] }
  0x29   : > { %309 = vst [vmem:[%s5412_s28 + $0x10] sm:$0xff] %v308_v2  ;;  %v312_v4 = vld [vmem:[%s5407_s29 + $0x40] sm:$0xff]  ;;  %v314_v5 = vld [vmem:[%s5407_s29 + $0x48] sm:$0xff]  ;;  %311 = vst [vmem:[%s5412_s28 + $0x18] sm:$0xff] %v310_v3 }
  0x2a   : > { %313 = vst [vmem:[%s5412_s28 + $0x20] sm:$0xff] %v312_v4  ;;  %315 = vst [vmem:[%s5412_s28 + $0x28] sm:$0xff] %v314_v5  ;;  %v316_v6 = vld [vmem:[%s5407_s29 + $0x60] sm:$0xff]  ;;  %v318_v7 = vld [vmem:[%s5407_s29 + $0x68] sm:$0xff] }
  0x2b   : > { %v320_v8 = vld [vmem:[%s5407_s29 + $0x80] sm:$0xff]  ;;  %317 = vst [vmem:[%s5412_s28 + $0x30] sm:$0xff] %v316_v6  ;;  %319 = vst [vmem:[%s5412_s28 + $0x38] sm:$0xff] %v318_v7  ;;  %v322_v9 = vld [vmem:[%s5407_s29 + $0x88] sm:$0xff] }
  0x2c   : > { %321 = vst [vmem:[%s5412_s28 + $0x40] sm:$0xff] %v320_v8  ;;  %v324_v10 = vld [vmem:[%s5407_s29 + $0xa0] sm:$0xff]  ;;  %v326_v11 = vld [vmem:[%s5407_s29 + $0xa8] sm:$0xff]  ;;  %323 = vst [vmem:[%s5412_s28 + $0x48] sm:$0xff] %v322_v9 }
  0x2d   : > { %325 = vst [vmem:[%s5412_s28 + $0x50] sm:$0xff] %v324_v10  ;;  %327 = vst [vmem:[%s5412_s28 + $0x58] sm:$0xff] %v326_v11  ;;  %v328_v12 = vld [vmem:[%s5407_s29 + $0xc0] sm:$0xff]  ;;  %v330_v13 = vld [vmem:[%s5407_s29 + $0xc8] sm:$0xff] }
  0x2e   : > { %v332_v14 = vld [vmem:[%s5407_s29 + $0xe0] sm:$0xff]  ;;  %329 = vst [vmem:[%s5412_s28 + $0x60] sm:$0xff] %v328_v12  ;;  %331 = vst [vmem:[%s5412_s28 + $0x68] sm:$0xff] %v330_v13  ;;  %v334_v15 = vld [vmem:[%s5407_s29 + $0xe8] sm:$0xff] }
  0x2f   : > { %333 = vst [vmem:[%s5412_s28 + $0x70] sm:$0xff] %v332_v14  ;;  %v336_v16 = vld [vmem:[%s5407_s29 + $0x100] sm:$0xff]  ;;  %v338_v17 = vld [vmem:[%s5407_s29 + $0x108] sm:$0xff]  ;;  %335 = vst [vmem:[%s5412_s28 + $0x78] sm:$0xff] %v334_v15 }
  0x30   : > { %337 = vst [vmem:[%s5412_s28 + $0x80] sm:$0xff] %v336_v16  ;;  %339 = vst [vmem:[%s5412_s28 + $0x88] sm:$0xff] %v338_v17  ;;  %v340_v18 = vld [vmem:[%s5407_s29 + $0x120] sm:$0xff]  ;;  %v342_v19 = vld [vmem:[%s5407_s29 + $0x128] sm:$0xff] }
  0x31   : > { %v344_v20 = vld [vmem:[%s5407_s29 + $0x140] sm:$0xff]  ;;  %341 = vst [vmem:[%s5412_s28 + $0x90] sm:$0xff] %v340_v18  ;;  %343 = vst [vmem:[%s5412_s28 + $0x98] sm:$0xff] %v342_v19  ;;  %v346_v21 = vld [vmem:[%s5407_s29 + $0x148] sm:$0xff] }
  0x32   : > { %345 = vst [vmem:[%s5412_s28 + $0xa0] sm:$0xff] %v344_v20  ;;  %v348_v22 = vld [vmem:[%s5407_s29 + $0x160] sm:$0xff]  ;;  %v350_v23 = vld [vmem:[%s5407_s29 + $0x168] sm:$0xff]  ;;  %347 = vst [vmem:[%s5412_s28 + $0xa8] sm:$0xff] %v346_v21 }
  0x33   : > { %349 = vst [vmem:[%s5412_s28 + $0xb0] sm:$0xff] %v348_v22  ;;  %351 = vst [vmem:[%s5412_s28 + $0xb8] sm:$0xff] %v350_v23  ;;  %v352_v24 = vld [vmem:[%s5407_s29 + $0x180] sm:$0xff]  ;;  %v354_v25 = vld [vmem:[%s5407_s29 + $0x188] sm:$0xff] }
  0x34   : > { %v356_v26 = vld [vmem:[%s5407_s29 + $0x1a0] sm:$0xff]  ;;  %353 = vst [vmem:[%s5412_s28 + $0xc0] sm:$0xff] %v352_v24  ;;  %355 = vst [vmem:[%s5412_s28 + $0xc8] sm:$0xff] %v354_v25  ;;  %v358_v27 = vld [vmem:[%s5407_s29 + $0x1a8] sm:$0xff] }
  0x35   : > { %357 = vst [vmem:[%s5412_s28 + $0xd0] sm:$0xff] %v356_v26  ;;  %v360_v28 = vld [vmem:[%s5407_s29 + $0x1c0] sm:$0xff]  ;;  %v362_v29 = vld [vmem:[%s5407_s29 + $0x1c8] sm:$0xff]  ;;  %359 = vst [vmem:[%s5412_s28 + $0xd8] sm:$0xff] %v358_v27 }
  0x36   : > { %361 = vst [vmem:[%s5412_s28 + $0xe0] sm:$0xff] %v360_v28  ;;  %363 = vst [vmem:[%s5412_s28 + $0xe8] sm:$0xff] %v362_v29  ;;  %v364_v30 = vld [vmem:[%s5407_s29 + $0x1e0] sm:$0xff]  ;;  %v366_v31 = vld [vmem:[%s5407_s29 + $0x1e8] sm:$0xff] }
  0x37   : > { %v368_v32 = vld [vmem:[%s5407_s29 + $0x200] sm:$0xff]  ;;  %365 = vst [vmem:[%s5412_s28 + $0xf0] sm:$0xff] %v364_v30  ;;  %367 = vst [vmem:[%s5412_s28 + $0xf8] sm:$0xff] %v366_v31  ;;  %v370_v33 = vld [vmem:[%s5407_s29 + $0x208] sm:$0xff] }
  0x38   : > { %369 = vst [vmem:[%s5412_s28 + $0x100] sm:$0xff] %v368_v32  ;;  %v372_v34 = vld [vmem:[%s5407_s29 + $0x220] sm:$0xff]  ;;  %v374_v35 = vld [vmem:[%s5407_s29 + $0x228] sm:$0xff]  ;;  %371 = vst [vmem:[%s5412_s28 + $0x108] sm:$0xff] %v370_v33 }
  0x39   : > { %373 = vst [vmem:[%s5412_s28 + $0x110] sm:$0xff] %v372_v34  ;;  %375 = vst [vmem:[%s5412_s28 + $0x118] sm:$0xff] %v374_v35  ;;  %v376_v36 = vld [vmem:[%s5407_s29 + $0x240] sm:$0xff]  ;;  %v378_v37 = vld [vmem:[%s5407_s29 + $0x248] sm:$0xff] }
  0x3a   : > { %v380_v38 = vld [vmem:[%s5407_s29 + $0x260] sm:$0xff]  ;;  %377 = vst [vmem:[%s5412_s28 + $0x120] sm:$0xff] %v376_v36  ;;  %379 = vst [vmem:[%s5412_s28 + $0x128] sm:$0xff] %v378_v37  ;;  %v382_v39 = vld [vmem:[%s5407_s29 + $0x268] sm:$0xff] }
  0x3b   : > { %381 = vst [vmem:[%s5412_s28 + $0x130] sm:$0xff] %v380_v38  ;;  %v384_v40 = vld [vmem:[%s5407_s29 + $0x280] sm:$0xff]  ;;  %v386_v41 = vld [vmem:[%s5407_s29 + $0x288] sm:$0xff]  ;;  %383 = vst [vmem:[%s5412_s28 + $0x138] sm:$0xff] %v382_v39 }
  0x3c   : > { %385 = vst [vmem:[%s5412_s28 + $0x140] sm:$0xff] %v384_v40  ;;  %387 = vst [vmem:[%s5412_s28 + $0x148] sm:$0xff] %v386_v41  ;;  %v388_v42 = vld [vmem:[%s5407_s29 + $0x2a0] sm:$0xff]  ;;  %v390_v43 = vld [vmem:[%s5407_s29 + $0x2a8] sm:$0xff] }
  0x3d   : > { %v392_v44 = vld [vmem:[%s5407_s29 + $0x2c0] sm:$0xff]  ;;  %389 = vst [vmem:[%s5412_s28 + $0x150] sm:$0xff] %v388_v42  ;;  %391 = vst [vmem:[%s5412_s28 + $0x158] sm:$0xff] %v390_v43  ;;  %v394_v45 = vld [vmem:[%s5407_s29 + $0x2c8] sm:$0xff] }
  0x3e   : > { %393 = vst [vmem:[%s5412_s28 + $0x160] sm:$0xff] %v392_v44  ;;  %v396_v46 = vld [vmem:[%s5407_s29 + $0x2e0] sm:$0xff]  ;;  %v398_v47 = vld [vmem:[%s5407_s29 + $0x2e8] sm:$0xff]  ;;  %395 = vst [vmem:[%s5412_s28 + $0x168] sm:$0xff] %v394_v45 }
  0x3f   : > { %397 = vst [vmem:[%s5412_s28 + $0x170] sm:$0xff] %v396_v46  ;;  %399 = vst [vmem:[%s5412_s28 + $0x178] sm:$0xff] %v398_v47  ;;  %v400_v48 = vld [vmem:[%s5407_s29 + $0x300] sm:$0xff]  ;;  %v402_v49 = vld [vmem:[%s5407_s29 + $0x308] sm:$0xff] }
  0x40   : > { %v404_v50 = vld [vmem:[%s5407_s29 + $0x320] sm:$0xff]  ;;  %401 = vst [vmem:[%s5412_s28 + $0x180] sm:$0xff] %v400_v48  ;;  %403 = vst [vmem:[%s5412_s28 + $0x188] sm:$0xff] %v402_v49  ;;  %v406_v51 = vld [vmem:[%s5407_s29 + $0x328] sm:$0xff] }
  0x41   : > { %405 = vst [vmem:[%s5412_s28 + $0x190] sm:$0xff] %v404_v50  ;;  %v408_v52 = vld [vmem:[%s5407_s29 + $0x340] sm:$0xff]  ;;  %v410_v53 = vld [vmem:[%s5407_s29 + $0x348] sm:$0xff]  ;;  %407 = vst [vmem:[%s5412_s28 + $0x198] sm:$0xff] %v406_v51 }
  0x42   : > { %409 = vst [vmem:[%s5412_s28 + $0x1a0] sm:$0xff] %v408_v52  ;;  %411 = vst [vmem:[%s5412_s28 + $0x1a8] sm:$0xff] %v410_v53  ;;  %v412_v54 = vld [vmem:[%s5407_s29 + $0x360] sm:$0xff]  ;;  %v414_v55 = vld [vmem:[%s5407_s29 + $0x368] sm:$0xff] }
  0x43   : > { %v416_v56 = vld [vmem:[%s5407_s29 + $0x380] sm:$0xff]  ;;  %413 = vst [vmem:[%s5412_s28 + $0x1b0] sm:$0xff] %v412_v54  ;;  %415 = vst [vmem:[%s5412_s28 + $0x1b8] sm:$0xff] %v414_v55  ;;  %v418_v57 = vld [vmem:[%s5407_s29 + $0x388] sm:$0xff] }
  0x44   : > { %417 = vst [vmem:[%s5412_s28 + $0x1c0] sm:$0xff] %v416_v56  ;;  %v420_v58 = vld [vmem:[%s5407_s29 + $0x3a0] sm:$0xff]  ;;  %v422_v59 = vld [vmem:[%s5407_s29 + $0x3a8] sm:$0xff]  ;;  %419 = vst [vmem:[%s5412_s28 + $0x1c8] sm:$0xff] %v418_v57 }
  0x45   : > { %421 = vst [vmem:[%s5412_s28 + $0x1d0] sm:$0xff] %v420_v58  ;;  %423 = vst [vmem:[%s5412_s28 + $0x1d8] sm:$0xff] %v422_v59  ;;  %v424_v60 = vld [vmem:[%s5407_s29 + $0x3c0] sm:$0xff]  ;;  %v426_v61 = vld [vmem:[%s5407_s29 + $0x3c8] sm:$0xff] }
  0x46   : > { %v428_v62 = vld [vmem:[%s5407_s29 + $0x3e0] sm:$0xff]  ;;  %425 = vst [vmem:[%s5412_s28 + $0x1e0] sm:$0xff] %v424_v60  ;;  %427 = vst [vmem:[%s5412_s28 + $0x1e8] sm:$0xff] %v426_v61  ;;  %v430_v63 = vld [vmem:[%s5407_s29 + $0x3e8] sm:$0xff] }
  0x47   : > { %429 = vst [vmem:[%s5412_s28 + $0x1f0] sm:$0xff] %v428_v62  ;;  %431 = vst [vmem:[%s5412_s28 + $0x1f8] sm:$0xff] %v430_v63 }
  0x48 PF: > { %p3991_p11 = scmp.ge.s32.totalorder %s5253_s25, 1  ;;  %p454_p12 = scmp.lt.s32.totalorder %s5253_s25, 9 }
  0x4a   : > { %p455_p13 = pnand %p3991_p11, %p454_p12 }
  0x4b   : > { %s461_s9 = sand.u32 (!%p455_p13), 1, %s5229_s20   ;;  %s498_s0 = sand.u32 (!%p455_p13), 1, %s5221_s18  }
  0x4c   : > { %458 = sbr.rel (%p455_p13) target bundleno = 1249 (0x4e1), region = 67  ;;  %s3992_s16 = sshll.u32 (!%p455_p13), %s461_s9, 9 }
  0x4d   : > { %s3993_s26 = sshll.u32 (!%p455_p13), %s498_s0, 8  ;;  %s3994_s27 = sshll.u32 (!%p455_p13), %s5241_s23, 5 }
  0x4e   : > { %p511_p0 = scmp.lt.s32.totalorder (!%p455_p13), %s3994_s27, 127  ;;  %s5559_s9 = scalar_lea.vmem (!%p455_p13), [#allocation2], %s3992_s16 }
  0x4f   : > { %s5561_s0 = scalar_lea.vmem (!%p455_p13), [#allocation3], %s3993_s26  ;;  %p4000_p1 = scmp.ne.s32.totalorder (!%p455_p13), %s5237_s22, 0 }
  0x53   : > { %s7020_s27 = smov (!%p511_p0, %s3994_s27), 127  ;;  %533 = sbr.rel (%p4000_p1) target bundleno = 101 (0x65), region = 75 }
  0x54   : > { %s3995_s30 = sshll.u32 %s7020_s27, 3  ;;  %s3999_s12 = sshll.u32 %s7020_s27, 2  ;;  %v5255_v0 = vmov (!%p4000_p1), 0.0  }
  0x55   : > { %s5547_s28 = scalar_lea.vmem %s6862_s4, %s3995_s30  ;;  %s5552_s24 = scalar_lea.vmem %s6863_s5, %s3995_s30  ;;  %534 = vst [vmem:[%s5561_s0] sm:$0xff] (!%p4000_p1), %v5255_v0  ;;  %535 = vst [vmem:[%s5561_s0 + $0x8] sm:$0xff] (!%p4000_p1), %v5255_v0 }
  0x56   : > { %s5557_s18 = scalar_lea.vmem %s6868_s10, %s3999_s12  ;;  %536 = vst [vmem:[%s5561_s0 + $0x10] sm:$0xff] (!%p4000_p1), %v5255_v0  ;;  %537 = vst [vmem:[%s5561_s0 + $0x18] sm:$0xff] (!%p4000_p1), %v5255_v0 }
  0x57   : > { %538 = vst [vmem:[%s5561_s0 + $0x20] sm:$0xff] (!%p4000_p1), %v5255_v0  ;;  %539 = vst [vmem:[%s5561_s0 + $0x28] sm:$0xff] (!%p4000_p1), %v5255_v0 }
  0x58   : > { %540 = vst [vmem:[%s5561_s0 + $0x30] sm:$0xff] (!%p4000_p1), %v5255_v0  ;;  %541 = vst [vmem:[%s5561_s0 + $0x38] sm:$0xff] (!%p4000_p1), %v5255_v0 }
  0x59   : > { %542 = vst [vmem:[%s5561_s0 + $0x40] sm:$0xff] (!%p4000_p1), %v5255_v0  ;;  %543 = vst [vmem:[%s5561_s0 + $0x48] sm:$0xff] (!%p4000_p1), %v5255_v0 }
  0x5a   : > { %544 = vst [vmem:[%s5561_s0 + $0x50] sm:$0xff] %v5255_v0  ;;  %545 = vst [vmem:[%s5561_s0 + $0x58] sm:$0xff] %v5255_v0 }
  0x5b   : > { %546 = vst [vmem:[%s5561_s0 + $0x60] sm:$0xff] %v5255_v0  ;;  %547 = vst [vmem:[%s5561_s0 + $0x68] sm:$0xff] %v5255_v0 }
  0x5c   : > { %548 = vst [vmem:[%s5561_s0 + $0x70] sm:$0xff] %v5255_v0  ;;  %549 = vst [vmem:[%s5561_s0 + $0x78] sm:$0xff] %v5255_v0 }
  0x5d   : > { %550 = vst [vmem:[%s5561_s0 + $0x80] sm:$0xff] %v5255_v0  ;;  %551 = vst [vmem:[%s5561_s0 + $0x88] sm:$0xff] %v5255_v0 }
  0x5e   : > { %552 = vst [vmem:[%s5561_s0 + $0x90] sm:$0xff] %v5255_v0  ;;  %553 = vst [vmem:[%s5561_s0 + $0x98] sm:$0xff] %v5255_v0 }
  0x5f   : > { %554 = vst [vmem:[%s5561_s0 + $0xa0] sm:$0xff] %v5255_v0  ;;  %555 = vst [vmem:[%s5561_s0 + $0xa8] sm:$0xff] %v5255_v0 }
  0x60   : > { %556 = vst [vmem:[%s5561_s0 + $0xb0] sm:$0xff] %v5255_v0  ;;  %557 = vst [vmem:[%s5561_s0 + $0xb8] sm:$0xff] %v5255_v0 }
  0x61   : > { %558 = vst [vmem:[%s5561_s0 + $0xc0] sm:$0xff] %v5255_v0  ;;  %559 = vst [vmem:[%s5561_s0 + $0xc8] sm:$0xff] %v5255_v0 }
  0x62   : > { %560 = vst [vmem:[%s5561_s0 + $0xd0] sm:$0xff] %v5255_v0  ;;  %561 = vst [vmem:[%s5561_s0 + $0xd8] sm:$0xff] %v5255_v0 }
  0x63   : > { %562 = vst [vmem:[%s5561_s0 + $0xe0] sm:$0xff] %v5255_v0  ;;  %563 = vst [vmem:[%s5561_s0 + $0xe8] sm:$0xff] %v5255_v0 }
  0x64   : > { %564 = vst [vmem:[%s5561_s0 + $0xf0] sm:$0xff] %v5255_v0  ;;  %565 = vst [vmem:[%s5561_s0 + $0xf8] sm:$0xff] %v5255_v0 }
  0x65 PF: > { %s4001_s2 = sshll.u32 %s5237_s22, 9  ;;  %v4762_v1 = vld [vmem:[%s5559_s9 + $0x4] ss:$16 sps:$4 sm:$0xff]   ;;  %v4765_v2 = vld [vmem:[%s5559_s9 + $0xc] ss:$16 sps:$4 sm:$0xff]   ;;  %p4099_p2 = scmp.ne.s32.totalorder %s5237_s22, 1 }
  0x66   : > { %s567_s1 = sshra.s32 %s4001_s2, 3  ;;  %1275 = vmatprep.mubr.bf16.mxu0 %v4762_v1  ;;  %1436 = vmatprep.mubr.bf16.mxu1 %v4765_v2  ;;  %v4760_v33 = vld [vmem:[%s5559_s9] ss:$16 sps:$4 sm:$0xff]   ;;  %v4763_v36 = vld [vmem:[%s5559_s9 + $0x8] ss:$16 sps:$4 sm:$0xff]  }
  0x67   : > { %s4002_s15 = sshll.u32 %s567_s1, 2  ;;  %v4766_v37 = vld [vmem:[%s5559_s9 + $0x24] ss:$16 sps:$4 sm:$0xff]   ;;  %v4768_v38 = vld [vmem:[%s5559_s9 + $0x2c] ss:$16 sps:$4 sm:$0xff]  }
  0x68   : > { %s5602_s27 = scalar_lea.vmem %s6861_s3, %s4002_s15  ;;  %v4770_v39 = vld [vmem:[%s5559_s9 + $0x20] ss:$16 sps:$4 sm:$0xff]   ;;  %v4771_v40 = vld [vmem:[%s5559_s9 + $0x28] ss:$16 sps:$4 sm:$0xff]   ;;  %v4772_v41 = vld [vmem:[%s5559_s9 + $0x44] ss:$16 sps:$4 sm:$0xff]  }
  0x69   : > { %v4728_v3 = vld [vmem:[%s5602_s27 + $0x40] sm:$0xff]   ;;  %v4732_v7 = vld [vmem:[%s5602_s27 + $0x48] sm:$0xff]   ;;  %v4736_v11 = vld [vmem:[%s5602_s27 + $0x50] sm:$0xff]  }
  0x6a   : > { %v4729_v4 = vld [vmem:[%s5602_s27 + $0xc0] sm:$0xff]   ;;  %4342 = vmatprep.subr.bf16.mxu0 %v4728_v3  ;;  %v4733_v8 = vld [vmem:[%s5602_s27 + $0xc8] sm:$0xff]   ;;  %v4737_v12 = vld [vmem:[%s5602_s27 + $0xd0] sm:$0xff]  }
  0x6b   : > { %v4730_v5 = vld [vmem:[%s5602_s27] sm:$0xff]   ;;  %4454 = vmatprep.subr.bf16.mxu1 %v4729_v4  ;;  %v4734_v9 = vld [vmem:[%s5602_s27 + $0x8] sm:$0xff]   ;;  %v4738_v13 = vld [vmem:[%s5602_s27 + $0x10] sm:$0xff]  }
  0x6c   : > { %v4731_v6 = vld [vmem:[%s5602_s27 + $0x80] sm:$0xff]   ;;  %4343 = vmatpush3.bf16.msra.mxu0 %v4730_v5  ;;  %v4735_v10 = vld [vmem:[%s5602_s27 + $0x88] sm:$0xff]   ;;  %v4739_v14 = vld [vmem:[%s5602_s27 + $0x90] sm:$0xff]  }
  0x6d   : > { %4455 = vmatpush3.bf16.msra.mxu1 %v4731_v6  ;;  %4344 = vmatprep.subr.bf16.mxu0 %v4732_v7  ;;  %v4740_v15 = vld [vmem:[%s5602_s27 + $0x58] sm:$0xff]   ;;  %v4744_v19 = vld [vmem:[%s5602_s27 + $0x60] sm:$0xff]   ;;  %v4748_v23 = vld [vmem:[%s5602_s27 + $0x68] sm:$0xff]  }
  0x6e   : > { %4456 = vmatprep.subr.bf16.mxu1 %v4733_v8  ;;  %v4741_v16 = vld [vmem:[%s5602_s27 + $0xd8] sm:$0xff]   ;;  %v4745_v20 = vld [vmem:[%s5602_s27 + $0xe0] sm:$0xff]   ;;  %v4749_v24 = vld [vmem:[%s5602_s27 + $0xe8] sm:$0xff]  }
  0x6f   : > { %v4742_v17 = vld [vmem:[%s5602_s27 + $0x18] sm:$0xff]   ;;  %v4746_v21 = vld [vmem:[%s5602_s27 + $0x20] sm:$0xff]   ;;  %v4750_v25 = vld [vmem:[%s5602_s27 + $0x28] sm:$0xff]  }
  0x70   : > { %4345 = vmatpush3.bf16.msra.mxu0 %v4734_v9  ;;  %v4743_v18 = vld [vmem:[%s5602_s27 + $0x98] sm:$0xff]   ;;  %v4747_v22 = vld [vmem:[%s5602_s27 + $0xa0] sm:$0xff]   ;;  %v4751_v26 = vld [vmem:[%s5602_s27 + $0xa8] sm:$0xff]  }
  0x71   : > { %4457 = vmatpush3.bf16.msra.mxu1 %v4735_v10  ;;  %4346 = vmatprep.subr.bf16.mxu0 %v4736_v11  ;;  %v4752_v27 = vld [vmem:[%s5602_s27 + $0x70] sm:$0xff]   ;;  %v4756_v31 = vld [vmem:[%s5602_s27 + $0x78] sm:$0xff]  }
  0x72   : > { %4458 = vmatprep.subr.bf16.mxu1 %v4737_v12  ;;  %v4753_v28 = vld [vmem:[%s5602_s27 + $0xf0] sm:$0xff]   ;;  %v4757_v32 = vld [vmem:[%s5602_s27 + $0xf8] sm:$0xff]  }
  0x73   : > { %v4754_v29 = vld [vmem:[%s5602_s27 + $0x30] sm:$0xff]   ;;  %v4758_v34 = vld [vmem:[%s5602_s27 + $0x38] sm:$0xff]  }
  0x74   : > { %4347 = vmatpush3.bf16.msra.mxu0 %v4738_v13  ;;  %v4755_v30 = vld [vmem:[%s5602_s27 + $0xb0] sm:$0xff]   ;;  %v4759_v35 = vld [vmem:[%s5602_s27 + $0xb8] sm:$0xff]  }
  0x75   : > { %4459 = vmatpush3.bf16.msra.mxu1 %v4739_v14  ;;  %4348 = vmatprep.subr.bf16.mxu0 %v4740_v15  ;;  %v4774_v42 = vld [vmem:[%s5559_s9 + $0x4c] ss:$16 sps:$4 sm:$0xff]   ;;  %v4776_v43 = vld [vmem:[%s5559_s9 + $0x40] ss:$16 sps:$4 sm:$0xff]   ;;  %v4777_v44 = vld [vmem:[%s5559_s9 + $0x48] ss:$16 sps:$4 sm:$0xff]  }
  0x76   : > { %4460 = vmatprep.subr.bf16.mxu1 %v4741_v16  ;;  %v4778_v45 = vld [vmem:[%s5559_s9 + $0x64] ss:$16 sps:$4 sm:$0xff]   ;;  %v4780_v46 = vld [vmem:[%s5559_s9 + $0x6c] ss:$16 sps:$4 sm:$0xff]   ;;  %v4782_v47 = vld [vmem:[%s5559_s9 + $0x60] ss:$16 sps:$4 sm:$0xff]  }
  0x77   : > { %v4783_v48 = vld [vmem:[%s5559_s9 + $0x68] ss:$16 sps:$4 sm:$0xff]   ;;  %v4784_v49 = vld [vmem:[%s5559_s9 + $0x84] ss:$16 sps:$4 sm:$0xff]   ;;  %v4786_v50 = vld [vmem:[%s5559_s9 + $0x8c] ss:$16 sps:$4 sm:$0xff]  }
  0x78   : > { %4349 = vmatpush3.bf16.msra.mxu0 %v4742_v17  ;;  %v4788_v51 = vld [vmem:[%s5559_s9 + $0x80] ss:$16 sps:$4 sm:$0xff]   ;;  %v4789_v52 = vld [vmem:[%s5559_s9 + $0x88] ss:$16 sps:$4 sm:$0xff]   ;;  %v4790_v53 = vld [vmem:[%s5559_s9 + $0xa4] ss:$16 sps:$4 sm:$0xff]  }
  0x79   : > { %4461 = vmatpush3.bf16.msra.mxu1 %v4743_v18  ;;  %4350 = vmatprep.subr.bf16.mxu0 %v4744_v19  ;;  %v4792_v54 = vld [vmem:[%s5559_s9 + $0xac] ss:$16 sps:$4 sm:$0xff]   ;;  %v4794_v55 = vld [vmem:[%s5559_s9 + $0xa0] ss:$16 sps:$4 sm:$0xff]   ;;  %v4795_v56 = vld [vmem:[%s5559_s9 + $0xa8] ss:$16 sps:$4 sm:$0xff]  }
  0x7a   : > { %4462 = vmatprep.subr.bf16.mxu1 %v4745_v20  ;;  %v4796_v57 = vld [vmem:[%s5559_s9 + $0xc4] ss:$16 sps:$4 sm:$0xff]   ;;  %v4798_v58 = vld [vmem:[%s5559_s9 + $0xcc] ss:$16 sps:$4 sm:$0xff]   ;;  %v4800_v59 = vld [vmem:[%s5559_s9 + $0xc0] ss:$16 sps:$4 sm:$0xff]  }
  0x7b   : > { %v4801_v60 = vld [vmem:[%s5559_s9 + $0xc8] ss:$16 sps:$4 sm:$0xff]   ;;  %v4802_v61 = vld [vmem:[%s5559_s9 + $0xe4] ss:$16 sps:$4 sm:$0xff]   ;;  %v4804_v62 = vld [vmem:[%s5559_s9 + $0xec] ss:$16 sps:$4 sm:$0xff]  }
  0x7c   : > { %4351 = vmatpush3.bf16.msra.mxu0 %v4746_v21  ;;  %v4806_v63 = vld [vmem:[%s5559_s9 + $0xe0] ss:$16 sps:$4 sm:$0xff]   ;;  %v4807_v0 = vld [vmem:[%s5559_s9 + $0xe8] ss:$16 sps:$4 sm:$0xff]   ;;  %v4808_v1 = vld [vmem:[%s5559_s9 + $0x104] ss:$16 sps:$4 sm:$0xff]  }
  0x7d   : > { %4463 = vmatpush3.bf16.msra.mxu1 %v4747_v22  ;;  %4352 = vmatprep.subr.bf16.mxu0 %v4748_v23  ;;  %v4810_v2 = vld [vmem:[%s5559_s9 + $0x10c] ss:$16 sps:$4 sm:$0xff]   ;;  %v4812_v3 = vld [vmem:[%s5559_s9 + $0x100] ss:$16 sps:$4 sm:$0xff]   ;;  %v4813_v4 = vld [vmem:[%s5559_s9 + $0x108] ss:$16 sps:$4 sm:$0xff]  }
  0x7e   : > { %4464 = vmatprep.subr.bf16.mxu1 %v4749_v24  ;;  %v4814_v5 = vld [vmem:[%s5559_s9 + $0x124] ss:$16 sps:$4 sm:$0xff]   ;;  %v4816_v6 = vld [vmem:[%s5559_s9 + $0x12c] ss:$16 sps:$4 sm:$0xff]   ;;  %v4818_v7 = vld [vmem:[%s5559_s9 + $0x120] ss:$16 sps:$4 sm:$0xff]  }
  0x7f   : > { %v4819_v8 = vld [vmem:[%s5559_s9 + $0x128] ss:$16 sps:$4 sm:$0xff]   ;;  %v4820_v9 = vld [vmem:[%s5559_s9 + $0x144] ss:$16 sps:$4 sm:$0xff]   ;;  %v4822_v10 = vld [vmem:[%s5559_s9 + $0x14c] ss:$16 sps:$4 sm:$0xff]  }
  0x80   : > { %4353 = vmatpush3.bf16.msra.mxu0 %v4750_v25  ;;  %v4824_v11 = vld [vmem:[%s5559_s9 + $0x140] ss:$16 sps:$4 sm:$0xff]   ;;  %v4825_v12 = vld [vmem:[%s5559_s9 + $0x148] ss:$16 sps:$4 sm:$0xff]   ;;  %v4826_v13 = vld [vmem:[%s5559_s9 + $0x164] ss:$16 sps:$4 sm:$0xff]  }
  0x81   : > { %4465 = vmatpush3.bf16.msra.mxu1 %v4751_v26  ;;  %4354 = vmatprep.subr.bf16.mxu0 %v4752_v27  ;;  %v4828_v14 = vld [vmem:[%s5559_s9 + $0x16c] ss:$16 sps:$4 sm:$0xff]   ;;  %v4830_v15 = vld [vmem:[%s5559_s9 + $0x160] ss:$16 sps:$4 sm:$0xff]   ;;  %v4831_v16 = vld [vmem:[%s5559_s9 + $0x168] ss:$16 sps:$4 sm:$0xff]  }
  0x82   : > { %4466 = vmatprep.subr.bf16.mxu1 %v4753_v28  ;;  %v4832_v17 = vld [vmem:[%s5559_s9 + $0x184] ss:$16 sps:$4 sm:$0xff]   ;;  %v4834_v18 = vld [vmem:[%s5559_s9 + $0x18c] ss:$16 sps:$4 sm:$0xff]   ;;  %v4836_v19 = vld [vmem:[%s5559_s9 + $0x180] ss:$16 sps:$4 sm:$0xff]  }
  0x83   : > { %v4837_v20 = vld [vmem:[%s5559_s9 + $0x188] ss:$16 sps:$4 sm:$0xff]   ;;  %v4838_v21 = vld [vmem:[%s5559_s9 + $0x1a4] ss:$16 sps:$4 sm:$0xff]   ;;  %v4840_v22 = vld [vmem:[%s5559_s9 + $0x1ac] ss:$16 sps:$4 sm:$0xff]  }
  0x84   : > { %4355 = vmatpush3.bf16.msra.mxu0 %v4754_v29  ;;  %v4842_v23 = vld [vmem:[%s5559_s9 + $0x1a0] ss:$16 sps:$4 sm:$0xff]   ;;  %v4843_v24 = vld [vmem:[%s5559_s9 + $0x1a8] ss:$16 sps:$4 sm:$0xff]   ;;  %v4844_v25 = vld [vmem:[%s5559_s9 + $0x1c4] ss:$16 sps:$4 sm:$0xff]  }
  0x85   : > { %4467 = vmatpush3.bf16.msra.mxu1 %v4755_v30  ;;  %4356 = vmatprep.subr.bf16.mxu0 %v4756_v31  ;;  %v4846_v26 = vld [vmem:[%s5559_s9 + $0x1cc] ss:$16 sps:$4 sm:$0xff]   ;;  %v4848_v27 = vld [vmem:[%s5559_s9 + $0x1c0] ss:$16 sps:$4 sm:$0xff]   ;;  %v4849_v28 = vld [vmem:[%s5559_s9 + $0x1c8] ss:$16 sps:$4 sm:$0xff]  }
  0x86   : > { %4468 = vmatprep.subr.bf16.mxu1 %v4757_v32  ;;  %v4850_v29 = vld [vmem:[%s5559_s9 + $0x1e4] ss:$16 sps:$4 sm:$0xff]   ;;  %v4852_v30 = vld [vmem:[%s5559_s9 + $0x1ec] ss:$16 sps:$4 sm:$0xff]   ;;  %v4854_v31 = vld [vmem:[%s5559_s9 + $0x1e0] ss:$16 sps:$4 sm:$0xff]  }
  0x87   : > { %v4855_v32 = vld [vmem:[%s5559_s9 + $0x1e8] ss:$16 sps:$4 sm:$0xff]  }
  0x88   : > { %4357 = vmatpush3.bf16.msra.mxu0 %v4758_v34 }
  0x89   : > { %4469 = vmatpush3.bf16.msra.mxu1 %v4759_v35 }
  0x8b   : > { %1276 = vmatmul.mubr.bf16.vlgmr.msra.gmra.mrb[0].mxu0 %v4760_v33 }
  0x8c   : > { %1437 = vmatmul.mubr.bf16.vlgmr.msra.gmra.mrb[0].mxu1 %v4763_v36  ;;  %1283 = vmatprep.mubr.bf16.mxu0 %v4766_v37 }
  0x8d   : > { %1444 = vmatprep.mubr.bf16.mxu1 %v4768_v38 }
  0x93   : > { %1284 = vmatmul.mubr.bf16.gmra.mrb[4].mxu0 %v4770_v39 }
  0x94   : > { %1445 = vmatmul.mubr.bf16.gmra.mrb[4].mxu1 %v4771_v40  ;;  %1291 = vmatprep.mubr.bf16.mxu0 %v4772_v41 }
  0x95   : > { %1452 = vmatprep.mubr.bf16.mxu1 %v4774_v42  ;;  %v635_v42 = vld [vmem:[%s5561_s0] sm:$0xff] }
  0x9b   : > { %1292 = vmatmul.mubr.bf16.gmra.mrb[8].mxu0 %v4776_v43 }
  0x9c   : > { %1453 = vmatmul.mubr.bf16.gmra.mrb[8].mxu1 %v4777_v44  ;;  %1299 = vmatprep.mubr.bf16.mxu0 %v4778_v45 }
  0x9d   : > { %1460 = vmatprep.mubr.bf16.mxu1 %v4780_v46 }
  0xa3   : > { %1300 = vmatmul.mubr.bf16.gmra.mrb[12].mxu0 %v4782_v47  ;;  %v636_v47 = vld [vmem:[%s5561_s0 + $0x8] sm:$0xff] }
  0xa4   : > { %1461 = vmatmul.mubr.bf16.gmra.mrb[12].mxu1 %v4783_v48  ;;  %1307 = vmatprep.mubr.bf16.mxu0 %v4784_v49 }
  0xa5   : > { %1468 = vmatprep.mubr.bf16.mxu1 %v4786_v50 }
  0xab   : > { %1308 = vmatmul.mubr.bf16.gmra.mrb[16].mxu0 %v4788_v51 }
  0xac   : > { %1469 = vmatmul.mubr.bf16.gmra.mrb[16].mxu1 %v4789_v52  ;;  %1315 = vmatprep.mubr.bf16.mxu0 %v4790_v53 }
  0xad   : > { %1476 = vmatprep.mubr.bf16.mxu1 %v4792_v54 }
  0xb3   : > { %1316 = vmatmul.mubr.bf16.gmra.mrb[20].mxu0 %v4794_v55 }
  0xb4   : > { %1477 = vmatmul.mubr.bf16.gmra.mrb[20].mxu1 %v4795_v56  ;;  %1323 = vmatprep.mubr.bf16.mxu0 %v4796_v57 }
  0xb5   : > { %1484 = vmatprep.mubr.bf16.mxu1 %v4798_v58 }
  0xbb   : > { %1324 = vmatmul.mubr.bf16.gmra.mrb[24].mxu0 %v4800_v59 }
  0xbc   : > { %1485 = vmatmul.mubr.bf16.gmra.mrb[24].mxu1 %v4801_v60  ;;  %1331 = vmatprep.mubr.bf16.mxu0 %v4802_v61  ;;  %v637_v60 = vld [vmem:[%s5561_s0 + $0x10] sm:$0xff] }
  0xbd   : > { %1492 = vmatprep.mubr.bf16.mxu1 %v4804_v62 }
  0xc3   : > { %1332 = vmatmul.mubr.bf16.gmra.mrb[28].mxu0 %v4806_v63 }
  0xc4   : > { %1493 = vmatmul.mubr.bf16.gmra.mrb[28].mxu1 %v4807_v0  ;;  %1339 = vmatprep.mubr.bf16.mxu0 %v4808_v1  ;;  %v638_v1 = vld [vmem:[%s5561_s0 + $0x18] sm:$0xff] }
  0xc5   : > { %1500 = vmatprep.mubr.bf16.mxu1 %v4810_v2 }
  0xcb   : > { %1340 = vmatmul.mubr.bf16.gmra.mrb[32].mxu0 %v4812_v3 }
  0xcc   : > { %1501 = vmatmul.mubr.bf16.gmra.mrb[32].mxu1 %v4813_v4  ;;  %1347 = vmatprep.mubr.bf16.mxu0 %v4814_v5 }
  0xcd   : > { %1508 = vmatprep.mubr.bf16.mxu1 %v4816_v6 }
  0xd3   : > { %1348 = vmatmul.mubr.bf16.gmra.mrb[36].mxu0 %v4818_v7 }
  0xd4   : > { %1509 = vmatmul.mubr.bf16.gmra.mrb[36].mxu1 %v4819_v8  ;;  %1355 = vmatprep.mubr.bf16.mxu0 %v4820_v9 }
  0xd5   : > { %1516 = vmatprep.mubr.bf16.mxu1 %v4822_v10 }
  0xdb   : > { %1356 = vmatmul.mubr.bf16.gmra.mrb[40].mxu0 %v4824_v11 }
  0xdc   : > { %1517 = vmatmul.mubr.bf16.gmra.mrb[40].mxu1 %v4825_v12  ;;  %1363 = vmatprep.mubr.bf16.mxu0 %v4826_v13 }
  0xdd   : > { %1524 = vmatprep.mubr.bf16.mxu1 %v4828_v14  ;;  %v639_v14 = vld [vmem:[%s5561_s0 + $0x20] sm:$0xff] }
  0xe3   : > { %1364 = vmatmul.mubr.bf16.gmra.mrb[44].mxu0 %v4830_v15 }
  0xe4   : > { %1525 = vmatmul.mubr.bf16.gmra.mrb[44].mxu1 %v4831_v16  ;;  %1371 = vmatprep.mubr.bf16.mxu0 %v4832_v17 }
  0xe5   : > { %1532 = vmatprep.mubr.bf16.mxu1 %v4834_v18 }
  0xeb   : > { %1372 = vmatmul.mubr.bf16.gmra.mrb[48].mxu0 %v4836_v19  ;;  %v640_v19 = vld [vmem:[%s5561_s0 + $0x28] sm:$0xff] }
  0xec   : > { %1533 = vmatmul.mubr.bf16.gmra.mrb[48].mxu1 %v4837_v20  ;;  %1379 = vmatprep.mubr.bf16.mxu0 %v4838_v21 }
  0xed   : > { %1540 = vmatprep.mubr.bf16.mxu1 %v4840_v22 }
  0xf3   : > { %1380 = vmatmul.mubr.bf16.gmra.mrb[52].mxu0 %v4842_v23 }
  0xf4   : > { %1541 = vmatmul.mubr.bf16.gmra.mrb[52].mxu1 %v4843_v24  ;;  %1387 = vmatprep.mubr.bf16.mxu0 %v4844_v25 }
  0xf5   : > { %1548 = vmatprep.mubr.bf16.mxu1 %v4846_v26 }
  0xfb   : > { %1388 = vmatmul.mubr.bf16.gmra.mrb[56].mxu0 %v4848_v27 }
  0xfc   : > { %1549 = vmatmul.mubr.bf16.gmra.mrb[56].mxu1 %v4849_v28  ;;  %1395 = vmatprep.mubr.bf16.mxu0 %v4850_v29 }
  0xfd   : > { %1556 = vmatprep.mubr.bf16.mxu1 %v4852_v30 }
 0x103   : > { %1396 = vmatmul.mubr.bf16.gmra.mrb[60].mxu0 %v4854_v31 }
 0x104   : > { %1557 = vmatmul.mubr.bf16.gmra.mrb[60].mxu1 %v4855_v32  ;;  %v641_v32 = vld [vmem:[%s5561_s0 + $0x30] sm:$0xff] }
 0x15e   : > { %v4358_v33 = vpop.f32.mrb[0].mxu0 }
 0x15f   : > { %v4470_v34 = vpop.f32.mrb[0].mxu1  ;;  %v4359_v35 = vpop.f32.mrb[1].mxu0 }
 0x160   : > { %v4360_v36 = vadd.f32 %v4359_v35, %v4358_v33  ;;  %v4471_v37 = vpop.f32.mrb[1].mxu1  ;;  %v4361_v38 = vpop.f32.mrb[2].mxu0 }
 0x161   : > { %v4472_v39 = vadd.f32 %v4471_v37, %v4470_v34  ;;  %v4473_v40 = vpop.f32.mrb[2].mxu1  ;;  %v4362_v41 = vpop.f32.mrb[3].mxu0  ;;  %v642_v37 = vld [vmem:[%s5561_s0 + $0x38] sm:$0xff] }
 0x162   : > { %v4363_v43 = vadd.f32 %v4362_v41, %v4361_v38  ;;  %v4474_v44 = vpop.f32.mrb[3].mxu1 }
 0x163   : > { %v1439_v45 = vadd.f32 %v4472_v39, %v4360_v36  ;;  %v4475_v46 = vadd.f32 %v4474_v44, %v4473_v40 }
 0x165   : > { %v1565_v48 = vadd.f32 %v1439_v45, %v635_v42  ;;  %v1442_v49 = vadd.f32 %v4475_v46, %v4363_v43 }
 0x166   : > { %v4364_v50 = vpop.f32.mrb[4].mxu0 }
 0x167   : > { %1597 = vst [vmem:[%s5561_s0] sm:$0xff] %v1565_v48  ;;  %v1566_v51 = vadd.f32 %v1442_v49, %v636_v47  ;;  %v4476_v52 = vpop.f32.mrb[4].mxu1  ;;  %v4365_v53 = vpop.f32.mrb[5].mxu0 }
 0x168   : > { %v4366_v54 = vadd.f32 %v4365_v53, %v4364_v50  ;;  %v4477_v55 = vpop.f32.mrb[5].mxu1  ;;  %v4367_v56 = vpop.f32.mrb[6].mxu0  ;;  %v643_v50 = vld [vmem:[%s5561_s0 + $0x40] sm:$0xff] }
 0x169   : > { %1598 = vst [vmem:[%s5561_s0 + $0x8] sm:$0xff] %v1566_v51  ;;  %v4478_v57 = vadd.f32 %v4477_v55, %v4476_v52  ;;  %v4479_v58 = vpop.f32.mrb[6].mxu1  ;;  %v4368_v59 = vpop.f32.mrb[7].mxu0  ;;  %v644_v55 = vld [vmem:[%s5561_s0 + $0x48] sm:$0xff] }
 0x16a   : > { %v4369_v61 = vadd.f32 %v4368_v59, %v4367_v56  ;;  %v4480_v62 = vpop.f32.mrb[7].mxu1 }
 0x16b   : > { %v1447_v63 = vadd.f32 %v4478_v57, %v4366_v54  ;;  %v4481_v0 = vadd.f32 %v4480_v62, %v4479_v58 }
 0x16d   : > { %v1567_v2 = vadd.f32 %v1447_v63, %v637_v60  ;;  %v1450_v3 = vadd.f32 %v4481_v0, %v4369_v61 }
 0x16e   : > { %v4370_v4 = vpop.f32.mrb[8].mxu0 }
 0x16f   : > { %1599 = vst [vmem:[%s5561_s0 + $0x10] sm:$0xff] %v1567_v2  ;;  %v1568_v5 = vadd.f32 %v1450_v3, %v638_v1  ;;  %v4482_v6 = vpop.f32.mrb[8].mxu1  ;;  %v4371_v7 = vpop.f32.mrb[9].mxu0 }
 0x170   : > { %v4372_v8 = vadd.f32 %v4371_v7, %v4370_v4  ;;  %v4483_v9 = vpop.f32.mrb[9].mxu1  ;;  %v4373_v10 = vpop.f32.mrb[10].mxu0  ;;  %v645_v4 = vld [vmem:[%s5561_s0 + $0x50] sm:$0xff] }
 0x171   : > { %1600 = vst [vmem:[%s5561_s0 + $0x18] sm:$0xff] %v1568_v5  ;;  %v4484_v11 = vadd.f32 %v4483_v9, %v4482_v6  ;;  %v4485_v12 = vpop.f32.mrb[10].mxu1  ;;  %v4374_v13 = vpop.f32.mrb[11].mxu0  ;;  %v646_v9 = vld [vmem:[%s5561_s0 + $0x58] sm:$0xff] }
 0x172   : > { %v4375_v15 = vadd.f32 %v4374_v13, %v4373_v10  ;;  %v4486_v16 = vpop.f32.mrb[11].mxu1 }
 0x173   : > { %v1455_v17 = vadd.f32 %v4484_v11, %v4372_v8  ;;  %v4487_v18 = vadd.f32 %v4486_v16, %v4485_v12 }
 0x175   : > { %v1569_v20 = vadd.f32 %v1455_v17, %v639_v14  ;;  %v1458_v21 = vadd.f32 %v4487_v18, %v4375_v15 }
 0x176   : > { %v4376_v22 = vpop.f32.mrb[12].mxu0 }
 0x177   : > { %1601 = vst [vmem:[%s5561_s0 + $0x20] sm:$0xff] %v1569_v20  ;;  %v1570_v23 = vadd.f32 %v1458_v21, %v640_v19  ;;  %v4488_v24 = vpop.f32.mrb[12].mxu1  ;;  %v4377_v25 = vpop.f32.mrb[13].mxu0 }
 0x178   : > { %v4378_v26 = vadd.f32 %v4377_v25, %v4376_v22  ;;  %v4489_v27 = vpop.f32.mrb[13].mxu1  ;;  %v4379_v28 = vpop.f32.mrb[14].mxu0  ;;  %v647_v22 = vld [vmem:[%s5561_s0 + $0x60] sm:$0xff] }
 0x179   : > { %1602 = vst [vmem:[%s5561_s0 + $0x28] sm:$0xff] %v1570_v23  ;;  %v4490_v29 = vadd.f32 %v4489_v27, %v4488_v24  ;;  %v4491_v30 = vpop.f32.mrb[14].mxu1  ;;  %v4380_v31 = vpop.f32.mrb[15].mxu0  ;;  %v648_v27 = vld [vmem:[%s5561_s0 + $0x68] sm:$0xff] }
 0x17a   : > { %v4381_v33 = vadd.f32 %v4380_v31, %v4379_v28  ;;  %v4492_v34 = vpop.f32.mrb[15].mxu1 }
 0x17b   : > { %v1463_v35 = vadd.f32 %v4490_v29, %v4378_v26  ;;  %v4493_v36 = vadd.f32 %v4492_v34, %v4491_v30 }
 0x17d   : > { %v1571_v38 = vadd.f32 %v1463_v35, %v641_v32  ;;  %v1466_v39 = vadd.f32 %v4493_v36, %v4381_v33 }
 0x17e   : > { %v4382_v40 = vpop.f32.mrb[16].mxu0 }
 0x17f   : > { %1603 = vst [vmem:[%s5561_s0 + $0x30] sm:$0xff] %v1571_v38  ;;  %v1572_v41 = vadd.f32 %v1466_v39, %v642_v37  ;;  %v4494_v42 = vpop.f32.mrb[16].mxu1  ;;  %v4383_v43 = vpop.f32.mrb[17].mxu0 }
 0x180   : > { %v4384_v44 = vadd.f32 %v4383_v43, %v4382_v40  ;;  %v4495_v45 = vpop.f32.mrb[17].mxu1  ;;  %v4385_v46 = vpop.f32.mrb[18].mxu0  ;;  %v649_v40 = vld [vmem:[%s5561_s0 + $0x70] sm:$0xff] }
 0x181   : > { %1604 = vst [vmem:[%s5561_s0 + $0x38] sm:$0xff] %v1572_v41  ;;  %v4496_v47 = vadd.f32 %v4495_v45, %v4494_v42  ;;  %v4497_v48 = vpop.f32.mrb[18].mxu1  ;;  %v4386_v49 = vpop.f32.mrb[19].mxu0  ;;  %v650_v45 = vld [vmem:[%s5561_s0 + $0x78] sm:$0xff] }
 0x182   : > { %v4387_v51 = vadd.f32 %v4386_v49, %v4385_v46  ;;  %v4498_v52 = vpop.f32.mrb[19].mxu1 }
 0x183   : > { %v1471_v53 = vadd.f32 %v4496_v47, %v4384_v44  ;;  %v4499_v54 = vadd.f32 %v4498_v52, %v4497_v48 }
 0x185   : > { %v1573_v56 = vadd.f32 %v1471_v53, %v643_v50  ;;  %v1474_v57 = vadd.f32 %v4499_v54, %v4387_v51 }
 0x186   : > { %v4388_v58 = vpop.f32.mrb[20].mxu0 }
 0x187   : > { %1605 = vst [vmem:[%s5561_s0 + $0x40] sm:$0xff] %v1573_v56  ;;  %v1574_v59 = vadd.f32 %v1474_v57, %v644_v55  ;;  %v4500_v60 = vpop.f32.mrb[20].mxu1  ;;  %v4389_v61 = vpop.f32.mrb[21].mxu0 }
 0x188   : > { %v4390_v62 = vadd.f32 %v4389_v61, %v4388_v58  ;;  %v4501_v63 = vpop.f32.mrb[21].mxu1  ;;  %v4391_v0 = vpop.f32.mrb[22].mxu0  ;;  %v651_v58 = vld [vmem:[%s5561_s0 + $0x80] sm:$0xff] }
 0x189   : > { %1606 = vst [vmem:[%s5561_s0 + $0x48] sm:$0xff] %v1574_v59  ;;  %v4502_v1 = vadd.f32 %v4501_v63, %v4500_v60  ;;  %v4503_v2 = vpop.f32.mrb[22].mxu1  ;;  %v4392_v3 = vpop.f32.mrb[23].mxu0  ;;  %v652_v63 = vld [vmem:[%s5561_s0 + $0x88] sm:$0xff] }
 0x18a   : > { %v4393_v5 = vadd.f32 %v4392_v3, %v4391_v0  ;;  %v4504_v6 = vpop.f32.mrb[23].mxu1 }
 0x18b   : > { %v1479_v7 = vadd.f32 %v4502_v1, %v4390_v62  ;;  %v4505_v8 = vadd.f32 %v4504_v6, %v4503_v2 }
 0x18d   : > { %v1575_v10 = vadd.f32 %v1479_v7, %v645_v4  ;;  %v1482_v11 = vadd.f32 %v4505_v8, %v4393_v5 }
 0x18e   : > { %v4394_v12 = vpop.f32.mrb[24].mxu0 }
 0x18f   : > { %1607 = vst [vmem:[%s5561_s0 + $0x50] sm:$0xff] %v1575_v10  ;;  %v1576_v13 = vadd.f32 %v1482_v11, %v646_v9  ;;  %v4506_v14 = vpop.f32.mrb[24].mxu1  ;;  %v4395_v15 = vpop.f32.mrb[25].mxu0 }
 0x190   : > { %v4396_v16 = vadd.f32 %v4395_v15, %v4394_v12  ;;  %v4507_v17 = vpop.f32.mrb[25].mxu1  ;;  %v4397_v18 = vpop.f32.mrb[26].mxu0  ;;  %v653_v12 = vld [vmem:[%s5561_s0 + $0x90] sm:$0xff] }
 0x191   : > { %1608 = vst [vmem:[%s5561_s0 + $0x58] sm:$0xff] %v1576_v13  ;;  %v4508_v19 = vadd.f32 %v4507_v17, %v4506_v14  ;;  %v4509_v20 = vpop.f32.mrb[26].mxu1  ;;  %v4398_v21 = vpop.f32.mrb[27].mxu0  ;;  %v654_v17 = vld [vmem:[%s5561_s0 + $0x98] sm:$0xff] }
 0x192   : > { %v4399_v23 = vadd.f32 %v4398_v21, %v4397_v18  ;;  %v4510_v24 = vpop.f32.mrb[27].mxu1 }
 0x193   : > { %v1487_v25 = vadd.f32 %v4508_v19, %v4396_v16  ;;  %v4511_v26 = vadd.f32 %v4510_v24, %v4509_v20 }
 0x195   : > { %v1577_v28 = vadd.f32 %v1487_v25, %v647_v22  ;;  %v1490_v29 = vadd.f32 %v4511_v26, %v4399_v23 }
 0x196   : > { %v4400_v30 = vpop.f32.mrb[28].mxu0 }
 0x197   : > { %1609 = vst [vmem:[%s5561_s0 + $0x60] sm:$0xff] %v1577_v28  ;;  %v1578_v31 = vadd.f32 %v1490_v29, %v648_v27  ;;  %v4512_v32 = vpop.f32.mrb[28].mxu1  ;;  %v4401_v33 = vpop.f32.mrb[29].mxu0 }
 0x198   : > { %v4402_v34 = vadd.f32 %v4401_v33, %v4400_v30  ;;  %v4513_v35 = vpop.f32.mrb[29].mxu1  ;;  %v4403_v36 = vpop.f32.mrb[30].mxu0  ;;  %v655_v30 = vld [vmem:[%s5561_s0 + $0xa0] sm:$0xff] }
 0x199   : > { %1610 = vst [vmem:[%s5561_s0 + $0x68] sm:$0xff] %v1578_v31  ;;  %v4514_v37 = vadd.f32 %v4513_v35, %v4512_v32  ;;  %v4515_v38 = vpop.f32.mrb[30].mxu1  ;;  %v4404_v39 = vpop.f32.mrb[31].mxu0  ;;  %v656_v35 = vld [vmem:[%s5561_s0 + $0xa8] sm:$0xff] }
 0x19a   : > { %v4405_v41 = vadd.f32 %v4404_v39, %v4403_v36  ;;  %v4516_v42 = vpop.f32.mrb[31].mxu1 }
 0x19b   : > { %v1495_v43 = vadd.f32 %v4514_v37, %v4402_v34  ;;  %v4517_v44 = vadd.f32 %v4516_v42, %v4515_v38 }
 0x19d   : > { %v1579_v46 = vadd.f32 %v1495_v43, %v649_v40  ;;  %v1498_v47 = vadd.f32 %v4517_v44, %v4405_v41 }
 0x19e   : > { %v4406_v48 = vpop.f32.mrb[32].mxu0 }
 0x19f   : > { %1611 = vst [vmem:[%s5561_s0 + $0x70] sm:$0xff] %v1579_v46  ;;  %v1580_v49 = vadd.f32 %v1498_v47, %v650_v45  ;;  %v4518_v50 = vpop.f32.mrb[32].mxu1  ;;  %v4407_v51 = vpop.f32.mrb[33].mxu0 }
 0x1a0   : > { %v4408_v52 = vadd.f32 %v4407_v51, %v4406_v48  ;;  %v4519_v53 = vpop.f32.mrb[33].mxu1  ;;  %v4409_v54 = vpop.f32.mrb[34].mxu0  ;;  %v657_v48 = vld [vmem:[%s5561_s0 + $0xb0] sm:$0xff] }
 0x1a1   : > { %1612 = vst [vmem:[%s5561_s0 + $0x78] sm:$0xff] %v1580_v49  ;;  %v4520_v55 = vadd.f32 %v4519_v53, %v4518_v50  ;;  %v4521_v56 = vpop.f32.mrb[34].mxu1  ;;  %v4410_v57 = vpop.f32.mrb[35].mxu0  ;;  %v658_v53 = vld [vmem:[%s5561_s0 + $0xb8] sm:$0xff] }
 0x1a2   : > { %v4411_v59 = vadd.f32 %v4410_v57, %v4409_v54  ;;  %v4522_v60 = vpop.f32.mrb[35].mxu1 }
 0x1a3   : > { %v1503_v61 = vadd.f32 %v4520_v55, %v4408_v52  ;;  %v4523_v62 = vadd.f32 %v4522_v60, %v4521_v56 }
 0x1a5   : > { %v1581_v0 = vadd.f32 %v1503_v61, %v651_v58  ;;  %v1506_v1 = vadd.f32 %v4523_v62, %v4411_v59 }
 0x1a6   : > { %v4412_v2 = vpop.f32.mrb[36].mxu0 }
 0x1a7   : > { %1613 = vst [vmem:[%s5561_s0 + $0x80] sm:$0xff] %v1581_v0  ;;  %v1582_v3 = vadd.f32 %v1506_v1, %v652_v63  ;;  %v4524_v4 = vpop.f32.mrb[36].mxu1  ;;  %v4413_v5 = vpop.f32.mrb[37].mxu0 }
 0x1a8   : > { %v4414_v6 = vadd.f32 %v4413_v5, %v4412_v2  ;;  %v4525_v7 = vpop.f32.mrb[37].mxu1  ;;  %v4415_v8 = vpop.f32.mrb[38].mxu0  ;;  %v659_v2 = vld [vmem:[%s5561_s0 + $0xc0] sm:$0xff] }
 0x1a9   : > { %1614 = vst [vmem:[%s5561_s0 + $0x88] sm:$0xff] %v1582_v3  ;;  %v4526_v9 = vadd.f32 %v4525_v7, %v4524_v4  ;;  %v4527_v10 = vpop.f32.mrb[38].mxu1  ;;  %v4416_v11 = vpop.f32.mrb[39].mxu0  ;;  %v660_v7 = vld [vmem:[%s5561_s0 + $0xc8] sm:$0xff] }
 0x1aa   : > { %v4417_v13 = vadd.f32 %v4416_v11, %v4415_v8  ;;  %v4528_v14 = vpop.f32.mrb[39].mxu1 }
 0x1ab   : > { %v1511_v15 = vadd.f32 %v4526_v9, %v4414_v6  ;;  %v4529_v16 = vadd.f32 %v4528_v14, %v4527_v10 }
 0x1ad   : > { %v1583_v18 = vadd.f32 %v1511_v15, %v653_v12  ;;  %v1514_v19 = vadd.f32 %v4529_v16, %v4417_v13 }
 0x1ae   : > { %v4418_v20 = vpop.f32.mrb[40].mxu0 }
 0x1af   : > { %1615 = vst [vmem:[%s5561_s0 + $0x90] sm:$0xff] %v1583_v18  ;;  %v1584_v21 = vadd.f32 %v1514_v19, %v654_v17  ;;  %v4530_v22 = vpop.f32.mrb[40].mxu1  ;;  %v4419_v23 = vpop.f32.mrb[41].mxu0 }
 0x1b0   : > { %v4420_v24 = vadd.f32 %v4419_v23, %v4418_v20  ;;  %v4531_v25 = vpop.f32.mrb[41].mxu1  ;;  %v4421_v26 = vpop.f32.mrb[42].mxu0  ;;  %v661_v20 = vld [vmem:[%s5561_s0 + $0xd0] sm:$0xff] }
 0x1b1   : > { %1616 = vst [vmem:[%s5561_s0 + $0x98] sm:$0xff] %v1584_v21  ;;  %v4532_v27 = vadd.f32 %v4531_v25, %v4530_v22  ;;  %v4533_v28 = vpop.f32.mrb[42].mxu1  ;;  %v4422_v29 = vpop.f32.mrb[43].mxu0  ;;  %v662_v25 = vld [vmem:[%s5561_s0 + $0xd8] sm:$0xff] }
 0x1b2   : > { %v4423_v31 = vadd.f32 %v4422_v29, %v4421_v26  ;;  %v4534_v32 = vpop.f32.mrb[43].mxu1 }
 0x1b3   : > { %v1519_v33 = vadd.f32 %v4532_v27, %v4420_v24  ;;  %v4535_v34 = vadd.f32 %v4534_v32, %v4533_v28 }
 0x1b5   : > { %v1585_v36 = vadd.f32 %v1519_v33, %v655_v30  ;;  %v1522_v37 = vadd.f32 %v4535_v34, %v4423_v31 }
 0x1b6   : > { %v4424_v38 = vpop.f32.mrb[44].mxu0 }
 0x1b7   : > { %1617 = vst [vmem:[%s5561_s0 + $0xa0] sm:$0xff] %v1585_v36  ;;  %v1586_v39 = vadd.f32 %v1522_v37, %v656_v35  ;;  %v4536_v40 = vpop.f32.mrb[44].mxu1  ;;  %v4425_v41 = vpop.f32.mrb[45].mxu0 }
 0x1b8   : > { %v4426_v42 = vadd.f32 %v4425_v41, %v4424_v38  ;;  %v4537_v43 = vpop.f32.mrb[45].mxu1  ;;  %v4427_v44 = vpop.f32.mrb[46].mxu0  ;;  %v663_v38 = vld [vmem:[%s5561_s0 + $0xe0] sm:$0xff] }
 0x1b9   : > { %1618 = vst [vmem:[%s5561_s0 + $0xa8] sm:$0xff] %v1586_v39  ;;  %v4538_v45 = vadd.f32 %v4537_v43, %v4536_v40  ;;  %v4539_v46 = vpop.f32.mrb[46].mxu1  ;;  %v4428_v47 = vpop.f32.mrb[47].mxu0  ;;  %v664_v43 = vld [vmem:[%s5561_s0 + $0xe8] sm:$0xff] }
 0x1ba   : > { %v4429_v49 = vadd.f32 %v4428_v47, %v4427_v44  ;;  %v4540_v50 = vpop.f32.mrb[47].mxu1 }
 0x1bb   : > { %v1527_v51 = vadd.f32 %v4538_v45, %v4426_v42  ;;  %v4541_v52 = vadd.f32 %v4540_v50, %v4539_v46 }
 0x1bd   : > { %v1587_v54 = vadd.f32 %v1527_v51, %v657_v48  ;;  %v1530_v55 = vadd.f32 %v4541_v52, %v4429_v49 }
 0x1be   : > { %v4430_v56 = vpop.f32.mrb[48].mxu0 }
 0x1bf   : > { %1619 = vst [vmem:[%s5561_s0 + $0xb0] sm:$0xff] %v1587_v54  ;;  %v1588_v57 = vadd.f32 %v1530_v55, %v658_v53  ;;  %v4542_v58 = vpop.f32.mrb[48].mxu1  ;;  %v4431_v59 = vpop.f32.mrb[49].mxu0 }
 0x1c0   : > { %v4432_v60 = vadd.f32 %v4431_v59, %v4430_v56  ;;  %v4543_v61 = vpop.f32.mrb[49].mxu1  ;;  %v4433_v62 = vpop.f32.mrb[50].mxu0  ;;  %v665_v56 = vld [vmem:[%s5561_s0 + $0xf0] sm:$0xff] }
 0x1c1   : > { %1620 = vst [vmem:[%s5561_s0 + $0xb8] sm:$0xff] %v1588_v57  ;;  %v4544_v63 = vadd.f32 %v4543_v61, %v4542_v58  ;;  %v4545_v0 = vpop.f32.mrb[50].mxu1  ;;  %v4434_v1 = vpop.f32.mrb[51].mxu0  ;;  %v666_v61 = vld [vmem:[%s5561_s0 + $0xf8] sm:$0xff] }
 0x1c2   : > { %v4435_v3 = vadd.f32 %v4434_v1, %v4433_v62  ;;  %v4546_v4 = vpop.f32.mrb[51].mxu1 }
 0x1c3   : > { %v1535_v5 = vadd.f32 %v4544_v63, %v4432_v60  ;;  %v4547_v6 = vadd.f32 %v4546_v4, %v4545_v0 }
 0x1c5   : > { %v1589_v8 = vadd.f32 %v1535_v5, %v659_v2  ;;  %v1538_v9 = vadd.f32 %v4547_v6, %v4435_v3 }
 0x1c6   : > { %v4436_v10 = vpop.f32.mrb[52].mxu0 }
 0x1c7   : > { %1621 = vst [vmem:[%s5561_s0 + $0xc0] sm:$0xff] %v1589_v8  ;;  %v1590_v11 = vadd.f32 %v1538_v9, %v660_v7  ;;  %v4548_v12 = vpop.f32.mrb[52].mxu1  ;;  %v4437_v13 = vpop.f32.mrb[53].mxu0 }
 0x1c8   : > { %v4438_v14 = vadd.f32 %v4437_v13, %v4436_v10  ;;  %v4549_v15 = vpop.f32.mrb[53].mxu1  ;;  %v4439_v16 = vpop.f32.mrb[54].mxu0 }
 0x1c9   : > { %1622 = vst [vmem:[%s5561_s0 + $0xc8] sm:$0xff] %v1590_v11  ;;  %v4550_v17 = vadd.f32 %v4549_v15, %v4548_v12  ;;  %v4551_v18 = vpop.f32.mrb[54].mxu1  ;;  %v4440_v19 = vpop.f32.mrb[55].mxu0 }
 0x1ca   : > { %v4441_v21 = vadd.f32 %v4440_v19, %v4439_v16  ;;  %v4552_v22 = vpop.f32.mrb[55].mxu1 }
 0x1cb   : > { %v1543_v23 = vadd.f32 %v4550_v17, %v4438_v14  ;;  %v4553_v24 = vadd.f32 %v4552_v22, %v4551_v18 }
 0x1cd   : > { %v1591_v26 = vadd.f32 %v1543_v23, %v661_v20  ;;  %v1546_v27 = vadd.f32 %v4553_v24, %v4441_v21 }
 0x1ce   : > { %v4442_v28 = vpop.f32.mrb[56].mxu0 }
 0x1cf   : > { %1623 = vst [vmem:[%s5561_s0 + $0xd0] sm:$0xff] %v1591_v26  ;;  %v1592_v29 = vadd.f32 %v1546_v27, %v662_v25  ;;  %v4554_v30 = vpop.f32.mrb[56].mxu1  ;;  %v4443_v31 = vpop.f32.mrb[57].mxu0 }
 0x1d0   : > { %v4444_v32 = vadd.f32 %v4443_v31, %v4442_v28  ;;  %v4555_v33 = vpop.f32.mrb[57].mxu1  ;;  %v4445_v34 = vpop.f32.mrb[58].mxu0 }
 0x1d1   : > { %1624 = vst [vmem:[%s5561_s0 + $0xd8] sm:$0xff] %v1592_v29  ;;  %v4556_v35 = vadd.f32 %v4555_v33, %v4554_v30  ;;  %v4557_v36 = vpop.f32.mrb[58].mxu1  ;;  %v4446_v37 = vpop.f32.mrb[59].mxu0 }
 0x1d2   : > { %v4447_v39 = vadd.f32 %v4446_v37, %v4445_v34  ;;  %v4558_v40 = vpop.f32.mrb[59].mxu1 }
 0x1d3   : > { %v1551_v41 = vadd.f32 %v4556_v35, %v4444_v32  ;;  %v4559_v42 = vadd.f32 %v4558_v40, %v4557_v36 }
 0x1d5   : > { %v1593_v44 = vadd.f32 %v1551_v41, %v663_v38  ;;  %v1554_v45 = vadd.f32 %v4559_v42, %v4447_v39 }
 0x1d6   : > { %v4448_v46 = vpop.f32.mrb[60].mxu0 }
 0x1d7   : > { %1625 = vst [vmem:[%s5561_s0 + $0xe0] sm:$0xff] %v1593_v44  ;;  %v1594_v47 = vadd.f32 %v1554_v45, %v664_v43  ;;  %v4560_v48 = vpop.f32.mrb[60].mxu1  ;;  %v4449_v49 = vpop.f32.mrb[61].mxu0 }
 0x1d8   : > { %v4450_v50 = vadd.f32 %v4449_v49, %v4448_v46  ;;  %v4561_v51 = vpop.f32.mrb[61].mxu1  ;;  %v4451_v52 = vpop.f32.mrb[62].mxu0 }
 0x1d9   : > { %1626 = vst [vmem:[%s5561_s0 + $0xe8] sm:$0xff] %v1594_v47  ;;  %v4562_v53 = vadd.f32 %v4561_v51, %v4560_v48  ;;  %v4563_v54 = vpop.f32.mrb[62].mxu1  ;;  %v4452_v55 = vpop.f32.mrb[63].mxu0 }
 0x1da   : > { %v4453_v57 = vadd.f32 %v4452_v55, %v4451_v52  ;;  %v4564_v58 = vpop.f32.mrb[63].mxu1 }
 0x1db   : > { %v1559_v59 = vadd.f32 %v4562_v53, %v4450_v50  ;;  %v4565_v60 = vadd.f32 %v4564_v58, %v4563_v54  ;;  %1632 = sbr.rel (%p4099_p2) target bundleno = 1231 (0x4cf), region = 79 }
 0x1dd   : > { %v1595_v62 = vadd.f32 %v1559_v59, %v665_v56  ;;  %v1562_v63 = vadd.f32 %v4565_v60, %v4453_v57 }
 0x1df   : > { %1627 = vst [vmem:[%s5561_s0 + $0xf0] sm:$0xff] %v1595_v62  ;;  %v1596_v0 = vadd.f32 %v1562_v63, %v666_v61 }
 0x1e1   : > { %1628 = vst [vmem:[%s5561_s0 + $0xf8] sm:$0xff] %v1596_v0 }
 0x1e2   : > { %v1800_v1 = vld [vmem:[%s5552_s24 + $0x10] sm:$0xff]  ;;  %v1798_v2 = vld [vmem:[%s5552_s24] sm:$0xff]  ;;  %v5256_v3 = vmov 0   ;;  %v1801_v4 = vld [vmem:[%s5552_s24 + $0x18] sm:$0xff]  ;;  %s4100_s20 = sshll.u32 %s5241_s23, 8 }
 0x1e3   : > { %4857 = vset.pattern.permute.xlu1 %v5256_v3  ;;  %4856 = vset.pattern.permute.xlu0 %v5256_v3  ;;  %v1799_v5 = vld [vmem:[%s5552_s24 + $0x8] sm:$0xff]  ;;  %v1802_v7 = vld [vmem:[%s5552_s24 + $0x20] sm:$0xff]  ;;  %v1805_v9 = vld [vmem:[%s5552_s24 + $0x38] sm:$0xff]  ;;  %s1634_s16 = sshra.s32 %s4100_s20, 3 }
 0x1e4   : > { %1842 = vperm.xlu1 %4857, %v1800_v1   ;;  %1832 = vperm.xlu0 %4856, %v1798_v2   ;;  %v1803_v6 = vld [vmem:[%s5552_s24 + $0x28] sm:$0xff]  ;;  %v1804_v10 = vld [vmem:[%s5552_s24 + $0x30] sm:$0xff]  ;;  %v1806_v15 = vld [vmem:[%s5552_s24 + $0x40] sm:$0xff]  ;;  %s4101_s12 = sshll.u32 %s1634_s16, 2 }
 0x1e5   : > { %2246 = vmatprep.mubr.bf16.mxu0 %v5256_v3  ;;  %2366 = vmatprep.mubr.bf16.mxu1 %v5256_v3  ;;  %v4858_v8 = vld [vmem:[%s6865_s7 + $0x4] ss:$8 sps:$4 sm:$0xff]   ;;  %v4860_v11 = vld [vmem:[%s6865_s7] ss:$8 sps:$4 sm:$0xff]   ;;  %v4861_v12 = vld [vmem:[%s6865_s7 + $0x14] ss:$8 sps:$4 sm:$0xff]   ;;  %s5831_s2 = scalar_lea.vmem %s6861_s3, %s4101_s12 }
 0x1e6   : > { %2214 = vmatprep.subr.bf16.mxu0 %v4858_v8  ;;  %4638 = vmatprep.subr.bf16.mxu1 %v4858_v8  ;;  %v4863_v13 = vld [vmem:[%s6865_s7 + $0x10] ss:$8 sps:$4 sm:$0xff]   ;;  %v1807_v14 = vld [vmem:[%s5552_s24 + $0x48] sm:$0xff]  ;;  %v4867_v20 = vld [vmem:[%s6865_s7 + $0x34] ss:$8 sps:$4 sm:$0xff]  }
 0x1e7   : > { %2215 = vmatpush1.bf16.msra.mxu0 %v4860_v11  ;;  %4646 = vmatpush1.bf16.msra.mxu1 %v4860_v11  ;;  %v4864_v16 = vld [vmem:[%s6865_s7 + $0x24] ss:$8 sps:$4 sm:$0xff]   ;;  %v4866_v17 = vld [vmem:[%s6865_s7 + $0x20] ss:$8 sps:$4 sm:$0xff]   ;;  %v1809_v18 = vld [vmem:[%s5552_s24 + $0x58] sm:$0xff] }
 0x1e8   : > { %1847 = vperm.xlu1 %4857, %v1801_v4   ;;  %1837 = vperm.xlu0 %4856, %v1799_v5   ;;  %v1808_v19 = vld [vmem:[%s5552_s24 + $0x50] sm:$0xff]  ;;  %v1811_v22 = vld [vmem:[%s5552_s24 + $0x68] sm:$0xff]  ;;  %v1810_v23 = vld [vmem:[%s5552_s24 + $0x60] sm:$0xff] }
 0x1e9   : > { %2216 = vmatprep.subr.bf16.mxu0 %v4861_v12  ;;  %4639 = vmatprep.subr.bf16.mxu1 %v4861_v12  ;;  %v4869_v21 = vld [vmem:[%s6865_s7 + $0x30] ss:$8 sps:$4 sm:$0xff]   ;;  %v4870_v24 = vld [vmem:[%s6865_s7 + $0x44] ss:$8 sps:$4 sm:$0xff]   ;;  %v4872_v25 = vld [vmem:[%s6865_s7 + $0x40] ss:$8 sps:$4 sm:$0xff]  }
 0x1ea   : > { %v1813_v26 = vld [vmem:[%s5552_s24 + $0x78] sm:$0xff]  ;;  %v1812_v27 = vld [vmem:[%s5552_s24 + $0x70] sm:$0xff]  ;;  %v1815_v30 = vld [vmem:[%s5552_s24 + $0x88] sm:$0xff] }
 0x1eb   : > { %2217 = vmatpush1.bf16.msra.mxu0 %v4863_v13  ;;  %4647 = vmatpush1.bf16.msra.mxu1 %v4863_v13  ;;  %v4873_v28 = vld [vmem:[%s6865_s7 + $0x54] ss:$8 sps:$4 sm:$0xff]   ;;  %v4875_v29 = vld [vmem:[%s6865_s7 + $0x50] ss:$8 sps:$4 sm:$0xff]   ;;  %v1814_v31 = vld [vmem:[%s5552_s24 + $0x80] sm:$0xff] }
 0x1ec   : > { %1857 = vperm.xlu1 %4857, %v1803_v6   ;;  %1852 = vperm.xlu0 %4856, %v1802_v7   ;;  %v4876_v32 = vld [vmem:[%s6865_s7 + $0x64] ss:$8 sps:$4 sm:$0xff]   ;;  %v4878_v33 = vld [vmem:[%s6865_s7 + $0x60] ss:$8 sps:$4 sm:$0xff]   ;;  %v1817_v34 = vld [vmem:[%s5552_s24 + $0x98] sm:$0xff] }
 0x1ed   : > { %2218 = vmatprep.subr.bf16.mxu0 %v4864_v16  ;;  %4640 = vmatprep.subr.bf16.mxu1 %v4864_v16  ;;  %v1816_v35 = vld [vmem:[%s5552_s24 + $0x90] sm:$0xff]  ;;  %v5842_v38 = vld [vmem:[%s5831_s2] sm:$0xff]   ;;  %v1819_v40 = vld [vmem:[%s5552_s24 + $0xa8] sm:$0xff] }
 0x1ee   : > { %v4879_v36 = vld [vmem:[%s6865_s7 + $0x74] ss:$8 sps:$4 sm:$0xff]   ;;  %v4881_v37 = vld [vmem:[%s6865_s7 + $0x70] ss:$8 sps:$4 sm:$0xff]   ;;  %v5845_v39 = vld [vmem:[%s5831_s2 + $0x60] sm:$0xff]  }
 0x1ef   : > { %2219 = vmatpush1.bf16.msra.mxu0 %v4866_v17  ;;  %4648 = vmatpush1.bf16.msra.mxu1 %v4866_v17  ;;  %v1818_v41 = vld [vmem:[%s5552_s24 + $0xa0] sm:$0xff]  ;;  %v1821_v43 = vld [vmem:[%s5552_s24 + $0xb8] sm:$0xff]  ;;  %v1820_v44 = vld [vmem:[%s5552_s24 + $0xb0] sm:$0xff] }
 0x1f0   : > { %1867 = vperm.xlu1 %4857, %v1805_v9   ;;  %1862 = vperm.xlu0 %4856, %v1804_v10   ;;  %v4885_v42 = vld [vmem:[%s6864_s6] sm:$0xff]   ;;  %v4887_v45 = vld [vmem:[%s6864_s6 + $0x8] sm:$0xff]   ;;  %v4889_v50 = vld [vmem:[%s6864_s6 + $0x10] sm:$0xff]  }
 0x1f1   : > { %2220 = vmatprep.subr.bf16.mxu0 %v4867_v20  ;;  %4641 = vmatprep.subr.bf16.mxu1 %v4867_v20  ;;  %v5861_v46 = vld [vmem:[%s5831_s2 + $0x8] sm:$0xff]   ;;  %v1822_v49 = vld [vmem:[%s5552_s24 + $0xc0] sm:$0xff]  ;;  %v1825_v51 = vld [vmem:[%s5552_s24 + $0xd8] sm:$0xff] }
 0x1f2   : > { %v5864_v47 = vld [vmem:[%s5831_s2 + $0x68] sm:$0xff]   ;;  %v1824_v52 = vld [vmem:[%s5552_s24 + $0xd0] sm:$0xff]  ;;  %v4891_v53 = vld [vmem:[%s6864_s6 + $0x18] sm:$0xff]  }
 0x1f3   : > { %2221 = vmatpush1.bf16.msra.mxu0 %v4869_v21  ;;  %4649 = vmatpush1.bf16.msra.mxu1 %v4869_v21  ;;  %v1823_v48 = vld [vmem:[%s5552_s24 + $0xc8] sm:$0xff]  ;;  %v5881_v54 = vld [vmem:[%s5831_s2 + $0x10] sm:$0xff]   ;;  %v1826_v57 = vld [vmem:[%s5552_s24 + $0xe0] sm:$0xff] }
 0x1f4   : > { %1877 = vperm.xlu1 %4857, %v1807_v14   ;;  %1872 = vperm.xlu0 %4856, %v1806_v15   ;;  %v5884_v55 = vld [vmem:[%s5831_s2 + $0x70] sm:$0xff]   ;;  %v1827_v56 = vld [vmem:[%s5552_s24 + $0xe8] sm:$0xff]  ;;  %v4893_v58 = vld [vmem:[%s6864_s6 + $0x20] sm:$0xff]  }
 0x1f5   : > { %2222 = vmatprep.subr.bf16.mxu0 %v4870_v24  ;;  %4642 = vmatprep.subr.bf16.mxu1 %v4870_v24  ;;  %v1829_v59 = vld [vmem:[%s5552_s24 + $0xf8] sm:$0xff]  ;;  %v1828_v60 = vld [vmem:[%s5552_s24 + $0xf0] sm:$0xff]  ;;  %v4895_v61 = vld [vmem:[%s6864_s6 + $0x28] sm:$0xff]  }
 0x1f6   : > { %v5901_v62 = vld [vmem:[%s5831_s2 + $0x18] sm:$0xff]   ;;  %v4897_v0 = vld [vmem:[%s6864_s6 + $0x30] sm:$0xff]   ;;  %v5917_v2 = vld [vmem:[%s5831_s2 + $0x20] sm:$0xff]  }
 0x1f7   : > { %2223 = vmatpush1.bf16.msra.mxu0 %v4872_v25  ;;  %4650 = vmatpush1.bf16.msra.mxu1 %v4872_v25  ;;  %v5904_v63 = vld [vmem:[%s5831_s2 + $0x78] sm:$0xff]   ;;  %v5922_v4 = vld [vmem:[%s5831_s2 + $0x28] sm:$0xff]   ;;  %v5927_v5 = vld [vmem:[%s5831_s2 + $0x30] sm:$0xff]  }
 0x1f8   : > { %1887 = vperm.xlu1 %4857, %v1809_v18   ;;  %1882 = vperm.xlu0 %4856, %v1808_v19   ;;  %v4899_v1 = vld [vmem:[%s6864_s6 + $0x38] sm:$0xff]   ;;  %v1654_v7 = vld [vmem:[%s5831_s2 + $0x40] sm:$0xff]   ;;  %v1656_v8 = vld [vmem:[%s5831_s2 + $0x48] sm:$0xff]  }
 0x1f9   : > { %2224 = vmatprep.subr.bf16.mxu0 %v4873_v28  ;;  %4643 = vmatprep.subr.bf16.mxu1 %v4873_v28  ;;  %v1652_v6 = vld [vmem:[%s5831_s2 + $0x38] sm:$0xff]   ;;  %v1658_v9 = vld [vmem:[%s5831_s2 + $0x50] sm:$0xff]   ;;  %v1702_v13 = vld [vmem:[%s5561_s0] sm:$0xff] }
 0x1fa   : > { %v1704_v10 = vld [vmem:[%s5561_s0 + $0x10] sm:$0xff]  ;;  %v1660_v12 = vld [vmem:[%s5831_s2 + $0x58] sm:$0xff]   ;;  %v1734_v14 = vld [vmem:[%s5547_s28] sm:$0xff] }
 0x1fb   : > { %2225 = vmatpush1.bf16.msra.mxu0 %v4875_v29  ;;  %4651 = vmatpush1.bf16.msra.mxu1 %v4875_v29  ;;  %v1736_v11 = vld [vmem:[%s5547_s28 + $0x10] sm:$0xff]  ;;  %v1705_v15 = vld [vmem:[%s5561_s0 + $0x18] sm:$0xff]  ;;  %v1703_v17 = vld [vmem:[%s5561_s0 + $0x8] sm:$0xff] }
 0x1fc   : > { %1897 = vperm.xlu1 %4857, %v1811_v22   ;;  %1892 = vperm.xlu0 %4856, %v1810_v23   ;;  %v1737_v16 = vld [vmem:[%s5547_s28 + $0x18] sm:$0xff]  ;;  %v1735_v18 = vld [vmem:[%s5547_s28 + $0x8] sm:$0xff]  ;;  %v1768_v22 = vadd.f32 %v1736_v11, %v1704_v10  ;;  %v1766_v23 = vadd.f32 %v1734_v14, %v1702_v13  ;;  %v1744_v10 = vld [vmem:[%s5547_s28 + $0x50] sm:$0xff] }
 0x1fd   : > { %2226 = vmatprep.subr.bf16.mxu0 %v4876_v32  ;;  %4644 = vmatprep.subr.bf16.mxu1 %v4876_v32  ;;  %v1707_v21 = vld [vmem:[%s5561_s0 + $0x28] sm:$0xff]  ;;  %v1769_v24 = vadd.f32 %v1737_v16, %v1705_v15  ;;  %v1767_v25 = vadd.f32 %v1735_v18, %v1703_v17 }
 0x1fe   : > { %v1715_v18 = vld [vmem:[%s5561_s0 + $0x68] sm:$0xff] }
 0x1ff   : > { %2227 = vmatpush1.bf16.msra.mxu0 %v4878_v33  ;;  %4652 = vmatpush1.bf16.msra.mxu1 %v4878_v33 }
 0x200   : > { %1907 = vperm.xlu1 %4857, %v1813_v26   ;;  %1902 = vperm.xlu0 %4856, %v1812_v27   ;;  %v1706_v26 = vld [vmem:[%s5561_s0 + $0x20] sm:$0xff] }
 0x201   : > { %2228 = vmatprep.subr.bf16.mxu0 %v4879_v36  ;;  %4645 = vmatprep.subr.bf16.mxu1 %v4879_v36  ;;  %v1738_v27 = vld [vmem:[%s5547_s28 + $0x20] sm:$0xff]  ;;  %v1709_v36 = vld [vmem:[%s5561_s0 + $0x38] sm:$0xff] }
 0x203   : > { %2229 = vmatpush1.bf16.msra.mxu0 %v4881_v37  ;;  %4653 = vmatpush1.bf16.msra.mxu1 %v4881_v37  ;;  %v1741_v37 = vld [vmem:[%s5547_s28 + $0x38] sm:$0xff] }
 0x204   : > { %1917 = vperm.xlu1 %4857, %v1815_v30   ;;  %1912 = vperm.xlu0 %4856, %v1814_v31   ;;  %v1770_v31 = vadd.f32 %v1738_v27, %v1706_v26 }
 0x205   : > { %4590 = vmatprep.subr.bf16.mxu1 %v4885_v42 }
 0x206   : > { %2247 = vmatmul.mubr.bf16.vlgmr.msra.gmra.mrb[0].mxu0 %v5842_v38  ;;  %2367 = vmatmul.mubr.bf16.vlgmr.msra.gmra.mrb[0].mxu1 %v5845_v39 }
 0x207   : > { %2256 = vmatprep.mubr.bf16.mxu0 %v5256_v3  ;;  %4591 = vmatpush3.bf16.msra.mxu1 %v4885_v42 }
 0x208   : > { %1927 = vperm.xlu1 %4857, %v1817_v34   ;;  %1922 = vperm.xlu0 %4856, %v1816_v35  }
 0x209   : > { %4592 = vmatprep.subr.bf16.mxu1 %v4887_v45  ;;  %2376 = vmatprep.mubr.bf16.mxu1 %v5256_v3 }
 0x20b   : > { %4593 = vmatpush3.bf16.msra.mxu1 %v4887_v45 }
 0x20c   : > { %1937 = vperm.xlu1 %4857, %v1819_v40   ;;  %1932 = vperm.xlu0 %4856, %v1818_v41   ;;  %v1708_v40 = vld [vmem:[%s5561_s0 + $0x30] sm:$0xff] }
 0x20d   : > { %4594 = vmatprep.subr.bf16.mxu1 %v4889_v50  ;;  %v1740_v41 = vld [vmem:[%s5547_s28 + $0x30] sm:$0xff] }
 0x20e   : > { %2257 = vmatmul.mubr.bf16.gmra.mrb[4].mxu0 %v5861_v46  ;;  %2377 = vmatmul.mubr.bf16.gmra.mrb[4].mxu1 %v5864_v47 }
 0x20f   : > { %2266 = vmatprep.mubr.bf16.mxu0 %v5256_v3  ;;  %4595 = vmatpush3.bf16.msra.mxu1 %v4889_v50  ;;  %v1773_v50 = vadd.f32 %v1741_v37, %v1709_v36 }
 0x210   : > { %1947 = vperm.xlu1 %4857, %v1821_v43   ;;  %1942 = vperm.xlu0 %4856, %v1820_v44  }
 0x211   : > { %4596 = vmatprep.subr.bf16.mxu1 %v4891_v53  ;;  %2386 = vmatprep.mubr.bf16.mxu1 %v5256_v3 }
 0x213   : > { %4597 = vmatpush3.bf16.msra.mxu1 %v4891_v53  ;;  %v1743_v53 = vld [vmem:[%s5547_s28 + $0x48] sm:$0xff] }
 0x214   : > { %1957 = vperm.xlu1 %4857, %v1823_v48   ;;  %1952 = vperm.xlu0 %4856, %v1822_v49  }
 0x215   : > { %4598 = vmatprep.subr.bf16.mxu1 %v4893_v58 }
 0x216   : > { %2267 = vmatmul.mubr.bf16.gmra.mrb[8].mxu0 %v5881_v54  ;;  %2387 = vmatmul.mubr.bf16.gmra.mrb[8].mxu1 %v5884_v55 }
 0x217   : > { %2276 = vmatprep.mubr.bf16.mxu0 %v5256_v3  ;;  %4599 = vmatpush3.bf16.msra.mxu1 %v4893_v58 }
 0x218   : > { %1967 = vperm.xlu1 %4857, %v1825_v51   ;;  %1962 = vperm.xlu0 %4856, %v1824_v52   ;;  %v1772_v51 = vadd.f32 %v1740_v41, %v1708_v40  ;;  %v1711_v52 = vld [vmem:[%s5561_s0 + $0x48] sm:$0xff] }
 0x219   : > { %4600 = vmatprep.subr.bf16.mxu1 %v4895_v61  ;;  %2396 = vmatprep.mubr.bf16.mxu1 %v5256_v3  ;;  %v1719_v41 = vld [vmem:[%s5561_s0 + $0x88] sm:$0xff] }
 0x21b   : > { %4601 = vmatpush3.bf16.msra.mxu1 %v4895_v61 }
 0x21c   : > { %1977 = vperm.xlu1 %4857, %v1827_v56   ;;  %1972 = vperm.xlu0 %4856, %v1826_v57   ;;  %v1710_v56 = vld [vmem:[%s5561_s0 + $0x40] sm:$0xff] }
 0x21d   : > { %4602 = vmatprep.subr.bf16.mxu1 %v4897_v0  ;;  %v1742_v57 = vld [vmem:[%s5547_s28 + $0x40] sm:$0xff] }
 0x21e   : > { %2277 = vmatmul.mubr.bf16.gmra.mrb[12].mxu0 %v5901_v62  ;;  %2397 = vmatmul.mubr.bf16.gmra.mrb[12].mxu1 %v5904_v63 }
 0x21f   : > { %2286 = vmatprep.mubr.bf16.mxu0 %v5256_v3  ;;  %4603 = vmatpush3.bf16.msra.mxu1 %v4897_v0 }
 0x220   : > { %1987 = vperm.xlu1 %4857, %v1829_v59   ;;  %1982 = vperm.xlu0 %4856, %v1828_v60  }
 0x221   : > { %4604 = vmatprep.subr.bf16.mxu1 %v4899_v1 }
 0x223   : > { %4605 = vmatpush3.bf16.msra.mxu1 %v4899_v1  ;;  %v1775_v1 = vadd.f32 %v1743_v53, %v1711_v52 }
 0x226   : > { %2287 = vmatmul.mubr.bf16.gmra.mrb[16].mxu0 %v5917_v2 }
 0x227   : > { %2296 = vmatprep.mubr.bf16.mxu0 %v5256_v3 }
 0x22e   : > { %2297 = vmatmul.mubr.bf16.gmra.mrb[20].mxu0 %v5922_v4 }
 0x22f   : > { %2306 = vmatprep.mubr.bf16.mxu0 %v5256_v3 }
 0x236   : > { %2307 = vmatmul.mubr.bf16.gmra.mrb[24].mxu0 %v5927_v5 }
 0x237   : > { %2316 = vmatprep.mubr.bf16.mxu0 %v5256_v3 }
 0x23e   : > { %2317 = vmatmul.mubr.bf16.gmra.mrb[28].mxu0 %v1652_v6  ;;  %v1774_v6 = vadd.f32 %v1742_v57, %v1710_v56  ;;  %v1721_v56 = vld [vmem:[%s5561_s0 + $0x98] sm:$0xff] }
 0x23f   : > { %2326 = vmatprep.mubr.bf16.mxu0 %v5256_v3  ;;  %v1753_v57 = vld [vmem:[%s5547_s28 + $0x98] sm:$0xff] }
 0x246   : > { %2327 = vmatmul.mubr.bf16.gmra.mrb[32].mxu0 %v1654_v7  ;;  %v1713_v7 = vld [vmem:[%s5561_s0 + $0x58] sm:$0xff] }
 0x247   : > { %2336 = vmatprep.mubr.bf16.mxu0 %v5256_v3 }
 0x24e   : > { %2337 = vmatmul.mubr.bf16.gmra.mrb[36].mxu0 %v1656_v8  ;;  %v1745_v8 = vld [vmem:[%s5547_s28 + $0x58] sm:$0xff] }
 0x24f   : > { %2346 = vmatprep.mubr.bf16.mxu0 %v5256_v3  ;;  %v1777_v16 = vadd.f32 %v1745_v8, %v1713_v7  ;;  %v1785_v7 = vadd.f32 %v1753_v57, %v1721_v56 }
 0x256   : > { %2347 = vmatmul.mubr.bf16.gmra.mrb[40].mxu0 %v1658_v9  ;;  %v1712_v9 = vld [vmem:[%s5561_s0 + $0x50] sm:$0xff] }
 0x257   : > { %2356 = vmatprep.mubr.bf16.mxu0 %v5256_v3  ;;  %v1739_v3 = vld [vmem:[%s5547_s28 + $0x28] sm:$0xff]  ;;  %v1776_v17 = vadd.f32 %v1744_v10, %v1712_v9 }
 0x258   : > { %v1771_v30 = vadd.f32 %v1739_v3, %v1707_v21  ;;  %v1746_v21 = vld [vmem:[%s5547_s28 + $0x60] sm:$0xff]  ;;  %v1723_v9 = vld [vmem:[%s5561_s0 + $0xa8] sm:$0xff] }
 0x259   : > { %v1755_v10 = vld [vmem:[%s5547_s28 + $0xa8] sm:$0xff] }
 0x25e   : > { %2357 = vmatmul.mubr.bf16.gmra.mrb[44].mxu0 %v1660_v12 }
 0x263   : > { %v1843_v19 = vpop.permute.xlu1 %1842  ;;  %v1833_v20 = vpop.permute.xlu0 %1832 }
 0x264   : > { %v1992_v32 = vmul.f32 %v1843_v19, %v1768_v22  ;;  %v1990_v33 = vmul.f32 %v1833_v20, %v1766_v23  ;;  %v1747_v19 = vld [vmem:[%s5547_s28 + $0x68] sm:$0xff]  ;;  %v1714_v20 = vld [vmem:[%s5561_s0 + $0x60] sm:$0xff] }
 0x265   : > { %v1779_v26 = vadd.f32 %v1747_v19, %v1715_v18  ;;  %v1778_v27 = vadd.f32 %v1746_v21, %v1714_v20  ;;  %v1787_v18 = vadd.f32 %v1755_v10, %v1723_v9  ;;  %v1725_v20 = vld [vmem:[%s5561_s0 + $0xb8] sm:$0xff] }
 0x266   : > { %v1757_v21 = vld [vmem:[%s5547_s28 + $0xb8] sm:$0xff] }
 0x267   : > { %v1848_v28 = vpop.permute.xlu1 %1847  ;;  %v1838_v29 = vpop.permute.xlu0 %1837 }
 0x268   : > { %v1993_v34 = vmul.f32 %v1848_v28, %v1769_v24  ;;  %v1991_v35 = vmul.f32 %v1838_v29, %v1767_v25  ;;  %v1717_v28 = vld [vmem:[%s5561_s0 + $0x78] sm:$0xff] }
 0x269   : > { %v1749_v29 = vld [vmem:[%s5547_s28 + $0x78] sm:$0xff] }
 0x26a   : > { %v2408_v42 = vpack.c.bf16 %v1993_v34, %v1992_v32  ;;  %v2407_v43 = vpack.c.bf16 %v1991_v35, %v1990_v33  ;;  %v1781_v37 = vadd.f32 %v1749_v29, %v1717_v28  ;;  %v1789_v28 = vadd.f32 %v1757_v21, %v1725_v20 }
 0x26b   : > { %v1858_v44 = vpop.permute.xlu1 %1857  ;;  %v1853_v45 = vpop.permute.xlu0 %1852 }
 0x26c   : > { %v1995_v48 = vmul.f32 %v1858_v44, %v1771_v30  ;;  %v1994_v49 = vmul.f32 %v1853_v45, %v1770_v31  ;;  %4606 = vmatprep.mubr.bf16.mxu1 %v2407_v43  ;;  %v1716_v30 = vld [vmem:[%s5561_s0 + $0x70] sm:$0xff]  ;;  %v1718_v43 = vld [vmem:[%s5561_s0 + $0x80] sm:$0xff] }
 0x26d   : > { %4607 = vmatmul.mubr.bf16.vlgmr.msra.gmra.mrb[16].mxu1 %v2408_v42  ;;  %v1748_v31 = vld [vmem:[%s5547_s28 + $0x70] sm:$0xff]  ;;  %v1751_v42 = vld [vmem:[%s5547_s28 + $0x88] sm:$0xff]  ;;  %v1750_v44 = vld [vmem:[%s5547_s28 + $0x80] sm:$0xff] }
 0x26e   : > { %v2409_v58 = vpack.c.bf16 %v1995_v48, %v1994_v49  ;;  %v1780_v40 = vadd.f32 %v1748_v31, %v1716_v30  ;;  %v1783_v52 = vadd.f32 %v1751_v42, %v1719_v41  ;;  %v1782_v53 = vadd.f32 %v1750_v44, %v1718_v43  ;;  %v1727_v30 = vld [vmem:[%s5561_s0 + $0xc8] sm:$0xff]  ;;  %v1729_v43 = vld [vmem:[%s5561_s0 + $0xd8] sm:$0xff] }
 0x26f   : > { %v1868_v59 = vpop.permute.xlu1 %1867  ;;  %v1863_v60 = vpop.permute.xlu0 %1862  ;;  %v1759_v31 = vld [vmem:[%s5547_s28 + $0xc8] sm:$0xff]  ;;  %v1761_v44 = vld [vmem:[%s5547_s28 + $0xd8] sm:$0xff] }
 0x270   : > { %v1997_v61 = vmul.f32 %v1868_v59, %v1773_v50  ;;  %v1996_v0 = vmul.f32 %v1863_v60, %v1772_v51  ;;  %4610 = vmatprep.mubr.bf16.mxu1 %v2409_v58  ;;  %v1720_v58 = vld [vmem:[%s5561_s0 + $0x90] sm:$0xff]  ;;  %v1791_v41 = vadd.f32 %v1759_v31, %v1727_v30  ;;  %v1793_v56 = vadd.f32 %v1761_v44, %v1729_v43 }
 0x271   : > { %v1752_v59 = vld [vmem:[%s5547_s28 + $0x90] sm:$0xff] }
 0x272   : > { %v2410_v11 = vpack.c.bf16 %v1997_v61, %v1996_v0  ;;  %v1784_v8 = vadd.f32 %v1752_v59, %v1720_v58  ;;  %v1731_v58 = vld [vmem:[%s5561_s0 + $0xe8] sm:$0xff] }
 0x273   : > { %v1878_v12 = vpop.permute.xlu1 %1877  ;;  %v1873_v13 = vpop.permute.xlu0 %1872  ;;  %v1763_v59 = vld [vmem:[%s5547_s28 + $0xe8] sm:$0xff] }
 0x274   : > { %v1999_v14 = vmul.f32 %v1878_v12, %v1775_v1  ;;  %v1998_v15 = vmul.f32 %v1873_v13, %v1774_v6  ;;  %v1754_v12 = vld [vmem:[%s5547_s28 + $0xa0] sm:$0xff]  ;;  %v1795_v9 = vadd.f32 %v1763_v59, %v1731_v58 }
 0x275   : > { %4611 = vmatmul.mubr.bf16.gmra.mrb[20].mxu1 %v2410_v11  ;;  %v1722_v11 = vld [vmem:[%s5561_s0 + $0xa0] sm:$0xff] }
 0x276   : > { %v2411_v22 = vpack.c.bf16 %v1999_v14, %v1998_v15  ;;  %v1786_v19 = vadd.f32 %v1754_v12, %v1722_v11  ;;  %v1733_v11 = vld [vmem:[%s5561_s0 + $0xf8] sm:$0xff] }
 0x277   : > { %v1888_v23 = vpop.permute.xlu1 %1887  ;;  %v1883_v24 = vpop.permute.xlu0 %1882  ;;  %v1765_v12 = vld [vmem:[%s5547_s28 + $0xf8] sm:$0xff] }
 0x278   : > { %v2001_v25 = vmul.f32 %v1888_v23, %v1777_v16  ;;  %v2000_v3 = vmul.f32 %v1883_v24, %v1776_v17  ;;  %4614 = vmatprep.mubr.bf16.mxu1 %v2411_v22  ;;  %v1724_v22 = vld [vmem:[%s5561_s0 + $0xb0] sm:$0xff]  ;;  %v1797_v20 = vadd.f32 %v1765_v12, %v1733_v11 }
 0x279   : > { %v1756_v23 = vld [vmem:[%s5547_s28 + $0xb0] sm:$0xff] }
 0x27a   : > { %v2412_v32 = vpack.c.bf16 %v2001_v25, %v2000_v3  ;;  %v1788_v29 = vadd.f32 %v1756_v23, %v1724_v22 }
 0x27b   : > { %v1898_v33 = vpop.permute.xlu1 %1897  ;;  %v1893_v34 = vpop.permute.xlu0 %1892 }
 0x27c   : > { %v2003_v35 = vmul.f32 %v1898_v33, %v1779_v26  ;;  %v2002_v36 = vmul.f32 %v1893_v34, %v1778_v27  ;;  %v1758_v33 = vld [vmem:[%s5547_s28 + $0xc0] sm:$0xff] }
 0x27d   : > { %4615 = vmatmul.mubr.bf16.gmra.mrb[24].mxu1 %v2412_v32  ;;  %v1726_v32 = vld [vmem:[%s5561_s0 + $0xc0] sm:$0xff] }
 0x27e   : > { %v2413_v45 = vpack.c.bf16 %v2003_v35, %v2002_v36  ;;  %v1790_v42 = vadd.f32 %v1758_v33, %v1726_v32 }
 0x27f   : > { %v1908_v48 = vpop.permute.xlu1 %1907  ;;  %v1903_v49 = vpop.permute.xlu0 %1902 }
 0x280   : > { %v2005_v50 = vmul.f32 %v1908_v48, %v1781_v37  ;;  %v2004_v51 = vmul.f32 %v1903_v49, %v1780_v40  ;;  %4618 = vmatprep.mubr.bf16.mxu1 %v2413_v45  ;;  %v1728_v45 = vld [vmem:[%s5561_s0 + $0xd0] sm:$0xff] }
 0x281   : > { %v1760_v48 = vld [vmem:[%s5547_s28 + $0xd0] sm:$0xff] }
 0x282   : > { %v2414_v60 = vpack.c.bf16 %v2005_v50, %v2004_v51  ;;  %v1792_v57 = vadd.f32 %v1760_v48, %v1728_v45 }
 0x283   : > { %v1918_v61 = vpop.permute.xlu1 %1917  ;;  %v1913_v0 = vpop.permute.xlu0 %1912 }
 0x284   : > { %v2007_v1 = vmul.f32 %v1918_v61, %v1783_v52  ;;  %v2006_v6 = vmul.f32 %v1913_v0, %v1782_v53  ;;  %v1762_v61 = vld [vmem:[%s5547_s28 + $0xe0] sm:$0xff] }
 0x285   : > { %4619 = vmatmul.mubr.bf16.gmra.mrb[28].mxu1 %v2414_v60  ;;  %v1730_v60 = vld [vmem:[%s5561_s0 + $0xe0] sm:$0xff] }
 0x286   : > { %v2415_v13 = vpack.c.bf16 %v2007_v1, %v2006_v6  ;;  %v1794_v10 = vadd.f32 %v1762_v61, %v1730_v60 }
 0x287   : > { %v1928_v14 = vpop.permute.xlu1 %1927  ;;  %v1923_v15 = vpop.permute.xlu0 %1922 }
 0x288   : > { %v2009_v16 = vmul.f32 %v1928_v14, %v1785_v7  ;;  %v2008_v17 = vmul.f32 %v1923_v15, %v1784_v8  ;;  %4622 = vmatprep.mubr.bf16.mxu1 %v2415_v13  ;;  %v1732_v13 = vld [vmem:[%s5561_s0 + $0xf0] sm:$0xff] }
 0x289   : > { %v1764_v14 = vld [vmem:[%s5547_s28 + $0xf0] sm:$0xff] }
 0x28a   : > { %v2416_v24 = vpack.c.bf16 %v2009_v16, %v2008_v17  ;;  %v1796_v21 = vadd.f32 %v1764_v14, %v1732_v13 }
 0x28b   : > { %v1938_v25 = vpop.permute.xlu1 %1937  ;;  %v1933_v3 = vpop.permute.xlu0 %1932 }
 0x28c   : > { %v2011_v26 = vmul.f32 %v1938_v25, %v1787_v18  ;;  %v2010_v27 = vmul.f32 %v1933_v3, %v1786_v19 }
 0x28d   : > { %4623 = vmatmul.mubr.bf16.gmra.mrb[32].mxu1 %v2416_v24 }
 0x28e   : > { %v2417_v34 = vpack.c.bf16 %v2011_v26, %v2010_v27  ;;  %v6007_v27 = vld [vmem:[%s6866_s8] ss:$0 sm:$0xff] }
 0x28f   : > { %v1948_v35 = vpop.permute.xlu1 %1947  ;;  %v1943_v36 = vpop.permute.xlu0 %1942 }
 0x290   : > { %v2013_v37 = vmul.f32 %v1948_v35, %v1789_v28  ;;  %v2012_v40 = vmul.f32 %v1943_v36, %v1788_v29  ;;  %4626 = vmatprep.mubr.bf16.mxu1 %v2417_v34 }
 0x292   : > { %v2418_v49 = vpack.c.bf16 %v2013_v37, %v2012_v40 }
 0x293   : > { %v1958_v50 = vpop.permute.xlu1 %1957  ;;  %v1953_v51 = vpop.permute.xlu0 %1952 }
 0x294   : > { %v2015_v52 = vmul.f32 %v1958_v50, %v1791_v41  ;;  %v2014_v53 = vmul.f32 %v1953_v51, %v1790_v42 }
 0x295   : > { %4627 = vmatmul.mubr.bf16.gmra.mrb[36].mxu1 %v2418_v49 }
 0x296   : > { %v2419_v0 = vpack.c.bf16 %v2015_v52, %v2014_v53 }
 0x297   : > { %v1968_v1 = vpop.permute.xlu1 %1967  ;;  %v1963_v6 = vpop.permute.xlu0 %1962 }
 0x298   : > { %v2017_v7 = vmul.f32 %v1968_v1, %v1793_v56  ;;  %v2016_v8 = vmul.f32 %v1963_v6, %v1792_v57  ;;  %4630 = vmatprep.mubr.bf16.mxu1 %v2419_v0 }
 0x29a   : > { %v2420_v15 = vpack.c.bf16 %v2017_v7, %v2016_v8 }
 0x29b   : > { %v1978_v16 = vpop.permute.xlu1 %1977  ;;  %v1973_v17 = vpop.permute.xlu0 %1972 }
 0x29c   : > { %v2019_v18 = vmul.f32 %v1978_v16, %v1795_v9  ;;  %v2018_v19 = vmul.f32 %v1973_v17, %v1794_v10 }
 0x29d   : > { %4631 = vmatmul.mubr.bf16.gmra.mrb[40].mxu1 %v2420_v15 }
 0x29e   : > { %v2421_v22 = vpack.c.bf16 %v2019_v18, %v2018_v19 }
 0x29f   : > { %v1988_v23 = vpop.permute.xlu1 %1987  ;;  %v1983_v24 = vpop.permute.xlu0 %1982 }
 0x2a0   : > { %v2021_v25 = vmul.f32 %v1988_v23, %v1797_v20  ;;  %v2020_v3 = vmul.f32 %v1983_v24, %v1796_v21  ;;  %4634 = vmatprep.mubr.bf16.mxu1 %v2421_v22 }
 0x2a2   : > { %v2422_v26 = vpack.c.bf16 %v2021_v25, %v2020_v3 }
 0x2a5   : > { %4635 = vmatmul.mubr.bf16.gmra.mrb[44].mxu1 %v2422_v26 }
 0x2d9   : > { %v6009_v28 = vpop.f32.mrb[0].mxu0  ;;  %v6011_v29 = vpop.f32.mrb[0].mxu1 }
 0x2da   : > { %v2250_v30 = vpop.f32.mrb[1].mxu0  ;;  %v2370_v31 = vpop.f32.mrb[1].mxu1 }
 0x2db   : > { %v2943_v32 = vadd.f32 %v6007_v27, %v2250_v30  ;;  %v6014_v33 = vpop.f32.mrb[2].mxu0  ;;  %v2967_v34 = vadd.f32 %v6007_v27, %v2370_v31  ;;  %v6017_v35 = vpop.f32.mrb[2].mxu1 }
 0x2dc   : > { %v2254_v36 = vpop.f32.mrb[3].mxu0  ;;  %v2374_v37 = vpop.f32.mrb[3].mxu1 }
 0x2dd   : > { %v4143_v40 = vmul.f32 -1.442695, %v2943_v32  ;;  %v2944_v41 = vadd.f32 %v6007_v27, %v2254_v36  ;;  %v4167_v42 = vmul.f32 -1.442695, %v2967_v34  ;;  %v2968_v43 = vadd.f32 %v6007_v27, %v2374_v37 }
 0x2df   : > { %4922 = vpow2.f32 %v4143_v40  ;;  %v4144_v44 = vmul.f32 -1.442695, %v2944_v41  ;;  %v4168_v45 = vmul.f32 -1.442695, %v2968_v43 }
 0x2e0   : > { %4924 = vpow2.f32 %v4167_v42 }
 0x2e1   : > { %4926 = vpow2.f32 %v4144_v44  ;;  %v6021_v48 = vpop.f32.mrb[4].mxu0  ;;  %v6023_v49 = vpop.f32.mrb[4].mxu1 }
 0x2e2   : > { %v2260_v50 = vpop.f32.mrb[5].mxu0  ;;  %4928 = vpow2.f32 %v4168_v45  ;;  %v2380_v51 = vpop.f32.mrb[5].mxu1 }
 0x2e3   : > { %v2945_v52 = vadd.f32 %v6007_v27, %v2260_v50  ;;  %v6026_v53 = vpop.f32.mrb[6].mxu0  ;;  %v2969_v56 = vadd.f32 %v6007_v27, %v2380_v51  ;;  %v6029_v57 = vpop.f32.mrb[6].mxu1 }
 0x2e4   : > { %v2264_v58 = vpop.f32.mrb[7].mxu0  ;;  %v2384_v59 = vpop.f32.mrb[7].mxu1 }
 0x2e5   : > { %v4145_v60 = vmul.f32 -1.442695, %v2945_v52  ;;  %v2946_v61 = vadd.f32 %v6007_v27, %v2264_v58  ;;  %v4169_v0 = vmul.f32 -1.442695, %v2969_v56  ;;  %v2970_v1 = vadd.f32 %v6007_v27, %v2384_v59 }
 0x2e7   : > { %4930 = vpow2.f32 %v4145_v60  ;;  %v4146_v6 = vmul.f32 -1.442695, %v2946_v61  ;;  %v4170_v7 = vmul.f32 -1.442695, %v2970_v1  ;;  %v1670_v60 = vunpack.c.l.bf16 %v5842_v38 }
 0x2e8   : > { %4932 = vpow2.f32 %v4169_v0 }
 0x2e9   : > { %v4923_v8 = vpop.eup %4922  ;;  %4934 = vpow2.f32 %v4146_v6  ;;  %v6033_v9 = vpop.f32.mrb[8].mxu0 }
 0x2ea   : > { %v6035_v10 = vpop.f32.mrb[8].mxu1  ;;  %v4925_v11 = vpop.eup %4924  ;;  %v3071_v12 = vadd.f32 1.0, %v4923_v8  ;;  %4936 = vpow2.f32 %v4170_v7 }
 0x2eb   : > { %v2270_v13 = vpop.f32.mrb[9].mxu0  ;;  %v2390_v14 = vpop.f32.mrb[9].mxu1  ;;  %v3095_v16 = vadd.f32 1.0, %v4925_v11 }
 0x2ec   : > { %v4927_v15 = vpop.eup %4926  ;;  %v2947_v17 = vadd.f32 %v6007_v27, %v2270_v13  ;;  %v6038_v18 = vpop.f32.mrb[10].mxu0  ;;  %v2971_v19 = vadd.f32 %v6007_v27, %v2390_v14  ;;  %4938 = vrcp.f32 %v3071_v12  ;;  %v1694_v12 = vunpack.c.l.bf16 %v5845_v39 }
 0x2ed   : > { %v6041_v20 = vpop.f32.mrb[10].mxu1  ;;  %v4929_v21 = vpop.eup %4928  ;;  %v3072_v22 = vadd.f32 1.0, %v4927_v15  ;;  %4940 = vrcp.f32 %v3095_v16  ;;  %v1671_v16 = vunpack.c.h.bf16 %v5842_v38 }
 0x2ee   : > { %v2274_v23 = vpop.f32.mrb[11].mxu0  ;;  %v2394_v24 = vpop.f32.mrb[11].mxu1  ;;  %v3096_v25 = vadd.f32 1.0, %v4929_v21  ;;  %v4147_v3 = vmul.f32 -1.442695, %v2947_v17 }
 0x2ef   : > { %v2948_v26 = vadd.f32 %v6007_v27, %v2274_v23  ;;  %4942 = vrcp.f32 %v3072_v22  ;;  %v4171_v30 = vmul.f32 -1.442695, %v2971_v19  ;;  %v2972_v31 = vadd.f32 %v6007_v27, %v2394_v24 }
 0x2f0   : > { %4944 = vrcp.f32 %v3096_v25  ;;  %v1695_v22 = vunpack.c.h.bf16 %v5845_v39 }
 0x2f1   : > { %v4148_v32 = vmul.f32 -1.442695, %v2948_v26  ;;  %4946 = vpow2.f32 %v4147_v3  ;;  %v4172_v34 = vmul.f32 -1.442695, %v2972_v31  ;;  %v4931_v36 = vpop.eup %4930  ;;  %v6045_v37 = vpop.f32.mrb[12].mxu0 }
 0x2f2   : > { %v6047_v40 = vpop.f32.mrb[12].mxu1  ;;  %v4933_v41 = vpop.eup %4932  ;;  %v3073_v42 = vadd.f32 1.0, %v4931_v36 }
 0x2f3   : > { %4948 = vpow2.f32 %v4148_v32  ;;  %v2280_v43 = vpop.f32.mrb[13].mxu0  ;;  %v2400_v44 = vpop.f32.mrb[13].mxu1  ;;  %v3097_v50 = vadd.f32 1.0, %v4933_v41 }
 0x2f4   : > { %4950 = vpow2.f32 %v4171_v30  ;;  %v4935_v45 = vpop.eup %4934  ;;  %v2949_v51 = vadd.f32 %v6007_v27, %v2280_v43  ;;  %v6050_v52 = vpop.f32.mrb[14].mxu0  ;;  %v2973_v56 = vadd.f32 %v6007_v27, %v2400_v44 }
 0x2f5   : > { %4952 = vpow2.f32 %v4172_v34  ;;  %v6053_v58 = vpop.f32.mrb[14].mxu1  ;;  %v4937_v59 = vpop.eup %4936  ;;  %v3074_v61 = vadd.f32 1.0, %v4935_v45  ;;  %v1672_v45 = vunpack.c.l.bf16 %v5861_v46 }
 0x2f6   : > { %4954 = vrcp.f32 %v3073_v42  ;;  %v2284_v0 = vpop.f32.mrb[15].mxu0  ;;  %v2404_v1 = vpop.f32.mrb[15].mxu1  ;;  %v3098_v6 = vadd.f32 1.0, %v4937_v59  ;;  %v4149_v7 = vmul.f32 -1.442695, %v2949_v51 }
 0x2f7   : > { %4956 = vrcp.f32 %v3097_v50  ;;  %v2950_v8 = vadd.f32 %v6007_v27, %v2284_v0  ;;  %v6057_v11 = vpop.eup %4938  ;;  %v4173_v13 = vmul.f32 -1.442695, %v2973_v56  ;;  %v2974_v14 = vadd.f32 %v6007_v27, %v2404_v1 }
 0x2f8   : > { %4958 = vrcp.f32 %v3074_v61  ;;  %v6061_v15 = vpop.eup %4940  ;;  %v3199_v19 = vsub.f32 1.0, %v6057_v11 }
 0x2f9   : > { %6907 = vst [vmem:[#allocation9_spill] sm:$0xff] %v6061_v15  ;;  %4960 = vrcp.f32 %v3098_v6  ;;  %v4150_v17 = vmul.f32 -1.442695, %v2950_v8  ;;  %v6065_v21 = vpop.eup %4942  ;;  %v4174_v23 = vmul.f32 -1.442695, %v2974_v14  ;;  %v3223_v24 = vsub.f32 1.0, %v6061_v15 }
 0x2fa   : > { %4962 = vpow2.f32 %v4149_v7  ;;  %v6069_v25 = vpop.eup %4944  ;;  %v6071_v3 = vpop.f32.mrb[16].mxu0  ;;  %v6073_v26 = vmul.f32 %v3199_v19, %v1670_v60  ;;  %v3200_v38 = vsub.f32 1.0, %v6065_v21  ;;  %v1696_v6 = vunpack.c.l.bf16 %v5864_v47 }
 0x2fb   : > { %6908 = vst [vmem:[#allocation10_spill] sm:$0xff] %v6069_v25  ;;  %4964 = vpow2.f32 %v4150_v17  ;;  %v4947_v30 = vpop.eup %4946  ;;  %v2290_v31 = vpop.f32.mrb[17].mxu0  ;;  %v6076_v32 = vmul.f32 %v3223_v24, %v1694_v12  ;;  %v3224_v39 = vsub.f32 1.0, %v6069_v25  ;;  %v1673_v12 = vunpack.c.h.bf16 %v5861_v46 }
 0x2fc   : > { %4966 = vpow2.f32 %v4173_v13  ;;  %v3075_v36 = vadd.f32 1.0, %v4947_v30  ;;  %v2951_v41 = vadd.f32 %v6007_v27, %v2290_v31  ;;  %v6080_v42 = vpop.f32.mrb[18].mxu0  ;;  %v6082_v43 = vmul.f32 %v3200_v38, %v1671_v16 }
 0x2fd   : > { %6909 = vst [vmem:[#allocation11_spill] sm:$0xff] %v6076_v32  ;;  %v4949_v34 = vpop.eup %4948  ;;  %4968 = vpow2.f32 %v4174_v23  ;;  %v2294_v51 = vpop.f32.mrb[19].mxu0  ;;  %v6085_v56 = vmul.f32 %v3224_v39, %v1695_v22  ;;  %v1697_v17 = vunpack.c.h.bf16 %v5864_v47 }
 0x2fe   : > { %v4951_v44 = vpop.eup %4950  ;;  %v3076_v50 = vadd.f32 1.0, %v4949_v34  ;;  %4970 = vrcp.f32 %v3075_v36  ;;  %v4151_v61 = vmul.f32 -1.442695, %v2951_v41  ;;  %v2952_v0 = vadd.f32 %v6007_v27, %v2294_v51 }
 0x2ff   : > { %6910 = vst [vmem:[#allocation12_spill] sm:$0xff] %v6085_v56  ;;  %v4953_v59 = vpop.eup %4952  ;;  %v3099_v60 = vadd.f32 1.0, %v4951_v44 }
 0x300   : > { %v6088_v1 = vpop.eup %4954  ;;  %4972 = vrcp.f32 %v3076_v50  ;;  %v3100_v7 = vadd.f32 1.0, %v4953_v59  ;;  %v4152_v13 = vmul.f32 -1.442695, %v2952_v0 }
 0x301   : > { %v6091_v8 = vpop.eup %4956  ;;  %4974 = vrcp.f32 %v3099_v60  ;;  %v3201_v14 = vsub.f32 1.0, %v6088_v1  ;;  %v6101_v23 = vpop.f32.mrb[20].mxu0 }
 0x302   : > { %6911 = vst [vmem:[#allocation13_spill] sm:$0xff] %v6091_v8  ;;  %v6095_v16 = vpop.eup %4958  ;;  %4976 = vrcp.f32 %v3100_v7  ;;  %v3225_v19 = vsub.f32 1.0, %v6091_v8  ;;  %v2300_v30 = vpop.f32.mrb[21].mxu0  ;;  %v1674_v7 = vunpack.c.l.bf16 %v5881_v54 }
 0x303   : > { %v6099_v22 = vpop.eup %4960  ;;  %4978 = vpow2.f32 %v4151_v61  ;;  %v6103_v24 = vmul.f32 %v3201_v14, %v1672_v45  ;;  %v3202_v46 = vsub.f32 1.0, %v6095_v16  ;;  %v2953_v36 = vadd.f32 %v6007_v27, %v2300_v30  ;;  %v6110_v41 = vpop.f32.mrb[22].mxu0 }
 0x304   : > { %6912 = vst [vmem:[#allocation14_spill] sm:$0xff] %v6099_v22  ;;  %v4963_v38 = vpop.eup %4962  ;;  %4980 = vpow2.f32 %v4152_v13  ;;  %v6106_v31 = vmul.f32 %v3225_v19, %v1696_v6  ;;  %v3226_v39 = vsub.f32 1.0, %v6099_v22  ;;  %v2304_v51 = vpop.f32.mrb[23].mxu0 }
 0x305   : > { %v4965_v47 = vpop.eup %4964  ;;  %v3077_v34 = vadd.f32 1.0, %v4963_v38  ;;  %v6112_v44 = vmul.f32 %v3202_v46, %v1673_v12  ;;  %v4153_v0 = vmul.f32 -1.442695, %v2953_v36  ;;  %v2954_v6 = vadd.f32 %v6007_v27, %v2304_v51 }
 0x306   : > { %6913 = vst [vmem:[#allocation15_spill] sm:$0xff] %v6106_v31  ;;  %v4967_v50 = vpop.eup %4966  ;;  %v3078_v45 = vadd.f32 1.0, %v4965_v47  ;;  %v6114_v59 = vmul.f32 %v3226_v39, %v1697_v17  ;;  %v1675_v12 = vunpack.c.h.bf16 %v5881_v54  ;;  %v1698_v17 = vunpack.c.l.bf16 %v5884_v55 }
 0x307   : > { %v4969_v60 = vpop.eup %4968  ;;  %4982 = vrcp.f32 %v3077_v34  ;;  %v3101_v61 = vadd.f32 1.0, %v4967_v50  ;;  %v4154_v19 = vmul.f32 -1.442695, %v2954_v6  ;;  %v1699_v39 = vunpack.c.h.bf16 %v5884_v55 }
 0x308   : > { %6914 = vst [vmem:[#allocation16_spill] sm:$0xff] %v6114_v59  ;;  %4984 = vrcp.f32 %v3078_v45  ;;  %v3102_v13 = vadd.f32 1.0, %v4969_v60  ;;  %v6118_v14 = vpop.eup %4970 }
 0x309   : > { %4986 = vrcp.f32 %v3101_v61  ;;  %v3203_v38 = vsub.f32 1.0, %v6118_v14  ;;  %v6128_v47 = vpop.f32.mrb[24].mxu0 }
 0x30a   : > { %v6121_v46 = vpop.eup %4972  ;;  %4988 = vrcp.f32 %v3102_v13  ;;  %v2310_v54 = vpop.f32.mrb[25].mxu0 }
 0x30b   : > { %6915 = vst [vmem:[#allocation17_spill] sm:$0xff] %v6121_v46  ;;  %v6125_v30 = vpop.eup %4974  ;;  %4990 = vpow2.f32 %v4153_v0  ;;  %v3204_v34 = vsub.f32 1.0, %v6121_v46  ;;  %v6133_v50 = vmul.f32 %v3203_v38, %v1674_v7  ;;  %v2955_v60 = vadd.f32 %v6007_v27, %v2310_v54  ;;  %v6137_v61 = vpop.f32.mrb[26].mxu0 }
 0x30c   : > { %6916 = vst [vmem:[#allocation18_spill] sm:$0xff] %v6125_v30  ;;  %v6131_v36 = vpop.eup %4976  ;;  %4992 = vpow2.f32 %v4154_v19  ;;  %v3227_v45 = vsub.f32 1.0, %v6125_v30  ;;  %v2314_v56 = vpop.f32.mrb[27].mxu0  ;;  %v1676_v30 = vunpack.c.l.bf16 %v5901_v62 }
 0x30d   : > { %6917 = vst [vmem:[#allocation19_spill] sm:$0xff] %v6131_v36  ;;  %6918 = vst [vmem:[#allocation20_spill] sm:$0xff] %v6133_v50  ;;  %v4979_v51 = vpop.eup %4978  ;;  %v6139_v6 = vmul.f32 %v3204_v34, %v1675_v12  ;;  %v3228_v55 = vsub.f32 1.0, %v6131_v36  ;;  %v4155_v59 = vmul.f32 -1.442695, %v2955_v60  ;;  %v2956_v7 = vadd.f32 %v6007_v27, %v2314_v56 }
 0x30e   : > { %v4981_v0 = vpop.eup %4980  ;;  %v3079_v13 = vadd.f32 1.0, %v4979_v51  ;;  %v6142_v25 = vmul.f32 %v3227_v45, %v1698_v17  ;;  %v1677_v12 = vunpack.c.h.bf16 %v5901_v62  ;;  %v1700_v17 = vunpack.c.l.bf16 %v5904_v63 }
 0x30f   : > { %6919 = vst [vmem:[#allocation21_spill] sm:$0xff] %v6139_v6  ;;  %v3080_v19 = vadd.f32 1.0, %v4981_v0  ;;  %v6145_v38 = vmul.f32 %v3228_v55, %v1699_v39  ;;  %v4156_v34 = vmul.f32 -1.442695, %v2956_v7  ;;  %v1701_v56 = vunpack.c.h.bf16 %v5904_v63 }
 0x310   : > { %6920 = vst [vmem:[#allocation22_spill] sm:$0xff] %v6142_v25  ;;  %4994 = vrcp.f32 %v3079_v13 }
 0x311   : > { %6921 = vst [vmem:[#allocation23_spill] sm:$0xff] %v6145_v38  ;;  %v6148_v54 = vpop.eup %4982  ;;  %4996 = vrcp.f32 %v3080_v19  ;;  %v6158_v39 = vpop.f32.mrb[28].mxu0 }
 0x312   : > { %v6151_v36 = vpop.eup %4984  ;;  %4998 = vpow2.f32 %v4155_v59  ;;  %v3205_v45 = vsub.f32 1.0, %v6148_v54  ;;  %v2320_v62 = vpop.f32.mrb[29].mxu0 }
 0x313   : > { %6922 = vst [vmem:[#allocation24_spill] sm:$0xff] %v6151_v36  ;;  %v6155_v51 = vpop.eup %4986  ;;  %5000 = vpow2.f32 %v4156_v34  ;;  %v3206_v60 = vsub.f32 1.0, %v6151_v36  ;;  %v2957_v59 = vadd.f32 %v6007_v27, %v2320_v62  ;;  %v6167_v7 = vpop.f32.mrb[30].mxu0  ;;  %v1678_v62 = vunpack.c.l.bf16 %v5917_v2 }
 0x314   : > { %6923 = vst [vmem:[#allocation25_spill] sm:$0xff] %v6155_v51  ;;  %v6161_v55 = vpop.eup %4988  ;;  %v6163_v0 = vmul.f32 %v3205_v45, %v1676_v30  ;;  %v3229_v13 = vsub.f32 1.0, %v6155_v51  ;;  %v2324_v32 = vpop.f32.mrb[31].mxu0 }
 0x315   : > { %6924 = vst [vmem:[#allocation26_spill] sm:$0xff] %v6161_v55  ;;  %v4991_v19 = vpop.eup %4990  ;;  %v6169_v38 = vmul.f32 %v3206_v60, %v1677_v12  ;;  %v3230_v63 = vsub.f32 1.0, %v6161_v55  ;;  %v4157_v31 = vmul.f32 -1.442695, %v2957_v59  ;;  %v2958_v30 = vadd.f32 %v6007_v27, %v2324_v32 }
 0x316   : > { %v4993_v34 = vpop.eup %4992  ;;  %v3081_v25 = vadd.f32 1.0, %v4991_v19  ;;  %v6172_v22 = vmul.f32 %v3229_v13, %v1700_v17  ;;  %v1679_v60 = vunpack.c.h.bf16 %v5917_v2 }
 0x317   : > { %6925 = vst [vmem:[#allocation27_spill] sm:$0xff] %v6169_v38  ;;  %v3082_v15 = vadd.f32 1.0, %v4993_v34  ;;  %v6175_v45 = vmul.f32 %v3230_v63, %v1701_v56  ;;  %v4158_v51 = vmul.f32 -1.442695, %v2958_v30 }
 0x318   : > { %6926 = vst [vmem:[#allocation28_spill] sm:$0xff] %v6172_v22  ;;  %5002 = vrcp.f32 %v3081_v25  ;;  %v1680_v22 = vunpack.c.l.bf16 %v5922_v4 }
 0x319   : > { %6927 = vst [vmem:[#allocation29_spill] sm:$0xff] %v6175_v45  ;;  %5004 = vrcp.f32 %v3082_v15  ;;  %v6183_v17 = vpop.f32.mrb[32].mxu0 }
 0x31a   : > { %v6178_v12 = vpop.eup %4994  ;;  %5006 = vpow2.f32 %v4157_v31  ;;  %v2330_v56 = vpop.f32.mrb[33].mxu0 }
 0x31b   : > { %6928 = vst [vmem:[#allocation30_spill] sm:$0xff] %v6178_v12  ;;  %v6181_v19 = vpop.eup %4996  ;;  %5008 = vpow2.f32 %v4158_v51  ;;  %v3207_v13 = vsub.f32 1.0, %v6178_v12  ;;  %v2959_v15 = vadd.f32 %v6007_v27, %v2330_v56  ;;  %v6188_v34 = vpop.f32.mrb[34].mxu0  ;;  %v1681_v56 = vunpack.c.h.bf16 %v5922_v4 }
 0x31c   : > { %6929 = vst [vmem:[#allocation31_spill] sm:$0xff] %v6181_v19  ;;  %v4999_v32 = vpop.eup %4998  ;;  %v3208_v25 = vsub.f32 1.0, %v6181_v19  ;;  %v2334_v31 = vpop.f32.mrb[35].mxu0  ;;  %v1682_v12 = vunpack.c.l.bf16 %v5927_v5 }
 0x31d   : > { %v5001_v59 = vpop.eup %5000  ;;  %v3083_v63 = vadd.f32 1.0, %v4999_v32  ;;  %v6190_v30 = vmul.f32 %v3207_v13, %v1678_v62  ;;  %v4159_v51 = vmul.f32 -1.442695, %v2959_v15  ;;  %v2960_v55 = vadd.f32 %v6007_v27, %v2334_v31 }
 0x31e   : > { %v3084_v2 = vadd.f32 1.0, %v5001_v59  ;;  %v6192_v45 = vmul.f32 %v3208_v25, %v1679_v60 }
 0x31f   : > { %6930 = vst [vmem:[#allocation32_spill] sm:$0xff] %v6190_v30  ;;  %5010 = vrcp.f32 %v3083_v63  ;;  %v4160_v8 = vmul.f32 -1.442695, %v2960_v55 }
 0x320   : > { %6931 = vst [vmem:[#allocation33_spill] sm:$0xff] %v6192_v45  ;;  %5012 = vrcp.f32 %v3084_v2 }
 0x321   : > { %5014 = vpow2.f32 %v4159_v51  ;;  %v6201_v62 = vpop.f32.mrb[36].mxu0 }
 0x322   : > { %v6196_v32 = vpop.eup %5002  ;;  %5016 = vpow2.f32 %v4160_v8  ;;  %v2340_v25 = vpop.f32.mrb[37].mxu0 }
 0x323   : > { %6932 = vst [vmem:[#allocation34_spill] sm:$0xff] %v6196_v32  ;;  %v6199_v19 = vpop.eup %5004  ;;  %v3209_v60 = vsub.f32 1.0, %v6196_v32  ;;  %v2961_v2 = vadd.f32 %v6007_v27, %v2340_v25  ;;  %v6206_v55 = vpop.f32.mrb[38].mxu0 }
 0x324   : > { %6933 = vst [vmem:[#allocation35_spill] sm:$0xff] %v6199_v19  ;;  %v5007_v13 = vpop.eup %5006  ;;  %v3210_v59 = vsub.f32 1.0, %v6199_v19  ;;  %v2344_v51 = vpop.f32.mrb[39].mxu0 }
 0x325   : > { %v5009_v63 = vpop.eup %5008  ;;  %v3085_v15 = vadd.f32 1.0, %v5007_v13  ;;  %v6208_v31 = vmul.f32 %v3209_v60, %v1680_v22  ;;  %v4161_v8 = vmul.f32 -1.442695, %v2961_v2  ;;  %v2962_v30 = vadd.f32 %v6007_v27, %v2344_v51 }
 0x326   : > { %v3086_v4 = vadd.f32 1.0, %v5009_v63  ;;  %v6210_v45 = vmul.f32 %v3210_v59, %v1681_v56  ;;  %v1683_v13 = vunpack.c.h.bf16 %v5927_v5 }
 0x327   : > { %6934 = vst [vmem:[#allocation36_spill] sm:$0xff] %v6208_v31  ;;  %5018 = vrcp.f32 %v3085_v15  ;;  %v4162_v25 = vmul.f32 -1.442695, %v2962_v30  ;;  %v5178_v31 = vld [vmem:[%s5831_s2 + $0x38] sm:$0xff]  }
 0x328   : > { %6935 = vst [vmem:[#allocation37_spill] sm:$0xff] %v6210_v45  ;;  %5020 = vrcp.f32 %v3086_v4  ;;  %v1684_v32 = vunpack.c.l.bf16 %v5178_v31 }
 0x329   : > { %v6214_v19 = vpop.eup %5010  ;;  %5022 = vpow2.f32 %v4161_v8  ;;  %v6220_v56 = vpop.f32.mrb[40].mxu0 }
 0x32a   : > { %6936 = vst [vmem:[#allocation38_spill] sm:$0xff] %v6214_v19  ;;  %v6217_v6 = vpop.eup %5012  ;;  %v3211_v22 = vsub.f32 1.0, %v6214_v19  ;;  %5024 = vpow2.f32 %v4162_v25  ;;  %v2350_v15 = vpop.f32.mrb[41].mxu0 }
 0x32b   : > { %6937 = vst [vmem:[#allocation39_spill] sm:$0xff] %v6217_v6  ;;  %v5015_v60 = vpop.eup %5014  ;;  %v3212_v59 = vsub.f32 1.0, %v6217_v6  ;;  %v2963_v5 = vadd.f32 %v6007_v27, %v2350_v15  ;;  %v6226_v51 = vpop.f32.mrb[42].mxu0 }
 0x32c   : > { %v3087_v63 = vadd.f32 1.0, %v5015_v60  ;;  %v6223_v2 = vmul.f32 %v3211_v22, %v1682_v12  ;;  %v5017_v4 = vpop.eup %5016  ;;  %v2354_v19 = vpop.f32.mrb[43].mxu0  ;;  %v1685_v12 = vunpack.c.h.bf16 %v5178_v31 }
 0x32d   : > { %v6228_v30 = vmul.f32 %v3212_v59, %v1683_v13  ;;  %v3088_v8 = vadd.f32 1.0, %v5017_v4  ;;  %v4163_v45 = vmul.f32 -1.442695, %v2963_v5  ;;  %v2964_v25 = vadd.f32 %v6007_v27, %v2354_v19 }
 0x32e   : > { %6938 = vst [vmem:[#allocation40_spill] sm:$0xff] %v6223_v2  ;;  %5026 = vrcp.f32 %v3087_v63 }
 0x32f   : > { %6939 = vst [vmem:[#allocation41_spill] sm:$0xff] %v6228_v30  ;;  %5028 = vrcp.f32 %v3088_v8  ;;  %v4164_v22 = vmul.f32 -1.442695, %v2964_v25 }
 0x330   : > { %5030 = vpow2.f32 %v4163_v45 }
 0x331   : > { %v6232_v60 = vpop.eup %5018  ;;  %5032 = vpow2.f32 %v4164_v22  ;;  %v6237_v63 = vpop.f32.mrb[44].mxu0 }
 0x332   : > { %6940 = vst [vmem:[#allocation42_spill] sm:$0xff] %v6232_v60  ;;  %v6234_v6 = vpop.eup %5020  ;;  %v3213_v13 = vsub.f32 1.0, %v6232_v60  ;;  %v2360_v4 = vpop.f32.mrb[45].mxu0  ;;  %v5179_v60 = vld [vmem:[%s5831_s2 + $0x40] sm:$0xff]  }
 0x333   : > { %6941 = vst [vmem:[#allocation43_spill] sm:$0xff] %v6234_v6  ;;  %v5023_v59 = vpop.eup %5022  ;;  %v3214_v15 = vsub.f32 1.0, %v6234_v6  ;;  %v2965_v31 = vadd.f32 %v6007_v27, %v2360_v4  ;;  %v6243_v45 = vpop.f32.mrb[46].mxu0  ;;  %v1686_v22 = vunpack.c.l.bf16 %v5179_v60 }
 0x334   : > { %v3089_v19 = vadd.f32 1.0, %v5023_v59  ;;  %v6240_v5 = vmul.f32 %v3213_v13, %v1684_v32  ;;  %v5025_v8 = vpop.eup %5024  ;;  %v2364_v2 = vpop.f32.mrb[47].mxu0  ;;  %v1687_v32 = vunpack.c.h.bf16 %v5179_v60 }
 0x335   : > { %v6245_v25 = vmul.f32 %v3214_v15, %v1685_v12  ;;  %v3090_v30 = vadd.f32 1.0, %v5025_v8  ;;  %v4165_v46 = vmul.f32 -1.442695, %v2965_v31  ;;  %v2966_v38 = vadd.f32 %v6007_v27, %v2364_v2 }
 0x336   : > { %6942 = vst [vmem:[#allocation44_spill] sm:$0xff] %v6240_v5  ;;  %5034 = vrcp.f32 %v3089_v19 }
 0x337   : > { %6943 = vst [vmem:[#allocation45_spill] sm:$0xff] %v6245_v25  ;;  %5036 = vrcp.f32 %v3090_v30  ;;  %v4166_v13 = vmul.f32 -1.442695, %v2966_v38 }
 0x338   : > { %v6249_v6 = vpop.eup %5026  ;;  %5038 = vpow2.f32 %v4165_v46 }
 0x339   : > { %6944 = vst [vmem:[#allocation46_spill] sm:$0xff] %v6249_v6  ;;  %v3215_v59 = vsub.f32 1.0, %v6249_v6  ;;  %v6252_v4 = vpop.eup %5028  ;;  %5040 = vpow2.f32 %v4166_v13 }
 0x33a   : > { %6945 = vst [vmem:[#allocation47_spill] sm:$0xff] %v6252_v4  ;;  %v5031_v15 = vpop.eup %5030  ;;  %v3216_v27 = vsub.f32 1.0, %v6252_v4 }
 0x33b   : > { %v6255_v31 = vmul.f32 %v3215_v59, %v1686_v22  ;;  %v3091_v46 = vadd.f32 1.0, %v5031_v15  ;;  %v5033_v38 = vpop.eup %5032  ;;  %v5180_v22 = vld [vmem:[%s5831_s2 + $0x48] sm:$0xff]  }
 0x33c   : > { %v6260_v5 = vmul.f32 %v3216_v27, %v1687_v32  ;;  %v1688_v59 = vunpack.c.l.bf16 %v5180_v22  ;;  %v3092_v15 = vadd.f32 1.0, %v5033_v38 }
 0x33d   : > { %6946 = vst [vmem:[#allocation48_spill] sm:$0xff] %v6255_v31  ;;  %5042 = vrcp.f32 %v3091_v46 }
 0x33e   : > { %6947 = vst [vmem:[#allocation49_spill] sm:$0xff] %v6260_v5  ;;  %5044 = vrcp.f32 %v3092_v15 }
 0x340   : > { %v4608_v12 = vpop.f32.mrb[16].mxu1 }
 0x341   : > { %v2530_v19 = vadd.f32 %v4608_v12, %v6021_v48  ;;  %v2521_v8 = vpop.f32.mrb[17].mxu1  ;;  %v1689_v12 = vunpack.c.h.bf16 %v5180_v22 }
 0x342   : > { %v2522_v2 = vadd.f32 %v2521_v8, %v6009_v28  ;;  %v4609_v30 = vpop.f32.mrb[18].mxu1  ;;  %v6266_v8 = vpop.eup %5034 }
 0x343   : > { %v2682_v60 = vmul.f32 0.22916667, %v2530_v19  ;;  %v2533_v6 = vadd.f32 %v4609_v30, %v6026_v53  ;;  %v2524_v25 = vpop.f32.mrb[19].mxu1  ;;  %vm2650_vm0 = vcmp.ge.f32.partialorder %v2530_v19, 0.0  ;;  %6948 = vst [vmem:[#allocation50_spill] sm:$0xff] %v6266_v8  ;;  %v6276_v30 = vld [vmem:[%s5831_s2 + $0x50] sm:$0xff]  }
 0x344   : > { %v2680_v48 = vmul.f32 0.22916667, %v2522_v2  ;;  %v2525_v13 = vadd.f32 %v2524_v25, %v6014_v33  ;;  %vm2648_vm1 = vcmp.ge.f32.partialorder %v2522_v2, 0.0  ;;  %v3217_v33 = vsub.f32 1.0, %v6266_v8  ;;  %v6273_v25 = vpop.eup %5036 }
 0x345   : > { %v6264_v28 = vsel %vm2650_vm0, %v2530_v19, %v2682_v60  ;;  %v2683_v4 = vmul.f32 0.22916667, %v2533_v6  ;;  %vm2651_vm3 = vcmp.ge.f32.partialorder %v2533_v6, 0.0  ;;  %6949 = vst [vmem:[#allocation51_spill] sm:$0xff] %v6273_v25  ;;  %v1690_v19 = vunpack.c.l.bf16 %v6276_v30  ;;  %v5039_v60 = vpop.eup %5038 }
 0x346   : > { %v2681_v53 = vmul.f32 0.22916667, %v2525_v13  ;;  %v2746_v32 = vmul.f32 %v6264_v28, %v6264_v28  ;;  %vm2649_vm2 = vcmp.ge.f32.partialorder %v2525_v13, 0.0  ;;  %v6270_v27 = vsel %vm2648_vm1, %v2522_v2, %v2680_v48 }
 0x347   : > { %v6284_v48 = vmul.f32 %v3217_v33, %v1688_v59  ;;  %v3218_v15 = vsub.f32 1.0, %v6273_v25  ;;  %v2744_v50 = vmul.f32 %v6270_v27, %v6270_v27 }
 0x348   : > { %v4612_v46 = vpop.f32.mrb[20].mxu1  ;;  %2780 = vadd.xlane.f32.xlu0 %v2746_v32  ;;  %v6279_v38 = vsel %vm2649_vm2, %v2525_v13, %v2681_v53  ;;  %v6291_v13 = vsel %vm2651_vm3, %v2533_v6, %v2683_v4  ;;  %v3093_v53 = vadd.f32 1.0, %v5039_v60  ;;  %v5041_v32 = vpop.eup %5040 }
 0x349   : > { %v2546_v22 = vadd.f32 %v4612_v46, %v6045_v37  ;;  %v2537_v5 = vpop.f32.mrb[21].mxu1  ;;  %v2745_v2 = vmul.f32 %v6279_v38, %v6279_v38  ;;  %v6294_v59 = vmul.f32 %v3218_v15, %v1689_v12  ;;  %v3094_v6 = vadd.f32 1.0, %v5041_v32  ;;  %v6299_v4 = vpop.eup %5042 }
 0x34a   : > { %v2538_v31 = vadd.f32 %v2537_v5, %v6033_v9  ;;  %v4613_v8 = vpop.f32.mrb[22].mxu1  ;;  %5046 = vrcp.f32 %v3093_v53  ;;  %6950 = vst [vmem:[#allocation52_spill] sm:$0xff] %v6299_v4 }
 0x34b   : > { %v2686_v37 = vmul.f32 0.22916667, %v2546_v22  ;;  %v2549_v46 = vadd.f32 %v4613_v8, %v6050_v52  ;;  %v2540_v36 = vpop.f32.mrb[23].mxu1  ;;  %2778 = vadd.xlane.f32.xlu1 %v2745_v2  ;;  %vm2654_vm4 = vcmp.ge.f32.partialorder %v2546_v22, 0.0  ;;  %v2747_v52 = vmul.f32 %v6291_v13, %v6291_v13  ;;  %v6311_v2 = vpop.eup %5044 }
 0x34c   : > { %v2684_v33 = vmul.f32 0.22916667, %v2538_v31  ;;  %v2541_v9 = vadd.f32 %v2540_v36, %v6038_v18  ;;  %2776 = vadd.xlane.f32.xlu0 %v2744_v50  ;;  %vm2652_vm5 = vcmp.ge.f32.partialorder %v2538_v31, 0.0  ;;  %5048 = vrcp.f32 %v3094_v6  ;;  %6951 = vst [vmem:[#allocation53_spill] sm:$0xff] %v6311_v2 }
 0x34d   : > { %v2687_v5 = vmul.f32 0.22916667, %v2549_v46  ;;  %v6297_v25 = vsel %vm2654_vm4, %v2546_v22, %v2686_v37  ;;  %vm2655_vm6 = vcmp.ge.f32.partialorder %v2549_v46, 0.0  ;;  %v3219_v36 = vsub.f32 1.0, %v6299_v4 }
 0x34e   : > { %v2685_v60 = vmul.f32 0.22916667, %v2541_v9  ;;  %v2750_v12 = vmul.f32 %v6297_v25, %v6297_v25  ;;  %v6305_v8 = vsel %vm2652_vm5, %v2538_v31, %v2684_v33  ;;  %v1691_v50 = vunpack.c.h.bf16 %v6276_v30 }
 0x34f   : > { %v6307_v18 = vsel %vm2655_vm6, %v2549_v46, %v2687_v5  ;;  %vm2653_vm7 = vcmp.ge.f32.partialorder %v2541_v9, 0.0  ;;  %v6314_v32 = vmul.f32 %v3219_v36, %v1690_v19  ;;  %v2748_v46 = vmul.f32 %v6305_v8, %v6305_v8  ;;  %v5182_v36 = vld [vmem:[%s5831_s2 + $0x58] sm:$0xff]  }
 0x350   : > { %v4616_v22 = vpop.f32.mrb[24].mxu1  ;;  %2782 = vadd.xlane.f32.xlu0 %v2747_v52  ;;  %2788 = vadd.xlane.f32.xlu1 %v2750_v12  ;;  %v2751_v30 = vmul.f32 %v6307_v18, %v6307_v18  ;;  %v3220_v33 = vsub.f32 1.0, %v6311_v2 }
 0x351   : > { %v2562_v15 = vadd.f32 %v4616_v22, %v6101_v23  ;;  %v2553_v53 = vpop.f32.mrb[25].mxu1  ;;  %6952 = vst [vmem:[#allocation54_spill] sm:$0xff] %v6314_v32  ;;  %v6323_v23 = vsel %vm2653_vm7, %v2541_v9, %v2685_v60  ;;  %v1692_v22 = vunpack.c.l.bf16 %v5182_v36 }
 0x352   : > { %v2554_v31 = vadd.f32 %v2553_v53, %v6071_v3  ;;  %v4617_v37 = vpop.f32.mrb[26].mxu1  ;;  %v6326_v12 = vmul.f32 %v3220_v33, %v1691_v50 }
 0x353   : > { %v2690_v5 = vmul.f32 0.22916667, %v2562_v15  ;;  %v2565_v6 = vadd.f32 %v4617_v37, %v6110_v41  ;;  %v2556_v52 = vpop.f32.mrb[27].mxu1  ;;  %vm2658_vm8 = vcmp.ge.f32.partialorder %v2562_v15, 0.0  ;;  %v2749_v41 = vmul.f32 %v6323_v23, %v6323_v23 }
 0x354   : > { %v2688_v19 = vmul.f32 0.22916667, %v2554_v31  ;;  %v2557_v3 = vadd.f32 %v2556_v52, %v6080_v42  ;;  %2784 = vadd.xlane.f32.xlu1 %v2748_v46  ;;  %2790 = vadd.xlane.f32.xlu0 %v2751_v30  ;;  %vm2656_vm9 = vcmp.ge.f32.partialorder %v2554_v31, 0.0  ;;  %6953 = vst [vmem:[#allocation55_spill] sm:$0xff] %v6326_v12  ;;  %v6331_v2 = vpop.eup %5046  ;;  %v1693_v46 = vunpack.c.h.bf16 %v5182_v36 }
 0x355   : > { %v2691_v53 = vmul.f32 0.22916667, %v2565_v6  ;;  %v6329_v32 = vsel %vm2658_vm8, %v2562_v15, %v2690_v5  ;;  %vm2659_vm10 = vcmp.ge.f32.partialorder %v2565_v6, 0.0  ;;  %v3221_v50 = vsub.f32 1.0, %v6331_v2 }
 0x356   : > { %v2754_v9 = vmul.f32 %v6329_v32, %v6329_v32  ;;  %v2689_v42 = vmul.f32 0.22916667, %v2557_v3  ;;  %v6337_v60 = vsel %vm2656_vm9, %v2554_v31, %v2688_v19  ;;  %vm2657_vm11 = vcmp.ge.f32.partialorder %v2557_v3, 0.0  ;;  %v6342_v15 = vpop.eup %5048 }
 0x357   : > { %v6339_v37 = vsel %vm2659_vm10, %v2565_v6, %v2691_v53  ;;  %v6345_v52 = vmul.f32 %v3221_v50, %v1692_v22  ;;  %v2752_v6 = vmul.f32 %v6337_v60, %v6337_v60  ;;  %v3222_v36 = vsub.f32 1.0, %v6342_v15 }
 0x358   : > { %v4620_v30 = vpop.f32.mrb[28].mxu1  ;;  %2786 = vadd.xlane.f32.xlu0 %v2749_v41  ;;  %2796 = vadd.xlane.f32.xlu1 %v2754_v9  ;;  %v2755_v19 = vmul.f32 %v6339_v37, %v6339_v37  ;;  %v6354_v4 = vsel %vm2657_vm11, %v2557_v3, %v2689_v42 }
 0x359   : > { %v2578_v33 = vadd.f32 %v4620_v30, %v6158_v39  ;;  %v2569_v5 = vpop.f32.mrb[29].mxu1 }
 0x35a   : > { %v2570_v12 = vadd.f32 %v2569_v5, %v6128_v47  ;;  %v4621_v31 = vpop.f32.mrb[30].mxu1  ;;  %v6357_v47 = vmul.f32 %v3222_v36, %v1693_v46  ;;  %v2753_v5 = vmul.f32 %v6354_v4, %v6354_v4 }
 0x35b   : > { %v2694_v53 = vmul.f32 0.22916667, %v2578_v33  ;;  %v2581_v41 = vadd.f32 %v4621_v31, %v6167_v7  ;;  %v2572_v9 = vpop.f32.mrb[31].mxu1  ;;  %vm2662_vm12 = vcmp.ge.f32.partialorder %v2578_v33, 0.0 }
 0x35c   : > { %v2692_v39 = vmul.f32 0.22916667, %v2570_v12  ;;  %v2573_v22 = vadd.f32 %v2572_v9, %v6137_v61  ;;  %2792 = vadd.xlane.f32.xlu1 %v2752_v6  ;;  %2798 = vadd.xlane.f32.xlu0 %v2755_v19  ;;  %vm2660_vm13 = vcmp.ge.f32.partialorder %v2570_v12, 0.0 }
 0x35d   : > { %v2695_v50 = vmul.f32 0.22916667, %v2581_v41  ;;  %v6359_v30 = vsel %vm2662_vm12, %v2578_v33, %v2694_v53  ;;  %vm2663_vm14 = vcmp.ge.f32.partialorder %v2581_v41, 0.0 }
 0x35e   : > { %v2758_v7 = vmul.f32 %v6359_v30, %v6359_v30  ;;  %v2693_v3 = vmul.f32 0.22916667, %v2573_v22  ;;  %v6365_v42 = vsel %vm2660_vm13, %v2570_v12, %v2692_v39  ;;  %vm2661_vm15 = vcmp.ge.f32.partialorder %v2573_v22, 0.0 }
 0x35f   : > { %v6367_v31 = vsel %vm2663_vm14, %v2581_v41, %v2695_v50  ;;  %v2756_v36 = vmul.f32 %v6365_v42, %v6365_v42 }
 0x360   : > { %v4624_v61 = vpop.f32.mrb[32].mxu1  ;;  %2794 = vadd.xlane.f32.xlu0 %v2753_v5  ;;  %2804 = vadd.xlane.f32.xlu1 %v2758_v7  ;;  %v2759_v53 = vmul.f32 %v6367_v31, %v6367_v31  ;;  %v6376_v39 = vsel %vm2661_vm15, %v2573_v22, %v2693_v3 }
 0x361   : > { %v2594_v46 = vadd.f32 %v4624_v61, %v6201_v62  ;;  %v2585_v33 = vpop.f32.mrb[33].mxu1  ;;  %v2757_v7 = vmul.f32 %v6376_v39, %v6376_v39 }
 0x362   : > { %v2586_v6 = vadd.f32 %v2585_v33, %v6183_v17  ;;  %v4625_v19 = vpop.f32.mrb[34].mxu1 }
 0x363   : > { %v2698_v12 = vmul.f32 0.22916667, %v2594_v46  ;;  %v2597_v41 = vadd.f32 %v4625_v19, %v6206_v55  ;;  %v2588_v9 = vpop.f32.mrb[35].mxu1  ;;  %vm2666_vm0 = vcmp.ge.f32.partialorder %v2594_v46, 0.0 }
 0x364   : > { %v2696_v50 = vmul.f32 0.22916667, %v2586_v6  ;;  %v2589_v62 = vadd.f32 %v2588_v9, %v6188_v34  ;;  %2800 = vadd.xlane.f32.xlu1 %v2756_v36  ;;  %2806 = vadd.xlane.f32.xlu0 %v2759_v53  ;;  %vm2664_vm1 = vcmp.ge.f32.partialorder %v2586_v6, 0.0 }
 0x365   : > { %v2699_v17 = vmul.f32 0.22916667, %v2597_v41  ;;  %v6379_v5 = vsel %vm2666_vm0, %v2594_v46, %v2698_v12  ;;  %vm2667_vm2 = vcmp.ge.f32.partialorder %v2597_v41, 0.0 }
 0x366   : > { %v2762_v55 = vmul.f32 %v6379_v5, %v6379_v5  ;;  %v2697_v61 = vmul.f32 0.22916667, %v2589_v62  ;;  %v6385_v22 = vsel %vm2664_vm1, %v2586_v6, %v2696_v50  ;;  %vm2665_vm3 = vcmp.ge.f32.partialorder %v2589_v62, 0.0 }
 0x367   : > { %v6387_v3 = vsel %vm2667_vm2, %v2597_v41, %v2699_v17  ;;  %v2760_v53 = vmul.f32 %v6385_v22, %v6385_v22 }
 0x368   : > { %v4628_v33 = vpop.f32.mrb[36].mxu1  ;;  %2802 = vadd.xlane.f32.xlu0 %v2757_v7  ;;  %2812 = vadd.xlane.f32.xlu1 %v2762_v55  ;;  %v2763_v12 = vmul.f32 %v6387_v3, %v6387_v3  ;;  %v6396_v50 = vsel %vm2665_vm3, %v2589_v62, %v2697_v61 }
 0x369   : > { %v2610_v34 = vadd.f32 %v4628_v33, %v6237_v63  ;;  %v2601_v46 = vpop.f32.mrb[37].mxu1  ;;  %v2761_v55 = vmul.f32 %v6396_v50, %v6396_v50 }
 0x36a   : > { %v2602_v19 = vadd.f32 %v2601_v46, %v6220_v56  ;;  %v4629_v36 = vpop.f32.mrb[38].mxu1 }
 0x36b   : > { %v2702_v6 = vmul.f32 0.22916667, %v2610_v34  ;;  %v2613_v41 = vadd.f32 %v4629_v36, %v6243_v45  ;;  %v2604_v9 = vpop.f32.mrb[39].mxu1  ;;  %vm2670_vm4 = vcmp.ge.f32.partialorder %v2610_v34, 0.0 }
 0x36c   : > { %v2700_v17 = vmul.f32 0.22916667, %v2602_v19  ;;  %v2605_v63 = vadd.f32 %v2604_v9, %v6226_v51  ;;  %2808 = vadd.xlane.f32.xlu1 %v2760_v53  ;;  %2814 = vadd.xlane.f32.xlu0 %v2763_v12  ;;  %vm2668_vm5 = vcmp.ge.f32.partialorder %v2602_v19, 0.0 }
 0x36d   : > { %v2703_v56 = vmul.f32 0.22916667, %v2613_v41  ;;  %v6399_v7 = vsel %vm2670_vm4, %v2610_v34, %v2702_v6  ;;  %vm2671_vm6 = vcmp.ge.f32.partialorder %v2613_v41, 0.0 }
 0x36e   : > { %v2766_v45 = vmul.f32 %v6399_v7, %v6399_v7  ;;  %v2701_v33 = vmul.f32 0.22916667, %v2605_v63  ;;  %v6405_v62 = vsel %vm2668_vm5, %v2602_v19, %v2700_v17  ;;  %vm2669_vm7 = vcmp.ge.f32.partialorder %v2605_v63, 0.0 }
 0x36f   : > { %v6407_v61 = vsel %vm2671_vm6, %v2613_v41, %v2703_v56  ;;  %v2764_v12 = vmul.f32 %v6405_v62, %v6405_v62 }
 0x370   : > { %v4632_v46 = vpop.f32.mrb[40].mxu1  ;;  %2810 = vadd.xlane.f32.xlu0 %v2761_v55  ;;  %2820 = vadd.xlane.f32.xlu1 %v2766_v45  ;;  %v2767_v6 = vmul.f32 %v6407_v61, %v6407_v61  ;;  %v6416_v17 = vsel %vm2669_vm7, %v2605_v63, %v2701_v33 }
 0x371   : > { %v2626_v51 = vadd.f32 %v4632_v46, %v6023_v49  ;;  %v2617_v34 = vpop.f32.mrb[41].mxu1 }
 0x372   : > { %v2618_v36 = vadd.f32 %v2617_v34, %v6011_v29  ;;  %v4633_v53 = vpop.f32.mrb[42].mxu1 }
 0x373   : > { %v2706_v19 = vmul.f32 0.22916667, %v2626_v51  ;;  %v2629_v41 = vadd.f32 %v4633_v53, %v6029_v57  ;;  %v2620_v9 = vpop.f32.mrb[43].mxu1  ;;  %vm2674_vm8 = vcmp.ge.f32.partialorder %v2626_v51, 0.0  ;;  %v2765_v57 = vmul.f32 %v6416_v17, %v6416_v17 }
 0x374   : > { %v2704_v56 = vmul.f32 0.22916667, %v2618_v36  ;;  %v2621_v49 = vadd.f32 %v2620_v9, %v6017_v35  ;;  %2816 = vadd.xlane.f32.xlu1 %v2764_v12  ;;  %2822 = vadd.xlane.f32.xlu0 %v2767_v6  ;;  %vm2672_vm9 = vcmp.ge.f32.partialorder %v2618_v36, 0.0 }
 0x375   : > { %v2707_v29 = vmul.f32 0.22916667, %v2629_v41  ;;  %v6419_v55 = vsel %vm2674_vm8, %v2626_v51, %v2706_v19  ;;  %vm2675_vm10 = vcmp.ge.f32.partialorder %v2629_v41, 0.0 }
 0x376   : > { %v2770_v45 = vmul.f32 %v6419_v55, %v6419_v55  ;;  %v2705_v46 = vmul.f32 0.22916667, %v2621_v49  ;;  %v6425_v34 = vsel %vm2672_vm9, %v2618_v36, %v2704_v56  ;;  %vm2673_vm11 = vcmp.ge.f32.partialorder %v2621_v49, 0.0 }
 0x377   : > { %v6427_v63 = vsel %vm2675_vm10, %v2629_v41, %v2707_v29  ;;  %v2768_v6 = vmul.f32 %v6425_v34, %v6425_v34 }
 0x378   : > { %v4636_v33 = vpop.f32.mrb[44].mxu1  ;;  %2828 = vadd.xlane.f32.xlu1 %v2770_v45  ;;  %2818 = vadd.xlane.f32.xlu0 %v2765_v57  ;;  %v2771_v19 = vmul.f32 %v6427_v63, %v6427_v63  ;;  %v6436_v9 = vsel %vm2673_vm11, %v2621_v49, %v2705_v46 }
 0x379   : > { %v2642_v35 = vadd.f32 %v4636_v33, %v6047_v40  ;;  %v2633_v51 = vpop.f32.mrb[45].mxu1  ;;  %v2769_v40 = vmul.f32 %v6436_v9, %v6436_v9 }
 0x37a   : > { %v2634_v53 = vadd.f32 %v2633_v51, %v6035_v10  ;;  %v4637_v12 = vpop.f32.mrb[46].mxu1 }
 0x37b   : > { %v2645_v36 = vadd.f32 %v4637_v12, %v6053_v58  ;;  %v2636_v41 = vpop.f32.mrb[47].mxu1  ;;  %v2710_v56 = vmul.f32 0.22916667, %v2642_v35  ;;  %vm2678_vm13 = vcmp.ge.f32.partialorder %v2642_v35, 0.0 }
 0x37c   : > { %v2708_v29 = vmul.f32 0.22916667, %v2634_v53  ;;  %v2637_v45 = vadd.f32 %v2636_v41, %v6041_v20  ;;  %2824 = vadd.xlane.f32.xlu1 %v2768_v6  ;;  %2830 = vadd.xlane.f32.xlu0 %v2771_v19  ;;  %vm2676_vm12 = vcmp.ge.f32.partialorder %v2634_v53, 0.0 }
 0x37d   : > { %v2711_v33 = vmul.f32 0.22916667, %v2645_v36  ;;  %v6447_v46 = vsel %vm2678_vm13, %v2642_v35, %v2710_v56  ;;  %vm2679_vm15 = vcmp.ge.f32.partialorder %v2645_v36, 0.0 }
 0x37e   : > { %v2709_v10 = vmul.f32 0.22916667, %v2637_v45  ;;  %v6441_v57 = vsel %vm2676_vm12, %v2634_v53, %v2708_v29  ;;  %vm2677_vm14 = vcmp.ge.f32.partialorder %v2637_v45, 0.0  ;;  %v2774_v51 = vmul.f32 %v6447_v46, %v6447_v46 }
 0x37f   : > { %v2772_v58 = vmul.f32 %v6441_v57, %v6441_v57  ;;  %v6453_v53 = vsel %vm2679_vm15, %v2645_v36, %v2711_v33 }
 0x380   : > { %2826 = vadd.xlane.f32.xlu0 %v2769_v40  ;;  %v6445_v49 = vsel %vm2677_vm14, %v2637_v45, %v2709_v10  ;;  %6954 = vst [vmem:[#allocation56_spill] sm:$0xff] %v6453_v53  ;;  %v2775_v12 = vmul.f32 %v6453_v53, %v6453_v53 }
 0x381   : > { %2832 = vadd.xlane.f32.xlu1 %v2772_v58  ;;  %v2773_v20 = vmul.f32 %v6445_v49, %v6445_v49 }
 0x384   : > { %2834 = vadd.xlane.f32.xlu0 %v2773_v20 }
 0x385   : > { %2836 = vadd.xlane.f32.xlu1 %v2774_v51 }
 0x388   : > { %2838 = vadd.xlane.f32.xlu0 %v2775_v12 }
 0x3d5   : > { %v2781_v6 = vpop.xlane.xlu0 %2780 }
 0x3d6   : > { %v2842_v19 = vmax.f32 %v2781_v6, 1e-24 }
 0x3d8   : > { %5050 = vrsqrt.f32 %v2842_v19  ;;  %v2779_v35 = vpop.xlane.xlu1 %2778 }
 0x3d9   : > { %v2841_v41 = vmax.f32 %v2779_v35, 1e-24  ;;  %v2777_v56 = vpop.xlane.xlu0 %2776 }
 0x3da   : > { %v2840_v29 = vmax.f32 %v2777_v56, 1e-24 }
 0x3db   : > { %5052 = vrsqrt.f32 %v2841_v41 }
 0x3dc   : > { %5054 = vrsqrt.f32 %v2840_v29 }
 0x3dd   : > { %v2783_v45 = vpop.xlane.xlu0 %2782  ;;  %v2789_v10 = vpop.xlane.xlu1 %2788 }
 0x3de   : > { %v2843_v40 = vmax.f32 %v2783_v45, 1e-24  ;;  %v2846_v36 = vmax.f32 %v2789_v10, 1e-24 }
 0x3e0   : > { %5056 = vrsqrt.f32 %v2843_v40 }
 0x3e1   : > { %5058 = vrsqrt.f32 %v2846_v36  ;;  %v2785_v33 = vpop.xlane.xlu1 %2784  ;;  %v2791_v58 = vpop.xlane.xlu0 %2790 }
 0x3e2   : > { %v5051_v20 = vpop.eup %5050  ;;  %v2844_v51 = vmax.f32 %v2785_v33, 1e-24  ;;  %v2847_v12 = vmax.f32 %v2791_v58, 1e-24 }
 0x3e3   : > { %v2906_v6 = vmul.f32 %v5051_v20, %v6264_v28 }
 0x3e4   : > { %5060 = vrsqrt.f32 %v2844_v51 }
 0x3e5   : > { %v5053_v19 = vpop.eup %5052  ;;  %5062 = vrsqrt.f32 %v2847_v12  ;;  %v2787_v35 = vpop.xlane.xlu0 %2786  ;;  %v3169_v41 = vmul.f32 %v6088_v1, %v2906_v6 }
 0x3e6   : > { %v2797_v56 = vpop.xlane.xlu1 %2796  ;;  %v5055_v29 = vpop.eup %5054  ;;  %v2845_v53 = vmax.f32 %v2787_v35, 1e-24  ;;  %v2905_v10 = vmul.f32 %v5053_v19, %v6279_v38 }
 0x3e7   : > { %v2850_v45 = vmax.f32 %v2797_v56, 1e-24  ;;  %v6461_v40 = vadd.f32 %v6103_v24, %v3169_v41  ;;  %v2904_v36 = vmul.f32 %v5055_v29, %v6270_v27 }
 0x3e8   : > { %5064 = vrsqrt.f32 %v2845_v53  ;;  %v3168_v28 = vmul.f32 %v6065_v21, %v2905_v10 }
 0x3e9   : > { %5066 = vrsqrt.f32 %v2850_v45  ;;  %v2799_v58 = vpop.xlane.xlu0 %2798  ;;  %v3297_v20 = vmul.f32 %v6461_v40, %v6461_v40  ;;  %v3167_v1 = vmul.f32 %v6057_v11, %v2904_v36 }
 0x3ea   : > { %v2793_v33 = vpop.xlane.xlu1 %2792  ;;  %v5057_v51 = vpop.eup %5056  ;;  %v2851_v6 = vmax.f32 %v2799_v58, 1e-24  ;;  %v6469_v38 = vadd.f32 %v6082_v43, %v3168_v28 }
 0x3eb   : > { %v2848_v12 = vmax.f32 %v2793_v33, 1e-24  ;;  %v5059_v24 = vpop.eup %5058  ;;  %3331 = vadd.xlane.f32.xlu1 %v3297_v20  ;;  %v6472_v27 = vadd.f32 %v6073_v26, %v3167_v1  ;;  %v2907_v21 = vmul.f32 %v5057_v51, %v6291_v13  ;;  %v6955_v1 = vld [vmem:[#allocation24_spill] sm:$0xff] }
 0x3ec   : > { %v2910_v53 = vmul.f32 %v5059_v24, %v6297_v25  ;;  %v6957_v24 = vld [vmem:[#allocation27_spill] sm:$0xff] }
 0x3ed   : > { %5068 = vrsqrt.f32 %v2848_v12  ;;  %v2795_v19 = vpop.xlane.xlu0 %2794  ;;  %v3295_v11 = vmul.f32 %v6472_v27, %v6472_v27  ;;  %v3170_v56 = vmul.f32 %v6095_v16, %v2907_v21  ;;  %v6956_v12 = vld [vmem:[#allocation20_spill] sm:$0xff] }
 0x3ee   : > { %5070 = vrsqrt.f32 %v2851_v6  ;;  %v2805_v35 = vpop.xlane.xlu1 %2804  ;;  %v5061_v43 = vpop.eup %5060  ;;  %v2849_v41 = vmax.f32 %v2795_v19, 1e-24  ;;  %v3173_v45 = vmul.f32 %v6148_v54, %v2910_v53 }
 0x3ef   : > { %v2854_v29 = vmax.f32 %v2805_v35, 1e-24  ;;  %v5063_v26 = vpop.eup %5062  ;;  %3327 = vadd.xlane.f32.xlu1 %v3295_v11  ;;  %v6481_v13 = vadd.f32 %v6112_v44, %v3170_v56  ;;  %v2908_v25 = vmul.f32 %v5061_v43, %v6305_v8  ;;  %v3296_v35 = vmul.f32 %v6469_v38, %v6469_v38  ;;  %v6958_v56 = vld [vmem:[#allocation17_spill] sm:$0xff] }
 0x3f0   : > { %5072 = vrsqrt.f32 %v2849_v41  ;;  %v6485_v10 = vadd.f32 %v6163_v0, %v3173_v45  ;;  %v2911_v36 = vmul.f32 %v5063_v26, %v6307_v18  ;;  %v6959_v45 = vld [vmem:[#allocation34_spill] sm:$0xff] }
 0x3f1   : > { %5074 = vrsqrt.f32 %v2854_v29  ;;  %v2807_v28 = vpop.xlane.xlu0 %2806  ;;  %v3298_v33 = vmul.f32 %v6481_v13, %v6481_v13  ;;  %v3171_v54 = vmul.f32 %v6118_v14, %v2908_v25 }
 0x3f2   : > { %v2801_v16 = vpop.xlane.xlu1 %2800  ;;  %v5065_v58 = vpop.eup %5064  ;;  %v2855_v44 = vmax.f32 %v2807_v28, 1e-24  ;;  %v3301_v8 = vmul.f32 %v6485_v10, %v6485_v10  ;;  %v3174_v51 = vmul.f32 %v6955_v1, %v2911_v36  ;;  %v6960_v36 = vld [vmem:[#allocation21_spill] sm:$0xff]  ;;  %v6961_v28 = vld [vmem:[#allocation36_spill] sm:$0xff] }
 0x3f3   : > { %v2852_v20 = vmax.f32 %v2801_v16, 1e-24  ;;  %v5067_v0 = vpop.eup %5066  ;;  %3333 = vadd.xlane.f32.xlu0 %v3298_v33  ;;  %v6495_v18 = vadd.f32 %v6956_v12, %v3171_v54  ;;  %v2909_v6 = vmul.f32 %v5065_v58, %v6323_v23 }
 0x3f4   : > { %3339 = vadd.xlane.f32.xlu1 %v3301_v8  ;;  %v6499_v21 = vadd.f32 %v6957_v24, %v3174_v51  ;;  %v2914_v14 = vmul.f32 %v5067_v0, %v6329_v32  ;;  %v6962_v8 = vld [vmem:[#allocation30_spill] sm:$0xff] }
 0x3f5   : > { %5076 = vrsqrt.f32 %v2852_v20  ;;  %v2803_v53 = vpop.xlane.xlu0 %2802  ;;  %v3299_v11 = vmul.f32 %v6495_v18, %v6495_v18  ;;  %v3172_v43 = vmul.f32 %v6958_v56, %v2909_v6  ;;  %v6963_v6 = vld [vmem:[#allocation35_spill] sm:$0xff] }
 0x3f6   : > { %5078 = vrsqrt.f32 %v2855_v44  ;;  %v2813_v19 = vpop.xlane.xlu1 %2812  ;;  %v2853_v23 = vmax.f32 %v2803_v53, 1e-24  ;;  %v3177_v26 = vmul.f32 %v6959_v45, %v2914_v14  ;;  %v3302_v44 = vmul.f32 %v6499_v21, %v6499_v21  ;;  %v6964_v53 = vld [vmem:[#allocation32_spill] sm:$0xff]  ;;  %v6966_v45 = vld [vmem:[#allocation31_spill] sm:$0xff] }
 0x3f7   : > { %v5069_v41 = vpop.eup %5068  ;;  %v2858_v29 = vmax.f32 %v2813_v19, 1e-24  ;;  %3329 = vadd.xlane.f32.xlu0 %v3296_v35  ;;  %v6509_v32 = vadd.f32 %v6960_v36, %v3172_v43  ;;  %v6965_v35 = vld [vmem:[#allocation37_spill] sm:$0xff] }
 0x3f8   : > { %v5071_v25 = vpop.eup %5070  ;;  %v2912_v16 = vmul.f32 %v5069_v41, %v6337_v60  ;;  %5080 = vrsqrt.f32 %v2853_v23  ;;  %3335 = vadd.xlane.f32.xlu1 %v3299_v11  ;;  %v6513_v33 = vadd.f32 %v6961_v28, %v3177_v26 }
 0x3f9   : > { %v2915_v54 = vmul.f32 %v5071_v25, %v6339_v37  ;;  %5082 = vrsqrt.f32 %v2858_v29  ;;  %v2815_v20 = vpop.xlane.xlu0 %2814  ;;  %v3300_v23 = vmul.f32 %v6509_v32, %v6509_v32 }
 0x3fa   : > { %v2809_v58 = vpop.xlane.xlu1 %2808  ;;  %v3175_v1 = vmul.f32 %v6962_v8, %v2912_v16  ;;  %v5073_v51 = vpop.eup %5072  ;;  %v2859_v12 = vmax.f32 %v2815_v20, 1e-24  ;;  %v3305_v60 = vmul.f32 %v6513_v33, %v6513_v33  ;;  %v6967_v16 = vld [vmem:[#allocation42_spill] sm:$0xff] }
 0x3fb   : > { %v2856_v0 = vmax.f32 %v2809_v58, 1e-24  ;;  %v3178_v24 = vmul.f32 %v6963_v6, %v2915_v54  ;;  %v5075_v14 = vpop.eup %5074  ;;  %3341 = vadd.xlane.f32.xlu0 %v3302_v44  ;;  %v2913_v19 = vmul.f32 %v5073_v51, %v6354_v4  ;;  %v6968_v58 = vld [vmem:[#allocation33_spill] sm:$0xff]  ;;  %v6969_v44 = vld [vmem:[#allocation44_spill] sm:$0xff] }
 0x3fc   : > { %v6523_v37 = vadd.f32 %v6964_v53, %v3175_v1  ;;  %3347 = vadd.xlane.f32.xlu1 %v3305_v60  ;;  %v2918_v56 = vmul.f32 %v5075_v14, %v6359_v30  ;;  %v6970_v60 = vld [vmem:[#allocation38_spill] sm:$0xff] }
 0x3fd   : > { %5084 = vrsqrt.f32 %v2856_v0  ;;  %v6527_v11 = vadd.f32 %v6965_v35, %v3178_v24  ;;  %v2811_v43 = vpop.xlane.xlu0 %2810  ;;  %v3176_v26 = vmul.f32 %v6966_v45, %v2913_v19  ;;  %v6971_v19 = vld [vmem:[#allocation43_spill] sm:$0xff] }
 0x3fe   : > { %5086 = vrsqrt.f32 %v2859_v12  ;;  %v2821_v41 = vpop.xlane.xlu1 %2820  ;;  %v3303_v29 = vmul.f32 %v6523_v37, %v6523_v37  ;;  %v2857_v4 = vmax.f32 %v2811_v43, 1e-24  ;;  %v3181_v28 = vmul.f32 %v6967_v16, %v2918_v56  ;;  %v6972_v43 = vld [vmem:[#allocation40_spill] sm:$0xff]  ;;  %v6974_v16 = vld [vmem:[#allocation39_spill] sm:$0xff] }
 0x3ff   : > { %v5077_v25 = vpop.eup %5076  ;;  %v2862_v36 = vmax.f32 %v2821_v41, 1e-24  ;;  %3337 = vadd.xlane.f32.xlu0 %v3300_v23  ;;  %v6537_v30 = vadd.f32 %v6968_v58, %v3176_v26  ;;  %v3306_v12 = vmul.f32 %v6527_v11, %v6527_v11  ;;  %v6973_v23 = vld [vmem:[#allocation45_spill] sm:$0xff] }
 0x400   : > { %v5079_v54 = vpop.eup %5078  ;;  %v2916_v20 = vmul.f32 %v5077_v25, %v6365_v42  ;;  %5088 = vrsqrt.f32 %v2857_v4  ;;  %3343 = vadd.xlane.f32.xlu1 %v3303_v29  ;;  %v6541_v8 = vadd.f32 %v6969_v44, %v3181_v28 }
 0x401   : > { %v2919_v1 = vmul.f32 %v5079_v54, %v6367_v31  ;;  %5090 = vrsqrt.f32 %v2862_v36  ;;  %v2823_v0 = vpop.xlane.xlu0 %2822  ;;  %v3304_v4 = vmul.f32 %v6537_v30, %v6537_v30 }
 0x402   : > { %v2817_v51 = vpop.xlane.xlu1 %2816  ;;  %v3179_v6 = vmul.f32 %v6970_v60, %v2916_v20  ;;  %v5081_v24 = vpop.eup %5080  ;;  %v2863_v53 = vmax.f32 %v2823_v0, 1e-24  ;;  %v3309_v42 = vmul.f32 %v6541_v8, %v6541_v8  ;;  %v6975_v20 = vld [vmem:[#allocation50_spill] sm:$0xff] }
 0x403   : > { %v2860_v14 = vmax.f32 %v2817_v51, 1e-24  ;;  %v3182_v35 = vmul.f32 %v6971_v19, %v2919_v1  ;;  %v5083_v56 = vpop.eup %5082  ;;  %3349 = vadd.xlane.f32.xlu0 %v3306_v12  ;;  %v2917_v41 = vmul.f32 %v5081_v24, %v6376_v39  ;;  %v6976_v51 = vld [vmem:[#allocation41_spill] sm:$0xff] }
 0x404   : > { %v6551_v31 = vadd.f32 %v6972_v43, %v3179_v6  ;;  %3355 = vadd.xlane.f32.xlu1 %v3309_v42  ;;  %v2922_v45 = vmul.f32 %v5083_v56, %v6379_v5  ;;  %v6978_v43 = vld [vmem:[#allocation51_spill] sm:$0xff] }
 0x405   : > { %5092 = vrsqrt.f32 %v2860_v14  ;;  %v6555_v29 = vadd.f32 %v6973_v23, %v3182_v35  ;;  %v2819_v25 = vpop.xlane.xlu0 %2818  ;;  %v3180_v28 = vmul.f32 %v6974_v16, %v2917_v41  ;;  %v6979_v23 = vld [vmem:[#allocation48_spill] sm:$0xff] }
 0x406   : > { %5094 = vrsqrt.f32 %v2863_v53  ;;  %v2829_v26 = vpop.xlane.xlu1 %2828  ;;  %v3307_v36 = vmul.f32 %v6551_v31, %v6551_v31  ;;  %v2861_v58 = vmax.f32 %v2819_v25, 1e-24  ;;  %v3185_v44 = vmul.f32 %v6975_v20, %v2922_v45  ;;  %v6977_v53 = vld [vmem:[#allocation46_spill] sm:$0xff] }
 0x407   : > { %v5085_v54 = vpop.eup %5084  ;;  %v2866_v39 = vmax.f32 %v2829_v26, 1e-24  ;;  %3345 = vadd.xlane.f32.xlu0 %v3304_v4  ;;  %v6565_v5 = vadd.f32 %v6976_v51, %v3180_v28  ;;  %v3310_v14 = vmul.f32 %v6555_v29, %v6555_v29  ;;  %v6980_v28 = vld [vmem:[#allocation47_spill] sm:$0xff] }
 0x408   : > { %v5087_v1 = vpop.eup %5086  ;;  %v2920_v0 = vmul.f32 %v5085_v54, %v6385_v22  ;;  %3351 = vadd.xlane.f32.xlu1 %v3307_v36  ;;  %v6569_v12 = vadd.f32 %v6284_v48, %v3185_v44 }
 0x409   : > { %5096 = vrsqrt.f32 %v2866_v39  ;;  %v2923_v60 = vmul.f32 %v5087_v1, %v6387_v3  ;;  %v2831_v24 = vpop.xlane.xlu0 %2830  ;;  %v3308_v36 = vmul.f32 %v6565_v5, %v6565_v5  ;;  %v6981_v1 = vld [vmem:[#allocation49_spill] sm:$0xff] }
 0x40a   : > { %5098 = vrsqrt.f32 %v2861_v58  ;;  %v2825_v6 = vpop.xlane.xlu1 %2824  ;;  %v3183_v42 = vmul.f32 %v6977_v53, %v2920_v0  ;;  %v5089_v19 = vpop.eup %5088  ;;  %v2867_v56 = vmax.f32 %v2831_v24, 1e-24  ;;  %v3313_v22 = vmul.f32 %v6569_v12, %v6569_v12  ;;  %v6982_v24 = vld [vmem:[#allocation52_spill] sm:$0xff] }
 0x40b   : > { %v2864_v35 = vmax.f32 %v2825_v6, 1e-24  ;;  %v3186_v41 = vmul.f32 %v6978_v43, %v2923_v60  ;;  %v5091_v48 = vpop.eup %5090  ;;  %3357 = vadd.xlane.f32.xlu0 %v3310_v14  ;;  %v2921_v45 = vmul.f32 %v5089_v19, %v6396_v50 }
 0x40c   : > { %v6579_v3 = vadd.f32 %v6979_v23, %v3183_v42  ;;  %3363 = vadd.xlane.f32.xlu1 %v3313_v22  ;;  %v2926_v25 = vmul.f32 %v5091_v48, %v6399_v7  ;;  %v6983_v22 = vld [vmem:[#allocation54_spill] sm:$0xff] }
 0x40d   : > { %5100 = vrsqrt.f32 %v2864_v35  ;;  %v6583_v26 = vadd.f32 %v6294_v59, %v3186_v41  ;;  %v2827_v4 = vpop.xlane.xlu0 %2826  ;;  %v3184_v54 = vmul.f32 %v6980_v28, %v2921_v45 }
 0x40e   : > { %5102 = vrsqrt.f32 %v2867_v56  ;;  %v3311_v16 = vmul.f32 %v6579_v3, %v6579_v3  ;;  %v2865_v58 = vmax.f32 %v2827_v4, 1e-24  ;;  %v2833_v50 = vpop.xlane.xlu1 %2832  ;;  %v3189_v20 = vmul.f32 %v6331_v2, %v2926_v25  ;;  %v6984_v25 = vld [vmem:[#allocation13_spill] sm:$0xff] }
 0x40f   : > { %v5093_v39 = vpop.eup %5092  ;;  %v2868_v59 = vmax.f32 %v2833_v50, 1e-24  ;;  %3353 = vadd.xlane.f32.xlu0 %v3308_v36  ;;  %v6593_v7 = vadd.f32 %v6981_v1, %v3184_v54  ;;  %v3314_v2 = vmul.f32 %v6583_v26, %v6583_v26  ;;  %v6988_v1 = vld [vmem:[#allocation9_spill] sm:$0xff] }
 0x410   : > { %v5095_v44 = vpop.eup %5094  ;;  %v2924_v51 = vmul.f32 %v5093_v39, %v6405_v62  ;;  %5104 = vrsqrt.f32 %v2865_v58  ;;  %3359 = vadd.xlane.f32.xlu1 %v3311_v16  ;;  %v6597_v0 = vadd.f32 %v6345_v52, %v3189_v20  ;;  %v6987_v58 = vld [vmem:[#allocation55_spill] sm:$0xff] }
 0x411   : > { %v2927_v60 = vmul.f32 %v5095_v44, %v6407_v61  ;;  %5106 = vrsqrt.f32 %v2868_v59  ;;  %v2835_v6 = vpop.xlane.xlu0 %2834 }
 0x412   : > { %v3187_v14 = vmul.f32 %v6982_v24, %v2924_v51  ;;  %v2869_v42 = vmax.f32 %v2835_v6, 1e-24  ;;  %v2837_v19 = vpop.xlane.xlu1 %2836  ;;  %v3317_v62 = vmul.f32 %v6597_v0, %v6597_v0  ;;  %v6989_v6 = vld [vmem:[#allocation14_spill] sm:$0xff] }
 0x413   : > { %v5097_v53 = vpop.eup %5096  ;;  %v3190_v35 = vmul.f32 %v6342_v15, %v2927_v60  ;;  %v2870_v52 = vmax.f32 %v2837_v19, 1e-24  ;;  %3365 = vadd.xlane.f32.xlu0 %v3314_v2  ;;  %v3312_v15 = vmul.f32 %v6593_v7, %v6593_v7 }
 0x414   : > { %v5099_v56 = vpop.eup %5098  ;;  %v6607_v61 = vadd.f32 %v6983_v22, %v3187_v14  ;;  %v2930_v43 = vmul.f32 %v5097_v53, %v6419_v55  ;;  %5108 = vrsqrt.f32 %v2869_v42  ;;  %3371 = vadd.xlane.f32.xlu1 %v3317_v62  ;;  %v6985_v55 = vld [vmem:[#allocation53_spill] sm:$0xff] }
 0x415   : > { %v6611_v41 = vadd.f32 %v6357_v47, %v3190_v35  ;;  %v2925_v48 = vmul.f32 %v5099_v56, %v6416_v17  ;;  %5110 = vrsqrt.f32 %v2870_v52  ;;  %v2839_v23 = vpop.xlane.xlu0 %2838  ;;  %v6986_v47 = vld [vmem:[#allocation15_spill] sm:$0xff]  ;;  %v6992_v56 = vld [vmem:[#allocation10_spill] sm:$0xff] }
 0x416   : > { %v3315_v45 = vmul.f32 %v6607_v61, %v6607_v61  ;;  %v3193_v4 = vmul.f32 %v6984_v25, %v2930_v43  ;;  %v2871_v16 = vmax.f32 %v2839_v23, 1e-24  ;;  %v6993_v43 = vld [vmem:[#allocation18_spill] sm:$0xff] }
 0x417   : > { %v5101_v36 = vpop.eup %5100  ;;  %v3188_v28 = vmul.f32 %v6985_v55, %v2925_v48  ;;  %3361 = vadd.xlane.f32.xlu0 %v3312_v15  ;;  %v3318_v44 = vmul.f32 %v6611_v41, %v6611_v41 }
 0x418   : > { %v5103_v54 = vpop.eup %5102  ;;  %v6621_v39 = vadd.f32 %v6986_v47, %v3193_v4  ;;  %v2928_v17 = vmul.f32 %v5101_v36, %v6425_v34  ;;  %5112 = vrsqrt.f32 %v2871_v16  ;;  %3367 = vadd.xlane.f32.xlu1 %v3315_v45  ;;  %v6990_v34 = vld [vmem:[#allocation11_spill] sm:$0xff]  ;;  %v6997_v47 = vld [vmem:[#allocation25_spill] sm:$0xff] }
 0x419   : > { %v6625_v50 = vadd.f32 %v6987_v58, %v3188_v28  ;;  %v2931_v20 = vmul.f32 %v5103_v54, %v6427_v63  ;;  %v6991_v63 = vld [vmem:[#allocation16_spill] sm:$0xff]  ;;  %v6996_v16 = vld [vmem:[#allocation19_spill] sm:$0xff] }
 0x41a   : > { %v3321_v59 = vmul.f32 %v6621_v39, %v6621_v39  ;;  %v3191_v51 = vmul.f32 %v6988_v1, %v2928_v17  ;;  %v5105_v60 = vpop.eup %5104  ;;  %v6998_v58 = vld [vmem:[#allocation23_spill] sm:$0xff] }
 0x41b   : > { %v3194_v2 = vmul.f32 %v6989_v6, %v2931_v20  ;;  %v5107_v24 = vpop.eup %5106  ;;  %3373 = vadd.xlane.f32.xlu0 %v3318_v44  ;;  %v2929_v53 = vmul.f32 %v5105_v60, %v6436_v9  ;;  %v3316_v62 = vmul.f32 %v6625_v50, %v6625_v50  ;;  %v6994_v9 = vld [vmem:[#allocation12_spill] sm:$0xff] }
 0x41c   : > { %v6635_v14 = vadd.f32 %v6990_v34, %v3191_v51  ;;  %3379 = vadd.xlane.f32.xlu1 %v3321_v59  ;;  %v2932_v19 = vmul.f32 %v5107_v24, %v6441_v57  ;;  %v6995_v57 = vld [vmem:[#allocation22_spill] sm:$0xff]  ;;  %v6999_v20 = vld [vmem:[#allocation56_spill] sm:$0xff] }
 0x41d   : > { %v6639_v42 = vadd.f32 %v6991_v63, %v3194_v2  ;;  %v3192_v52 = vmul.f32 %v6992_v56, %v2929_v53  ;;  %v7000_v59 = vld [vmem:[#allocation28_spill] sm:$0xff]  ;;  %v7001_v51 = vld [vmem:[#allocation26_spill] sm:$0xff]  ;;  %v7002_v2 = vld [vmem:[#allocation29_spill] sm:$0xff] }
 0x41e   : > { %v3319_v35 = vmul.f32 %v6635_v14, %v6635_v14  ;;  %v5109_v22 = vpop.eup %5108  ;;  %v3195_v48 = vmul.f32 %v6993_v43, %v2932_v19 }
 0x41f   : > { %v5111_v23 = vpop.eup %5110  ;;  %3369 = vadd.xlane.f32.xlu0 %v3316_v62  ;;  %v6649_v15 = vadd.f32 %v6994_v9, %v3192_v52  ;;  %v2933_v45 = vmul.f32 %v5109_v22, %v6445_v49  ;;  %v3322_v36 = vmul.f32 %v6639_v42, %v6639_v42 }
 0x420   : > { %3375 = vadd.xlane.f32.xlu1 %v3319_v35  ;;  %v6653_v25 = vadd.f32 %v6995_v57, %v3195_v48  ;;  %v2934_v4 = vmul.f32 %v5111_v23, %v6447_v46 }
 0x421   : > { %v3196_v55 = vmul.f32 %v6996_v16, %v2933_v45  ;;  %v3320_v1 = vmul.f32 %v6649_v15, %v6649_v15 }
 0x422   : > { %v5113_v28 = vpop.eup %5112  ;;  %v3323_v54 = vmul.f32 %v6653_v25, %v6653_v25  ;;  %v3197_v17 = vmul.f32 %v6997_v47, %v2934_v4 }
 0x423   : > { %3381 = vadd.xlane.f32.xlu0 %v3322_v36  ;;  %v6663_v49 = vadd.f32 %v6998_v58, %v3196_v55  ;;  %v2935_v44 = vmul.f32 %v5113_v28, %v6999_v20 }
 0x424   : > { %3383 = vadd.xlane.f32.xlu1 %v3323_v54  ;;  %v6667_v46 = vadd.f32 %v7000_v59, %v3197_v17 }
 0x425   : > { %v3198_v60 = vmul.f32 %v7001_v51, %v2935_v44  ;;  %v3324_v34 = vmul.f32 %v6663_v49, %v6663_v49 }
 0x426   : > { %v3325_v6 = vmul.f32 %v6667_v46, %v6667_v46 }
 0x427   : > { %3377 = vadd.xlane.f32.xlu0 %v3320_v1  ;;  %v6675_v24 = vadd.f32 %v7002_v2, %v3198_v60 }
 0x428   : > { %3387 = vadd.xlane.f32.xlu1 %v3325_v6 }
 0x429   : > { %v3326_v53 = vmul.f32 %v6675_v24, %v6675_v24 }
 0x42b   : > { %3385 = vadd.xlane.f32.xlu0 %v3324_v34 }
 0x42f   : > { %3389 = vadd.xlane.f32.xlu0 %v3326_v53 }
 0x478   : > { %v3332_v63 = vpop.xlane.xlu1 %3331 }
 0x479   : > { %v3393_v19 = vmax.f32 %v3332_v63, 1e-24 }
 0x47b   : > { %5114 = vrsqrt.f32 %v3393_v19 }
 0x47c   : > { %v3328_v62 = vpop.xlane.xlu1 %3327 }
 0x47d   : > { %v3391_v35 = vmax.f32 %v3328_v62, 1e-24 }
 0x47f   : > { %5116 = vrsqrt.f32 %v3391_v35 }
 0x480   : > { %v3334_v56 = vpop.xlane.xlu0 %3333 }
 0x481   : > { %v3394_v52 = vmax.f32 %v3334_v56, 1e-24  ;;  %v3340_v22 = vpop.xlane.xlu1 %3339 }
 0x482   : > { %v3397_v43 = vmax.f32 %v3340_v22, 1e-24 }
 0x483   : > { %5118 = vrsqrt.f32 %v3394_v52 }
 0x484   : > { %5120 = vrsqrt.f32 %v3397_v43  ;;  %v3330_v48 = vpop.xlane.xlu0 %3329 }
 0x485   : > { %v5115_v23 = vpop.eup %5114  ;;  %v3392_v9 = vmax.f32 %v3330_v48, 1e-24  ;;  %v3336_v45 = vpop.xlane.xlu1 %3335 }
 0x486   : > { %v3457_v57 = vmul.f32 %v5115_v23, %v6461_v40  ;;  %v3395_v4 = vmax.f32 %v3336_v45, 1e-24 }
 0x487   : > { %5122 = vrsqrt.f32 %v3392_v9 }
 0x488   : > { %3489 = vst [vmem:[%s5561_s0 + $0x10] sm:$0xff] %v3457_v57  ;;  %5124 = vrsqrt.f32 %v3395_v4  ;;  %v3342_v36 = vpop.xlane.xlu0 %3341 }
 0x489   : > { %v5117_v16 = vpop.eup %5116  ;;  %v3398_v55 = vmax.f32 %v3342_v36, 1e-24  ;;  %v3348_v28 = vpop.xlane.xlu1 %3347 }
 0x48a   : > { %v3455_v54 = vmul.f32 %v5117_v16, %v6472_v27  ;;  %v3401_v47 = vmax.f32 %v3348_v28, 1e-24 }
 0x48b   : > { %5126 = vrsqrt.f32 %v3398_v55 }
 0x48c   : > { %3487 = vst [vmem:[%s5561_s0] sm:$0xff] %v3455_v54  ;;  %5128 = vrsqrt.f32 %v3401_v47  ;;  %v3338_v17 = vpop.xlane.xlu0 %3337 }
 0x48d   : > { %v5119_v58 = vpop.eup %5118  ;;  %v3396_v20 = vmax.f32 %v3338_v17, 1e-24  ;;  %v3344_v40 = vpop.xlane.xlu1 %3343 }
 0x48e   : > { %v5121_v44 = vpop.eup %5120  ;;  %v3458_v59 = vmul.f32 %v5119_v58, %v6481_v13  ;;  %v3399_v1 = vmax.f32 %v3344_v40, 1e-24 }
 0x48f   : > { %v3461_v51 = vmul.f32 %v5121_v44, %v6485_v10  ;;  %5130 = vrsqrt.f32 %v3396_v20 }
 0x490   : > { %3490 = vst [vmem:[%s5561_s0 + $0x18] sm:$0xff] %v3458_v59  ;;  %v4255_v27 = vpack.c.bf16 %v3458_v59, %v3457_v57  ;;  %5132 = vrsqrt.f32 %v3399_v1  ;;  %v3350_v60 = vpop.xlane.xlu0 %3349 }
 0x491   : > { %v5123_v6 = vpop.eup %5122  ;;  %3493 = vst [vmem:[%s5561_s0 + $0x30] sm:$0xff] %v3461_v51  ;;  %v3402_v2 = vmax.f32 %v3350_v60, 1e-24  ;;  %v3356_v34 = vpop.xlane.xlu1 %3355 }
 0x492   : > { %v5125_v53 = vpop.eup %5124  ;;  %4327 = vst [vmem:[%s5557_s18 + $0x8] sm:$0xff] %v4255_v27   ;;  %v3456_v63 = vmul.f32 %v5123_v6, %v6469_v38  ;;  %v3405_v13 = vmax.f32 %v3356_v34, 1e-24 }
 0x493   : > { %v3459_v19 = vmul.f32 %v5125_v53, %v6495_v18  ;;  %5134 = vrsqrt.f32 %v3402_v2 }
 0x494   : > { %3488 = vst [vmem:[%s5561_s0 + $0x8] sm:$0xff] %v3456_v63  ;;  %v4250_v10 = vpack.c.bf16 %v3456_v63, %v3455_v54  ;;  %5136 = vrsqrt.f32 %v3405_v13  ;;  %v3346_v62 = vpop.xlane.xlu0 %3345 }
 0x495   : > { %v5127_v35 = vpop.eup %5126  ;;  %3491 = vst [vmem:[%s5561_s0 + $0x20] sm:$0xff] %v3459_v19  ;;  %v3400_v56 = vmax.f32 %v3346_v62, 1e-24  ;;  %v3352_v52 = vpop.xlane.xlu1 %3351 }
 0x496   : > { %v5129_v22 = vpop.eup %5128  ;;  %4251 = vst [vmem:[%s5557_s18] sm:$0xff] %v4250_v10   ;;  %v3462_v43 = vmul.f32 %v5127_v35, %v6499_v21  ;;  %v3403_v38 = vmax.f32 %v3352_v52, 1e-24 }
 0x497   : > { %v3465_v48 = vmul.f32 %v5129_v22, %v6513_v33  ;;  %5138 = vrsqrt.f32 %v3400_v56 }
 0x498   : > { %3494 = vst [vmem:[%s5561_s0 + $0x38] sm:$0xff] %v3462_v43  ;;  %v4265_v18 = vpack.c.bf16 %v3462_v43, %v3461_v51  ;;  %5140 = vrsqrt.f32 %v3403_v38  ;;  %v3358_v23 = vpop.xlane.xlu0 %3357 }
 0x499   : > { %v5131_v9 = vpop.eup %5130  ;;  %3497 = vst [vmem:[%s5561_s0 + $0x50] sm:$0xff] %v3465_v48  ;;  %v3406_v45 = vmax.f32 %v3358_v23, 1e-24  ;;  %v3364_v57 = vpop.xlane.xlu1 %3363 }
 0x49a   : > { %v5133_v4 = vpop.eup %5132  ;;  %4329 = vst [vmem:[%s5557_s18 + $0x18] sm:$0xff] %v4265_v18   ;;  %v3460_v36 = vmul.f32 %v5131_v9, %v6509_v32  ;;  %v3409_v21 = vmax.f32 %v3364_v57, 1e-24 }
 0x49b   : > { %v3463_v16 = vmul.f32 %v5133_v4, %v6523_v37  ;;  %5142 = vrsqrt.f32 %v3406_v45 }
 0x49c   : > { %3492 = vst [vmem:[%s5561_s0 + $0x28] sm:$0xff] %v3460_v36  ;;  %v4260_v33 = vpack.c.bf16 %v3460_v36, %v3459_v19  ;;  %5144 = vrsqrt.f32 %v3409_v21  ;;  %v3354_v55 = vpop.xlane.xlu0 %3353 }
 0x49d   : > { %v5135_v28 = vpop.eup %5134  ;;  %3495 = vst [vmem:[%s5561_s0 + $0x40] sm:$0xff] %v3463_v16  ;;  %v3404_v54 = vmax.f32 %v3354_v55, 1e-24  ;;  %v3360_v47 = vpop.xlane.xlu1 %3359 }
 0x49e   : > { %v5137_v17 = vpop.eup %5136  ;;  %4328 = vst [vmem:[%s5557_s18 + $0x10] sm:$0xff] %v4260_v33   ;;  %v3466_v58 = vmul.f32 %v5135_v28, %v6527_v11  ;;  %v3407_v32 = vmax.f32 %v3360_v47, 1e-24 }
 0x49f   : > { %v3469_v20 = vmul.f32 %v5137_v17, %v6541_v8  ;;  %5146 = vrsqrt.f32 %v3404_v54 }
 0x4a0   : > { %3498 = vst [vmem:[%s5561_s0 + $0x58] sm:$0xff] %v3466_v58  ;;  %v4275_v37 = vpack.c.bf16 %v3466_v58, %v3465_v48  ;;  %5148 = vrsqrt.f32 %v3407_v32  ;;  %v3366_v40 = vpop.xlane.xlu0 %3365 }
 0x4a1   : > { %v5139_v44 = vpop.eup %5138  ;;  %3501 = vst [vmem:[%s5561_s0 + $0x70] sm:$0xff] %v3469_v20  ;;  %v3410_v59 = vmax.f32 %v3366_v40, 1e-24  ;;  %v3372_v1 = vpop.xlane.xlu1 %3371 }
 0x4a2   : > { %v5141_v51 = vpop.eup %5140  ;;  %4331 = vst [vmem:[%s5557_s18 + $0x28] sm:$0xff] %v4275_v37   ;;  %v3464_v27 = vmul.f32 %v5139_v44, %v6537_v30  ;;  %v3413_v11 = vmax.f32 %v3372_v1, 1e-24 }
 0x4a3   : > { %v3467_v60 = vmul.f32 %v5141_v51, %v6551_v31  ;;  %5150 = vrsqrt.f32 %v3410_v59 }
 0x4a4   : > { %3496 = vst [vmem:[%s5561_s0 + $0x48] sm:$0xff] %v3464_v27  ;;  %v4270_v8 = vpack.c.bf16 %v3464_v27, %v3463_v16  ;;  %5152 = vrsqrt.f32 %v3413_v11  ;;  %v3362_v6 = vpop.xlane.xlu0 %3361 }
 0x4a5   : > { %v5143_v2 = vpop.eup %5142  ;;  %3499 = vst [vmem:[%s5561_s0 + $0x60] sm:$0xff] %v3467_v60  ;;  %v3408_v34 = vmax.f32 %v3362_v6, 1e-24  ;;  %v3368_v53 = vpop.xlane.xlu1 %3367 }
 0x4a6   : > { %v5145_v63 = vpop.eup %5144  ;;  %4330 = vst [vmem:[%s5557_s18 + $0x20] sm:$0xff] %v4270_v8   ;;  %v3470_v13 = vmul.f32 %v5143_v2, %v6555_v29  ;;  %v3411_v30 = vmax.f32 %v3368_v53, 1e-24 }
 0x4a7   : > { %v3473_v19 = vmul.f32 %v5145_v63, %v6569_v12  ;;  %5154 = vrsqrt.f32 %v3408_v34 }
 0x4a8   : > { %3502 = vst [vmem:[%s5561_s0 + $0x78] sm:$0xff] %v3470_v13  ;;  %v4285_v31 = vpack.c.bf16 %v3470_v13, %v3469_v20  ;;  %5156 = vrsqrt.f32 %v3411_v30  ;;  %v3374_v10 = vpop.xlane.xlu0 %3373 }
 0x4a9   : > { %v5147_v62 = vpop.eup %5146  ;;  %3505 = vst [vmem:[%s5561_s0 + $0x90] sm:$0xff] %v3473_v19  ;;  %v3414_v35 = vmax.f32 %v3374_v10, 1e-24  ;;  %v3380_v56 = vpop.xlane.xlu1 %3379 }
 0x4aa   : > { %v5149_v52 = vpop.eup %5148  ;;  %4333 = vst [vmem:[%s5557_s18 + $0x38] sm:$0xff] %v4285_v31   ;;  %v3468_v22 = vmul.f32 %v5147_v62, %v6565_v5  ;;  %v3417_v29 = vmax.f32 %v3380_v56, 1e-24 }
 0x4ab   : > { %v3471_v43 = vmul.f32 %v5149_v52, %v6579_v3  ;;  %5158 = vrsqrt.f32 %v3414_v35 }
 0x4ac   : > { %3500 = vst [vmem:[%s5561_s0 + $0x68] sm:$0xff] %v3468_v22  ;;  %v4280_v12 = vpack.c.bf16 %v3468_v22, %v3467_v60  ;;  %5160 = vrsqrt.f32 %v3417_v29  ;;  %v3370_v38 = vpop.xlane.xlu0 %3369 }
 0x4ad   : > { %v5151_v48 = vpop.eup %5150  ;;  %3503 = vst [vmem:[%s5561_s0 + $0x80] sm:$0xff] %v3471_v43  ;;  %v3412_v18 = vmax.f32 %v3370_v38, 1e-24  ;;  %v3376_v23 = vpop.xlane.xlu1 %3375 }
 0x4ae   : > { %v5153_v9 = vpop.eup %5152  ;;  %4332 = vst [vmem:[%s5557_s18 + $0x30] sm:$0xff] %v4280_v12   ;;  %v3474_v45 = vmul.f32 %v5151_v48, %v6583_v26  ;;  %v3415_v5 = vmax.f32 %v3376_v23, 1e-24 }
 0x4af   : > { %v3477_v57 = vmul.f32 %v5153_v9, %v6597_v0  ;;  %5162 = vrsqrt.f32 %v3412_v18 }
 0x4b0   : > { %3506 = vst [vmem:[%s5561_s0 + $0x98] sm:$0xff] %v3474_v45  ;;  %v4295_v3 = vpack.c.bf16 %v3474_v45, %v3473_v19  ;;  %5164 = vrsqrt.f32 %v3415_v5  ;;  %v3382_v4 = vpop.xlane.xlu0 %3381 }
 0x4b1   : > { %v5155_v36 = vpop.eup %5154  ;;  %3509 = vst [vmem:[%s5561_s0 + $0xb0] sm:$0xff] %v3477_v57  ;;  %v3418_v21 = vmax.f32 %v3382_v4, 1e-24  ;;  %v3384_v16 = vpop.xlane.xlu1 %3383 }
 0x4b2   : > { %v5157_v33 = vpop.eup %5156  ;;  %4335 = vst [vmem:[%s5557_s18 + $0x48] sm:$0xff] %v4295_v3   ;;  %v3472_v55 = vmul.f32 %v5155_v36, %v6593_v7  ;;  %v3419_v26 = vmax.f32 %v3384_v16, 1e-24 }
 0x4b3   : > { %v3475_v28 = vmul.f32 %v5157_v33, %v6607_v61  ;;  %5166 = vrsqrt.f32 %v3418_v21 }
 0x4b4   : > { %3504 = vst [vmem:[%s5561_s0 + $0x88] sm:$0xff] %v3472_v55  ;;  %v4290_v0 = vpack.c.bf16 %v3472_v55, %v3471_v43  ;;  %5168 = vrsqrt.f32 %v3419_v26  ;;  %v3378_v54 = vpop.xlane.xlu0 %3377 }
 0x4b5   : > { %v5159_v47 = vpop.eup %5158  ;;  %3507 = vst [vmem:[%s5561_s0 + $0xa0] sm:$0xff] %v3475_v28  ;;  %v3416_v17 = vmax.f32 %v3378_v54, 1e-24  ;;  %v3388_v58 = vpop.xlane.xlu1 %3387 }
 0x4b6   : > { %v5161_v32 = vpop.eup %5160  ;;  %4334 = vst [vmem:[%s5557_s18 + $0x40] sm:$0xff] %v4290_v0   ;;  %v3478_v20 = vmul.f32 %v5159_v47, %v6611_v41  ;;  %v3421_v7 = vmax.f32 %v3388_v58, 1e-24 }
 0x4b7   : > { %v3481_v61 = vmul.f32 %v5161_v32, %v6621_v39  ;;  %5170 = vrsqrt.f32 %v3416_v17 }
 0x4b8   : > { %3510 = vst [vmem:[%s5561_s0 + $0xb8] sm:$0xff] %v3478_v20  ;;  %v4305_v37 = vpack.c.bf16 %v3478_v20, %v3477_v57  ;;  %5172 = vrsqrt.f32 %v3421_v7  ;;  %v3386_v40 = vpop.xlane.xlu0 %3385 }
 0x4b9   : > { %v5163_v44 = vpop.eup %5162  ;;  %3513 = vst [vmem:[%s5561_s0 + $0xd0] sm:$0xff] %v3481_v61  ;;  %v3420_v59 = vmax.f32 %v3386_v40, 1e-24 }
 0x4ba   : > { %v5165_v1 = vpop.eup %5164  ;;  %4337 = vst [vmem:[%s5557_s18 + $0x58] sm:$0xff] %v4305_v37   ;;  %v3476_v51 = vmul.f32 %v5163_v44, %v6625_v50 }
 0x4bb   : > { %v3479_v41 = vmul.f32 %v5165_v1, %v6635_v14  ;;  %5174 = vrsqrt.f32 %v3420_v59 }
 0x4bc   : > { %3508 = vst [vmem:[%s5561_s0 + $0xa8] sm:$0xff] %v3476_v51  ;;  %v4300_v39 = vpack.c.bf16 %v3476_v51, %v3475_v28  ;;  %v3390_v27 = vpop.xlane.xlu0 %3389 }
 0x4bd   : > { %v5167_v11 = vpop.eup %5166  ;;  %3511 = vst [vmem:[%s5561_s0 + $0xc0] sm:$0xff] %v3479_v41  ;;  %v3422_v60 = vmax.f32 %v3390_v27, 1e-24 }
 0x4be   : > { %v5169_v8 = vpop.eup %5168  ;;  %4336 = vst [vmem:[%s5557_s18 + $0x50] sm:$0xff] %v4300_v39   ;;  %v3482_v6 = vmul.f32 %v5167_v11, %v6639_v42 }
 0x4bf   : > { %v3483_v50 = vmul.f32 %v5169_v8, %v6653_v25  ;;  %5176 = vrsqrt.f32 %v3422_v60 }
 0x4c0   : > { %3514 = vst [vmem:[%s5561_s0 + $0xd8] sm:$0xff] %v3482_v6  ;;  %v4315_v14 = vpack.c.bf16 %v3482_v6, %v3481_v61 }
 0x4c1   : > { %v5171_v2 = vpop.eup %5170  ;;  %3515 = vst [vmem:[%s5561_s0 + $0xe0] sm:$0xff] %v3483_v50 }
 0x4c2   : > { %v5173_v34 = vpop.eup %5172  ;;  %4339 = vst [vmem:[%s5557_s18 + $0x68] sm:$0xff] %v4315_v14   ;;  %v3480_v53 = vmul.f32 %v5171_v2, %v6649_v15 }
 0x4c3   : > { %v3485_v63 = vmul.f32 %v5173_v34, %v6667_v46 }
 0x4c4   : > { %3512 = vst [vmem:[%s5561_s0 + $0xc8] sm:$0xff] %v3480_v53  ;;  %v4310_v13 = vpack.c.bf16 %v3480_v53, %v3479_v41 }
 0x4c5   : > { %v5175_v42 = vpop.eup %5174  ;;  %3517 = vst [vmem:[%s5561_s0 + $0xf0] sm:$0xff] %v3485_v63 }
 0x4c6   : > { %4338 = vst [vmem:[%s5557_s18 + $0x60] sm:$0xff] %v4310_v13   ;;  %v3484_v25 = vmul.f32 %v5175_v42, %v6663_v49 }
 0x4c8   : > { %3516 = vst [vmem:[%s5561_s0 + $0xe8] sm:$0xff] %v3484_v25  ;;  %v4320_v30 = vpack.c.bf16 %v3484_v25, %v3483_v50 }
 0x4c9   : > { %v5177_v19 = vpop.eup %5176 }
 0x4ca   : > { %4340 = vst [vmem:[%s5557_s18 + $0x70] sm:$0xff] %v4320_v30   ;;  %v3486_v31 = vmul.f32 %v5177_v19, %v6675_v24 }
 0x4cc   : > { %3518 = vst [vmem:[%s5561_s0 + $0xf8] sm:$0xff] %v3486_v31  ;;  %v4325_v10 = vpack.c.bf16 %v3486_v31, %v3485_v63 }
 0x4ce   : > { %4341 = vst [vmem:[%s5557_s18 + $0x78] sm:$0xff] %v4325_v10  }
 0x4cf PF: > { %3690 = sbr.rel (!%p5388_p9) target bundleno = 1249 (0x4e1), region = 83  ;;  %s4246_s28 = sshll.u32 (%p5388_p9), %s5241_s23, 8  ;;  %v3783_v15 = vld [vmem:[%s5561_s0] sm:$0xff] (%p5388_p9)  ;;  %v3785_v49 = vld [vmem:[%s5561_s0 + $0x8] sm:$0xff] (%p5388_p9)  ;;  %v3787_v46 = vld [vmem:[%s5561_s0 + $0x10] sm:$0xff] (%p5388_p9) }
 0x4d0   : > { %s6768_s18 = scalar_lea.vmem (%p5388_p9), %s5318_s17, %s4246_s28  ;;  %v3789_v24 = vld [vmem:[%s5561_s0 + $0x18] sm:$0xff] (%p5388_p9)  ;;  %v3791_v62 = vld [vmem:[%s5561_s0 + $0x20] sm:$0xff] (%p5388_p9)  ;;  %v3793_v35 = vld [vmem:[%s5561_s0 + $0x28] sm:$0xff] (%p5388_p9) }
 0x4d1   : > { %3784 = vst [vmem:[%s6768_s18] sm:$0xff] (%p5388_p9), %v3783_v15  ;;  %3786 = vst [vmem:[%s6768_s18 + $0x8] sm:$0xff] (%p5388_p9), %v3785_v49  ;;  %v3795_v56 = vld [vmem:[%s5561_s0 + $0x30] sm:$0xff] (%p5388_p9)  ;;  %v3797_v52 = vld [vmem:[%s5561_s0 + $0x38] sm:$0xff] (%p5388_p9) }
 0x4d2   : > { %3788 = vst [vmem:[%s6768_s18 + $0x10] sm:$0xff] (%p5388_p9), %v3787_v46  ;;  %3790 = vst [vmem:[%s6768_s18 + $0x18] sm:$0xff] (%p5388_p9), %v3789_v24  ;;  %v3799_v22 = vld [vmem:[%s5561_s0 + $0x40] sm:$0xff] (%p5388_p9)  ;;  %v3801_v29 = vld [vmem:[%s5561_s0 + $0x48] sm:$0xff] (%p5388_p9) }
 0x4d3   : > { %3792 = vst [vmem:[%s6768_s18 + $0x20] sm:$0xff] (%p5388_p9), %v3791_v62  ;;  %3794 = vst [vmem:[%s6768_s18 + $0x28] sm:$0xff] (%p5388_p9), %v3793_v35  ;;  %v3803_v43 = vld [vmem:[%s5561_s0 + $0x50] sm:$0xff] (%p5388_p9)  ;;  %v3805_v12 = vld [vmem:[%s5561_s0 + $0x58] sm:$0xff] (%p5388_p9) }
 0x4d4   : > { %3796 = vst [vmem:[%s6768_s18 + $0x30] sm:$0xff] (%p5388_p9), %v3795_v56  ;;  %3798 = vst [vmem:[%s6768_s18 + $0x38] sm:$0xff] (%p5388_p9), %v3797_v52  ;;  %v3807_v38 = vld [vmem:[%s5561_s0 + $0x60] sm:$0xff] (%p5388_p9)  ;;  %v3809_v48 = vld [vmem:[%s5561_s0 + $0x68] sm:$0xff] (%p5388_p9) }
 0x4d5   : > { %3800 = vst [vmem:[%s6768_s18 + $0x40] sm:$0xff] (%p5388_p9), %v3799_v22  ;;  %3802 = vst [vmem:[%s6768_s18 + $0x48] sm:$0xff] (%p5388_p9), %v3801_v29  ;;  %v3811_v18 = vld [vmem:[%s5561_s0 + $0x70] sm:$0xff] (%p5388_p9)  ;;  %v3813_v23 = vld [vmem:[%s5561_s0 + $0x78] sm:$0xff] (%p5388_p9) }
 0x4d6   : > { %3804 = vst [vmem:[%s6768_s18 + $0x50] sm:$0xff] %v3803_v43  ;;  %3806 = vst [vmem:[%s6768_s18 + $0x58] sm:$0xff] %v3805_v12  ;;  %v3815_v9 = vld [vmem:[%s5561_s0 + $0x80] sm:$0xff]  ;;  %v3817_v45 = vld [vmem:[%s5561_s0 + $0x88] sm:$0xff] }
 0x4d7   : > { %3808 = vst [vmem:[%s6768_s18 + $0x60] sm:$0xff] %v3807_v38  ;;  %3810 = vst [vmem:[%s6768_s18 + $0x68] sm:$0xff] %v3809_v48  ;;  %v3819_v5 = vld [vmem:[%s5561_s0 + $0x90] sm:$0xff]  ;;  %v3821_v57 = vld [vmem:[%s5561_s0 + $0x98] sm:$0xff] }
 0x4d8   : > { %3812 = vst [vmem:[%s6768_s18 + $0x70] sm:$0xff] %v3811_v18  ;;  %3814 = vst [vmem:[%s6768_s18 + $0x78] sm:$0xff] %v3813_v23  ;;  %v3823_v3 = vld [vmem:[%s5561_s0 + $0xa0] sm:$0xff]  ;;  %v3825_v4 = vld [vmem:[%s5561_s0 + $0xa8] sm:$0xff] }
 0x4d9   : > { %3816 = vst [vmem:[%s6768_s18 + $0x80] sm:$0xff] %v3815_v9  ;;  %3818 = vst [vmem:[%s6768_s18 + $0x88] sm:$0xff] %v3817_v45  ;;  %v3827_v36 = vld [vmem:[%s5561_s0 + $0xb0] sm:$0xff]  ;;  %v3829_v21 = vld [vmem:[%s5561_s0 + $0xb8] sm:$0xff] }
 0x4da   : > { %3820 = vst [vmem:[%s6768_s18 + $0x90] sm:$0xff] %v3819_v5  ;;  %3822 = vst [vmem:[%s6768_s18 + $0x98] sm:$0xff] %v3821_v57  ;;  %v3831_v16 = vld [vmem:[%s5561_s0 + $0xc0] sm:$0xff]  ;;  %v3833_v33 = vld [vmem:[%s5561_s0 + $0xc8] sm:$0xff] }
 0x4db   : > { %3824 = vst [vmem:[%s6768_s18 + $0xa0] sm:$0xff] %v3823_v3  ;;  %3826 = vst [vmem:[%s6768_s18 + $0xa8] sm:$0xff] %v3825_v4  ;;  %v3835_v55 = vld [vmem:[%s5561_s0 + $0xd0] sm:$0xff]  ;;  %v3837_v26 = vld [vmem:[%s5561_s0 + $0xd8] sm:$0xff] }
 0x4dc   : > { %3828 = vst [vmem:[%s6768_s18 + $0xb0] sm:$0xff] %v3827_v36  ;;  %3830 = vst [vmem:[%s6768_s18 + $0xb8] sm:$0xff] %v3829_v21  ;;  %v3839_v28 = vld [vmem:[%s5561_s0 + $0xe0] sm:$0xff]  ;;  %v3841_v0 = vld [vmem:[%s5561_s0 + $0xe8] sm:$0xff] }
 0x4dd   : > { %3832 = vst [vmem:[%s6768_s18 + $0xc0] sm:$0xff] %v3831_v16  ;;  %3834 = vst [vmem:[%s6768_s18 + $0xc8] sm:$0xff] %v3833_v33  ;;  %v3843_v54 = vld [vmem:[%s5561_s0 + $0xf0] sm:$0xff]  ;;  %v3845_v47 = vld [vmem:[%s5561_s0 + $0xf8] sm:$0xff] }
 0x4de   : > { %3836 = vst [vmem:[%s6768_s18 + $0xd0] sm:$0xff] %v3835_v55  ;;  %3838 = vst [vmem:[%s6768_s18 + $0xd8] sm:$0xff] %v3837_v26 }
 0x4df   : > { %3840 = vst [vmem:[%s6768_s18 + $0xe0] sm:$0xff] %v3839_v28  ;;  %3842 = vst [vmem:[%s6768_s18 + $0xe8] sm:$0xff] %v3841_v0 }
 0x4e0   : > { %3844 = vst [vmem:[%s6768_s18 + $0xf0] sm:$0xff] %v3843_v54  ;;  %3846 = vst [vmem:[%s6768_s18 + $0xf8] sm:$0xff] %v3845_v47 }
 0x4e1 PF: > { %s24_s25 = sadd.s32 1, %s5253_s25   ;;  %s7003_s23 = sld [smem:[#allocation8_spill]] }
 0x4e2   : > { %p21_p3 = scmp.ge.s32.totalorder %s24_s25, 10   ;;  %s7004_s22 = sld [smem:[#allocation4_spill]] }
 0x4e3   : > { %s7005_s13 = sld [smem:[#allocation5_spill]]  ;;  %s7006_s24 = sld [smem:[#allocation6_spill]] }
 0x4e4   : > { %s7007_s1 = sld [smem:[#allocation7_spill]]  ;;  %s7008_s18 = smov %s5225_s19 }
 0x4e5   : > { %s7009_s19 = smov %s5393_s14  ;;  %s7010_s20 = smov %s5233_s21 }
 0x4e6   :  { %23 = sbr.rel (!%p21_p3) target bundleno = 8 (0x8), region = 173 }
 0x4e7   : > { %s7011_s21 = smov %s7003_s23 }
 0x4e9   : > { %s7012_s23 = smov %s7005_s13 }

</bundles_post_ra>
